<compile_context>
chip_gen: v7x
topology: tpu7x:2x2x1
jax: 0.10.0
libtpu: 0.0.40
codegen_flags: <defaults>
</compile_context>

<pallas_src>
import jax
import jax.numpy as jnp
from jax.experimental import pallas as pl
from jax.experimental.pallas import tpu as pltpu

_EPS = 1e-5  # nn.BatchNorm2d default eps
_VMEM_LIMIT = 32 * 1024 * 1024


def _round_up(x, m):
    return ((x + m - 1) // m) * m


def _vmem_budget_bytes():
    """Conservative per-call working-set budget, scaled by the chip's VMEM."""
    try:
        cap = pltpu.get_tpu_info().vmem_capacity_bytes
    except Exception:
        cap = 64 * 1024 * 1024  # assume the smallest (v7x-like) if query fails
    return max(2 * 1024 * 1024, min(cap // 8, 12 * 1024 * 1024))


def _pick_tile_rows(n_rows, row_in_bytes, row_out_bytes, resident_bytes, budget):
    """Largest row tile whose double-buffered in/out fits the VMEM budget."""
    avail = max(budget - resident_bytes, 1 << 20)
    t = avail // (2 * (row_in_bytes + row_out_bytes))
    t = max(8, min(int(t), 4096))
    t = (t // 8) * 8                                   # sublane multiple
    t = min(t, _round_up(max(n_rows, 1), 8))
    return max(t, 8)


# ----------------------------------------------------------------------------
# Pallas kernels
# ----------------------------------------------------------------------------

def _make_conv_kernel(r_valid, tile_r, with_stats):
    """matmul(patches, W) + bias; optionally accumulate full-batch sum/sumsq."""

    def kernel(p_ref, w_ref, b_ref, y_ref, *stat_refs):
        y = jnp.dot(p_ref[...], w_ref[...],
                    preferred_element_type=jnp.float32)            # (tile_r, C) f32
        y = y + b_ref[...]
        y_ref[...] = y.astype(y_ref.dtype)

        if with_stats:
            s_ref = stat_refs[0]

            @pl.when(pl.program_id(0) == 0)
            def _():
                s_ref[...] = jnp.zeros_like(s_ref)

            # Mask rows that are only batch padding so BN stats stay exact.
            row0 = pl.program_id(0) * tile_r
            rows = jax.lax.broadcasted_iota(jnp.int32, (tile_r, 1), 0) + row0
            ym = jnp.where(rows < r_valid, y, 0.0)
            upd = jnp.concatenate(
                [jnp.sum(ym, axis=0, keepdims=True),
                 jnp.sum(ym * ym, axis=0, keepdims=True)], axis=0)  # (2, C)
            s_ref[...] = s_ref[...] + upd

    return kernel


def _bn_relu_kernel(y_ref, scale_ref, shift_ref, a_ref):
    """Fused BatchNorm affine (precomputed scale/shift) + ReLU, elementwise."""
    y = y_ref[...].astype(jnp.float32)
    a = jnp.maximum(y * scale_ref[...] + shift_ref[...], 0.0)
    a_ref[...] = a.astype(a_ref.dtype)


# ----------------------------------------------------------------------------
# pallas_call wrappers
# ----------------------------------------------------------------------------

def _conv_rows(p, w, b, *, out_dtype, with_stats, budget):
    """y = p @ w + b, tiled over rows; optional (2, C) sum/sumsq accumulator."""
    r, k = p.shape
    c_out = w.shape[1]
    in_b = p.dtype.itemsize
    out_b = jnp.dtype(out_dtype).itemsize
    resident = k * c_out * w.dtype.itemsize + 8 * c_out * 4

    tile_r = _pick_tile_rows(r, k * in_b, c_out * out_b, resident, budget)
    r_pad = _round_up(r, tile_r)
    if r_pad != r:
        p = jnp.pad(p, ((0, r_pad - r), (0, 0)))
    grid = (r_pad // tile_r,)

    in_specs = [
        pl.BlockSpec((tile_r, k), lambda i: (i, 0)),       # streamed patch tile
        pl.BlockSpec((k, c_out), lambda i: (0, 0)),        # resident weight
        pl.BlockSpec((1, c_out), lambda i: (0, 0)),        # resident bias
    ]
    y_spec = pl.BlockSpec((tile_r, c_out), lambda i: (i, 0))
    flops = 2 * r_pad * k * c_out
    byt = (r_pad * k * in_b + k * c_out * w.dtype.itemsize
           + r_pad * c_out * out_b + 2 * c_out * 4)

    if with_stats:
        out_shape = (jax.ShapeDtypeStruct((r_pad, c_out), out_dtype),
                     jax.ShapeDtypeStruct((2, c_out), jnp.float32))
        out_specs = (y_spec, pl.BlockSpec((2, c_out), lambda i: (0, 0)))
        semantics = ("arbitrary",)     # resident stats accumulator across tiles
    else:
        out_shape = jax.ShapeDtypeStruct((r_pad, c_out), out_dtype)
        out_specs = y_spec
        semantics = ("parallel",)

    out = pl.pallas_call(
        _make_conv_kernel(r, tile_r, with_stats),
        grid=grid,
        in_specs=in_specs,
        out_specs=out_specs,
        out_shape=out_shape,
        compiler_params=pltpu.CompilerParams(
            dimension_semantics=semantics, vmem_limit_bytes=_VMEM_LIMIT),
        cost_estimate=pl.CostEstimate(flops=flops, transcendentals=0,
                                      bytes_accessed=byt),
    )(p, w, b)

    if with_stats:
        y, stats = out
        return y[:r], stats
    return out[:r], None


def _bn_relu_rows(y, scale, shift, *, budget):
    """Apply relu(y * scale + shift) row-tiled; scale/shift stay resident."""
    r, c = y.shape
    in_b = y.dtype.itemsize
    tile_r = _pick_tile_rows(r, c * in_b, c * 2, 4 * c * 4, budget)
    r_pad = _round_up(r, tile_r)
    if r_pad != r:
        y = jnp.pad(y, ((0, r_pad - r), (0, 0)))

    out = pl.pallas_call(
        _bn_relu_kernel,
        grid=(r_pad // tile_r,),
        in_specs=[pl.BlockSpec((tile_r, c), lambda i: (i, 0)),
                  pl.BlockSpec((1, c), lambda i: (0, 0)),
                  pl.BlockSpec((1, c), lambda i: (0, 0))],
        out_specs=pl.BlockSpec((tile_r, c), lambda i: (i, 0)),
        out_shape=jax.ShapeDtypeStruct((r_pad, c), jnp.bfloat16),
        compiler_params=pltpu.CompilerParams(
            dimension_semantics=("parallel",), vmem_limit_bytes=_VMEM_LIMIT),
        cost_estimate=pl.CostEstimate(flops=3 * r_pad * c, transcendentals=0,
                                      bytes_accessed=r_pad * c * (in_b + 2) + 2 * c * 4),
    )(y, scale, shift)
    return out[:r]


# ----------------------------------------------------------------------------
# Wrapper-side layout plumbing (im2col) and BN-stat finalization
# ----------------------------------------------------------------------------

def _patches_3x3_s2p1(a):
    """3x3 / stride-2 / pad-1 im2col of an NHWC map -> (N*Ho*Wo, 9*C)."""
    # TODO(synk): patch extraction (strided gather + zero pad) is layout plumbing
    # done in XLA; the conv compute itself runs in the Pallas matmul kernel.
    n, h, w, c = a.shape
    ho = (h + 2 - 3) // 2 + 1
    wo = (w + 2 - 3) // 2 + 1
    ap = jnp.pad(a, ((0, 0), (1, 1), (1, 1), (0, 0)))
    cols = []
    for kh in range(3):
        for kw in range(3):
            cols.append(jax.lax.slice(
                ap, (0, kh, kw, 0),
                (n, kh + 2 * (ho - 1) + 1, kw + 2 * (wo - 1) + 1, c),
                (1, 2, 2, 1)))
    patches = jnp.concatenate(cols, axis=-1)              # (n, ho, wo, 9c)
    return patches.reshape(n * ho * wo, 9 * c), (ho, wo)


def _finalize_stats(stats, count, gamma, beta, eps=_EPS):
    """(sum, sumsq) -> fused BN scale/shift (train-mode biased variance)."""
    mean = stats[0] / count
    var = jnp.maximum(stats[1] / count - mean * mean, 0.0)
    rstd = jax.lax.rsqrt(var + eps)
    scale = (gamma * rstd).astype(jnp.float32)
    shift = (beta - mean * scale).astype(jnp.float32)
    return scale.reshape(1, -1), shift.reshape(1, -1)


# ----------------------------------------------------------------------------
# Full forward pass
# ----------------------------------------------------------------------------

def net_simple_conv_forward(x_nchw, params):
    """x_nchw: (N, 3, 32, 32) float32 -> logits (N, numClass) float32."""
    budget = _vmem_budget_bytes()
    bf16 = jnp.bfloat16
    n = int(x_nchw.shape[0])
    num_class = params["b5"].shape[1]

    # NCHW -> NHWC so channels sit on the 128-lane axis inside the kernels.
    x = jnp.transpose(x_nchw.astype(jnp.float32), (0, 2, 3, 1))

    # ---- conv1_sub: Conv2d(3, c1, 3, s=2, p=1); no BN, no ReLU ----
    p, hw = _patches_3x3_s2p1(x.astype(bf16))
    y, stats = _conv_rows(p, params["w1"].astype(bf16), params["b1"],
                          out_dtype=bf16, with_stats=True, budget=budget)
    prev_c = params["w1"].shape[1]
    prev_hw = hw
    prev_gamma, prev_beta = params["gamma1"], params["beta1"]

    # ---- conv2..conv4_sub: BN -> ReLU -> Conv2d(3x3, s=2, p=1) ----
    for i in (2, 3, 4):
        count = n * prev_hw[0] * prev_hw[1]
        scale, shift = _finalize_stats(stats, count, prev_gamma, prev_beta)
        a = _bn_relu_rows(y, scale, shift, budget=budget)
        a = a.reshape(n, prev_hw[0], prev_hw[1], prev_c)
        p, hw = _patches_3x3_s2p1(a)
        y, stats = _conv_rows(p, params[f"w{i}"].astype(bf16), params[f"b{i}"],
                              out_dtype=bf16, with_stats=True, budget=budget)
        prev_c = params[f"w{i}"].shape[1]
        prev_hw = hw
        prev_gamma, prev_beta = params[f"gamma{i}"], params[f"beta{i}"]

    # ---- conv5_sub: BN -> ReLU -> Conv2d(c4, numClass, 2, s=1, p=0) ----
    assert prev_hw == (2, 2), "NetSimpleConv expects 32x32 spatial input"
    count = n * prev_hw[0] * prev_hw[1]
    scale, shift = _finalize_stats(stats, count, prev_gamma, prev_beta)
    a = _bn_relu_rows(y, scale, shift, budget=budget)
    a = a.reshape(n, prev_hw[0] * prev_hw[1] * prev_c)        # (n, 2*2*c4)

    c_pad = _round_up(num_class, 128)                         # lane-dense logits
    w5 = jnp.pad(params["w5"], ((0, 0), (0, c_pad - num_class))).astype(bf16)
    b5 = jnp.pad(params["b5"], ((0, 0), (0, c_pad - num_class)))
    logits, _ = _conv_rows(a, w5, b5, out_dtype=jnp.float32,
                           with_stats=False, budget=budget)
    # == x.squeeze(3).squeeze(2) in the PyTorch module.
    return logits[:, :num_class]


# ----------------------------------------------------------------------------
# Parameter init mirroring init_convnet(init_scale, 'const_norm', affine=True)
# ----------------------------------------------------------------------------

def init_params(key, hidden_size, num_class, init_scale=1.0):
    c1, c2, c3, c4 = hidden_size, 2 * hidden_size, 4 * hidden_size, 8 * hidden_size
    # (fan_in = C_in * kh * kw, C_out) for each conv, weights stored as
    # (kh*kw*C_in, C_out) matmul matrices (the im2col patch layout).
    dims = [(3 * 3 * 3, c1), (3 * 3 * c1, c2), (3 * 3 * c2, c3),
            (3 * 3 * c3, c4), (2 * 2 * c4, num_class)]
    keys = jax.random.split(key, 2 * len(dims))
    params = {}
    for i, (k_in, c_out) in enumerate(dims):
        # const_norm: normal(std=0.05) rescaled to Frobenius norm == init_scale
        w = jax.random.normal(keys[2 * i], (k_in, c_out), jnp.float32) * 0.05
        w = init_scale * w / jnp.linalg.norm(w)
        # conv biases keep PyTorch's default U(-1/sqrt(fan_in), 1/sqrt(fan_in))
        bound = 1.0 / jnp.sqrt(jnp.float32(k_in))
        b = jax.random.uniform(keys[2 * i + 1], (1, c_out), jnp.float32, -bound, bound)
        params[f"w{i + 1}"] = w
        params[f"b{i + 1}"] = b
    # BatchNorm2d affine params set by init_convnet: weight=1, bias=0
    for i, c in enumerate((c1, c2, c3, c4), start=1):
        params[f"gamma{i}"] = jnp.ones((c,), jnp.float32)
        params[f"beta{i}"] = jnp.zeros((c,), jnp.float32)
    return params


if __name__ == "__main__":
    key = jax.random.PRNGKey(0)
    kx, kp = jax.random.split(key)

    hidden_size = 32
    num_class = 10
    x = jax.random.normal(kx, (2, 3, 32, 32), jnp.float32)   # 32x32 -> 1x1 spatial

    params = init_params(kp, hidden_size, num_class, init_scale=1.0)
    fwd = jax.jit(net_simple_conv_forward)
    out = fwd(x, params)
    jax.block_until_ready(out)

    assert out.shape == (2, num_class), out.shape
    assert out.dtype == jnp.float32
    assert bool(jnp.all(jnp.isfinite(out)))
    print("KERNEL_OK")
</pallas_src>

<mosaic_0001>
module attributes {stable_mosaic.version = 11 : i64} {
  func.func @kernel(%arg0: i32, %arg1: memref<512x27xbf16, #tpu.memory_space<vmem>>, %arg2: memref<27x32xbf16, #tpu.memory_space<vmem>>, %arg3: memref<1x32xf32, #tpu.memory_space<vmem>>, %arg4: memref<512x32xbf16, #tpu.memory_space<vmem>>, %arg5: memref<2x32xf32, #tpu.memory_space<vmem>>) attributes {dimension_semantics = [#tpu.dimension_semantics<arbitrary>], iteration_bounds = array<i64: 1>, scalar_prefetch = 0 : i64, scratch_operands = 0 : i64, tpu.core_type = #tpu.core_type<tc>, window_params = [{transform_indices = @transform_0, window_bounds = array<i64: 512, 27>}, {pipeline_mode = #tpu.pipeline_mode<synchronous>, transform_indices = @transform_1, window_bounds = array<i64: 27, 32>}, {pipeline_mode = #tpu.pipeline_mode<synchronous>, transform_indices = @transform_2, window_bounds = array<i64: 1, 32>}, {transform_indices = @transform_3, window_bounds = array<i64: 512, 32>}, {pipeline_mode = #tpu.pipeline_mode<synchronous>, transform_indices = @transform_4, window_bounds = array<i64: 2, 32>}]} {
    %c0 = arith.constant 0 : index
    %c0_0 = arith.constant 0 : index
    %0 = vector.load %arg1[%c0, %c0_0] : memref<512x27xbf16, #tpu.memory_space<vmem>>, vector<512x27xbf16>
    %c0_1 = arith.constant 0 : index
    %c0_2 = arith.constant 0 : index
    %1 = vector.load %arg2[%c0_1, %c0_2] : memref<27x32xbf16, #tpu.memory_space<vmem>>, vector<27x32xbf16>
    %cst = arith.constant dense<0.000000e+00> : vector<512x32xf32>
    %2 = tpu.matmul %0, %1, %cst {dimension_numbers = #tpu.dot_dimension_numbers<[1], [0], [0], [1], [0, 0, 1, 1], [], []>} : vector<512x27xbf16>, vector<27x32xbf16>, vector<512x32xf32> -> vector<512x32xf32>
    %c0_3 = arith.constant 0 : index
    %c0_4 = arith.constant 0 : index
    %3 = vector.load %arg3[%c0_3, %c0_4] : memref<1x32xf32, #tpu.memory_space<vmem>>, vector<1x32xf32>
    %4 = vector.broadcast %3 : vector<1x32xf32> to vector<512x32xf32>
    %5 = arith.addf %2, %4 : vector<512x32xf32>
    %6 = arith.truncf %5 : vector<512x32xf32> to vector<512x32xbf16>
    %c0_5 = arith.constant 0 : index
    %c0_6 = arith.constant 0 : index
    %7 = vector.load %arg4[%c0_5, %c0_6] : memref<512x32xbf16, #tpu.memory_space<vmem>>, vector<512x32xbf16>
    tpu.vector_store %arg4[%c0_5, %c0_6], %6 {strides = array<i32>} : memref<512x32xbf16, #tpu.memory_space<vmem>>, vector<512x32xbf16>,
    %c0_i32 = arith.constant 0 : i32
    %8 = arith.cmpi eq, %arg0, %c0_i32 : i32
    %9 = arith.extui %8 : i1 to i32
    %c0_i32_7 = arith.constant 0 : i32
    %10 = arith.cmpi ne, %9, %c0_i32_7 : i32
    scf.if %10 {
      %cst_16 = arith.constant 0.000000e+00 : f32
      %30 = vector.broadcast %cst_16 : f32 to vector<2x32xf32>
      %c0_17 = arith.constant 0 : index
      %c0_18 = arith.constant 0 : index
      %31 = vector.load %arg5[%c0_17, %c0_18] : memref<2x32xf32, #tpu.memory_space<vmem>>, vector<2x32xf32>
      tpu.vector_store %arg5[%c0_17, %c0_18], %30 {strides = array<i32>} : memref<2x32xf32, #tpu.memory_space<vmem>>, vector<2x32xf32>,
    } else {
    }
    %c512_i32 = arith.constant 512 : i32
    %11 = arith.muli %arg0, %c512_i32 : i32
    %12 = tpu.iota {dimensions = array<i32: 0>} : vector<512x1xi32>
    %13 = vector.broadcast %11 : i32 to vector<512x1xi32>
    %14 = arith.addi %12, %13 : vector<512x1xi32>
    %c512_i32_8 = arith.constant 512 : i32
    %15 = vector.broadcast %c512_i32_8 : i32 to vector<512x1xi32>
    %16 = arith.cmpi slt, %14, %15 : vector<512x1xi32>
    %cst_9 = arith.constant 0.000000e+00 : f32
    %17 = vector.shape_cast %16 : vector<512x1xi1> to vector<512x1xi1>
    %18 = vector.broadcast %17 : vector<512x1xi1> to vector<512x32xi1>
    %19 = vector.broadcast %cst_9 : f32 to vector<512x32xf32>
    %20 = arith.select %18, %5, %19 : vector<512x32xi1>, vector<512x32xf32>
    %cst_10 = arith.constant dense<0.000000e+00> : vector<32xf32>
    %21 = vector.multi_reduction <add>, %20, %cst_10 [0] : vector<512x32xf32> to vector<32xf32>
    %22 = vector.shape_cast %21 : vector<32xf32> to vector<1x32xf32>
    %23 = arith.mulf %20, %20 : vector<512x32xf32>
    %cst_11 = arith.constant dense<0.000000e+00> : vector<32xf32>
    %24 = vector.multi_reduction <add>, %23, %cst_11 [0] : vector<512x32xf32> to vector<32xf32>
    %25 = vector.shape_cast %24 : vector<32xf32> to vector<1x32xf32>
    %26 = tpu.concatenate %22, %25 in 0 : vector<1x32xf32>, vector<1x32xf32> -> vector<2x32xf32>
    %c0_12 = arith.constant 0 : index
    %c0_13 = arith.constant 0 : index
    %27 = vector.load %arg5[%c0_12, %c0_13] : memref<2x32xf32, #tpu.memory_space<vmem>>, vector<2x32xf32>
    %28 = arith.addf %27, %26 : vector<2x32xf32>
    %c0_14 = arith.constant 0 : index
    %c0_15 = arith.constant 0 : index
    %29 = vector.load %arg5[%c0_14, %c0_15] : memref<2x32xf32, #tpu.memory_space<vmem>>, vector<2x32xf32>
    tpu.vector_store %arg5[%c0_14, %c0_15], %28 {strides = array<i32>} : memref<2x32xf32, #tpu.memory_space<vmem>>, vector<2x32xf32>,
    return
  }
  func.func @transform_0(%arg0: i32) -> (i32, i32) {
    %c0_i32 = arith.constant 0 : i32
    %c0_i32_0 = arith.constant 0 : i32
    return %arg0, %c0_i32 : i32, i32
  }
  func.func @transform_1(%arg0: i32) -> (i32, i32) {
    %c0_i32 = arith.constant 0 : i32
    %c0_i32_0 = arith.constant 0 : i32
    %c0_i32_1 = arith.constant 0 : i32
    return %c0_i32, %c0_i32_0 : i32, i32
  }
  func.func @transform_2(%arg0: i32) -> (i32, i32) {
    %c0_i32 = arith.constant 0 : i32
    %c0_i32_0 = arith.constant 0 : i32
    %c0_i32_1 = arith.constant 0 : i32
    return %c0_i32, %c0_i32_0 : i32, i32
  }
  func.func @transform_3(%arg0: i32) -> (i32, i32) {
    %c0_i32 = arith.constant 0 : i32
    %c0_i32_0 = arith.constant 0 : i32
    return %arg0, %c0_i32 : i32, i32
  }
  func.func @transform_4(%arg0: i32) -> (i32, i32) {
    %c0_i32 = arith.constant 0 : i32
    %c0_i32_0 = arith.constant 0 : i32
    %c0_i32_1 = arith.constant 0 : i32
    return %c0_i32, %c0_i32_0 : i32, i32
  }
}

module attributes {stable_mosaic.version = 11 : i64} {
  func.func @_bn_relu_kernel(%arg0: i32, %arg1: memref<512x32xbf16, #tpu.memory_space<vmem>>, %arg2: memref<1x32xf32, #tpu.memory_space<vmem>>, %arg3: memref<1x32xf32, #tpu.memory_space<vmem>>, %arg4: memref<512x32xbf16, #tpu.memory_space<vmem>>) attributes {dimension_semantics = [#tpu.dimension_semantics<parallel>], iteration_bounds = array<i64: 1>, scalar_prefetch = 0 : i64, scratch_operands = 0 : i64, tpu.core_type = #tpu.core_type<tc>, window_params = [{transform_indices = @transform_0, window_bounds = array<i64: 512, 32>}, {pipeline_mode = #tpu.pipeline_mode<synchronous>, transform_indices = @transform_1, window_bounds = array<i64: 1, 32>}, {pipeline_mode = #tpu.pipeline_mode<synchronous>, transform_indices = @transform_2, window_bounds = array<i64: 1, 32>}, {transform_indices = @transform_3, window_bounds = array<i64: 512, 32>}]} {
    %c0 = arith.constant 0 : index
    %c0_0 = arith.constant 0 : index
    %0 = vector.load %arg1[%c0, %c0_0] : memref<512x32xbf16, #tpu.memory_space<vmem>>, vector<512x32xbf16>
    %1 = arith.extf %0 : vector<512x32xbf16> to vector<512x32xf32>
    %c0_1 = arith.constant 0 : index
    %c0_2 = arith.constant 0 : index
    %2 = vector.load %arg2[%c0_1, %c0_2] : memref<1x32xf32, #tpu.memory_space<vmem>>, vector<1x32xf32>
    %3 = vector.broadcast %2 : vector<1x32xf32> to vector<512x32xf32>
    %4 = arith.mulf %1, %3 : vector<512x32xf32>
    %c0_3 = arith.constant 0 : index
    %c0_4 = arith.constant 0 : index
    %5 = vector.load %arg3[%c0_3, %c0_4] : memref<1x32xf32, #tpu.memory_space<vmem>>, vector<1x32xf32>
    %6 = vector.broadcast %5 : vector<1x32xf32> to vector<512x32xf32>
    %7 = arith.addf %4, %6 : vector<512x32xf32>
    %cst = arith.constant 0.000000e+00 : f32
    %8 = vector.broadcast %cst : f32 to vector<512x32xf32>
    %9 = arith.maximumf %7, %8 : vector<512x32xf32>
    %10 = arith.truncf %9 : vector<512x32xf32> to vector<512x32xbf16>
    %c0_5 = arith.constant 0 : index
    %c0_6 = arith.constant 0 : index
    %11 = vector.load %arg4[%c0_5, %c0_6] : memref<512x32xbf16, #tpu.memory_space<vmem>>, vector<512x32xbf16>
    tpu.vector_store %arg4[%c0_5, %c0_6], %10 {strides = array<i32>} : memref<512x32xbf16, #tpu.memory_space<vmem>>, vector<512x32xbf16>,
    return
  }
  func.func @transform_0(%arg0: i32) -> (i32, i32) {
    %c0_i32 = arith.constant 0 : i32
    %c0_i32_0 = arith.constant 0 : i32
    return %arg0, %c0_i32 : i32, i32
  }
  func.func @transform_1(%arg0: i32) -> (i32, i32) {
    %c0_i32 = arith.constant 0 : i32
    %c0_i32_0 = arith.constant 0 : i32
    %c0_i32_1 = arith.constant 0 : i32
    return %c0_i32, %c0_i32_0 : i32, i32
  }
  func.func @transform_2(%arg0: i32) -> (i32, i32) {
    %c0_i32 = arith.constant 0 : i32
    %c0_i32_0 = arith.constant 0 : i32
    %c0_i32_1 = arith.constant 0 : i32
    return %c0_i32, %c0_i32_0 : i32, i32
  }
  func.func @transform_3(%arg0: i32) -> (i32, i32) {
    %c0_i32 = arith.constant 0 : i32
    %c0_i32_0 = arith.constant 0 : i32
    return %arg0, %c0_i32 : i32, i32
  }
}

module attributes {stable_mosaic.version = 11 : i64} {
  func.func @_bn_relu_kernel(%arg0: i32, %arg1: memref<128x64xbf16, #tpu.memory_space<vmem>>, %arg2: memref<1x64xf32, #tpu.memory_space<vmem>>, %arg3: memref<1x64xf32, #tpu.memory_space<vmem>>, %arg4: memref<128x64xbf16, #tpu.memory_space<vmem>>) attributes {dimension_semantics = [#tpu.dimension_semantics<parallel>], iteration_bounds = array<i64: 1>, scalar_prefetch = 0 : i64, scratch_operands = 0 : i64, tpu.core_type = #tpu.core_type<tc>, window_params = [{transform_indices = @transform_0, window_bounds = array<i64: 128, 64>}, {pipeline_mode = #tpu.pipeline_mode<synchronous>, transform_indices = @transform_1, window_bounds = array<i64: 1, 64>}, {pipeline_mode = #tpu.pipeline_mode<synchronous>, transform_indices = @transform_2, window_bounds = array<i64: 1, 64>}, {transform_indices = @transform_3, window_bounds = array<i64: 128, 64>}]} {
    %c0 = arith.constant 0 : index
    %c0_0 = arith.constant 0 : index
    %0 = vector.load %arg1[%c0, %c0_0] : memref<128x64xbf16, #tpu.memory_space<vmem>>, vector<128x64xbf16>
    %1 = arith.extf %0 : vector<128x64xbf16> to vector<128x64xf32>
    %c0_1 = arith.constant 0 : index
    %c0_2 = arith.constant 0 : index
    %2 = vector.load %arg2[%c0_1, %c0_2] : memref<1x64xf32, #tpu.memory_space<vmem>>, vector<1x64xf32>
    %3 = vector.broadcast %2 : vector<1x64xf32> to vector<128x64xf32>
    %4 = arith.mulf %1, %3 : vector<128x64xf32>
    %c0_3 = arith.constant 0 : index
    %c0_4 = arith.constant 0 : index
    %5 = vector.load %arg3[%c0_3, %c0_4] : memref<1x64xf32, #tpu.memory_space<vmem>>, vector<1x64xf32>
    %6 = vector.broadcast %5 : vector<1x64xf32> to vector<128x64xf32>
    %7 = arith.addf %4, %6 : vector<128x64xf32>
    %cst = arith.constant 0.000000e+00 : f32
    %8 = vector.broadcast %cst : f32 to vector<128x64xf32>
    %9 = arith.maximumf %7, %8 : vector<128x64xf32>
    %10 = arith.truncf %9 : vector<128x64xf32> to vector<128x64xbf16>
    %c0_5 = arith.constant 0 : index
    %c0_6 = arith.constant 0 : index
    %11 = vector.load %arg4[%c0_5, %c0_6] : memref<128x64xbf16, #tpu.memory_space<vmem>>, vector<128x64xbf16>
    tpu.vector_store %arg4[%c0_5, %c0_6], %10 {strides = array<i32>} : memref<128x64xbf16, #tpu.memory_space<vmem>>, vector<128x64xbf16>,
    return
  }
  func.func @transform_0(%arg0: i32) -> (i32, i32) {
    %c0_i32 = arith.constant 0 : i32
    %c0_i32_0 = arith.constant 0 : i32
    return %arg0, %c0_i32 : i32, i32
  }
  func.func @transform_1(%arg0: i32) -> (i32, i32) {
    %c0_i32 = arith.constant 0 : i32
    %c0_i32_0 = arith.constant 0 : i32
    %c0_i32_1 = arith.constant 0 : i32
    return %c0_i32, %c0_i32_0 : i32, i32
  }
  func.func @transform_2(%arg0: i32) -> (i32, i32) {
    %c0_i32 = arith.constant 0 : i32
    %c0_i32_0 = arith.constant 0 : i32
    %c0_i32_1 = arith.constant 0 : i32
    return %c0_i32, %c0_i32_0 : i32, i32
  }
  func.func @transform_3(%arg0: i32) -> (i32, i32) {
    %c0_i32 = arith.constant 0 : i32
    %c0_i32_0 = arith.constant 0 : i32
    return %arg0, %c0_i32 : i32, i32
  }
}

module attributes {stable_mosaic.version = 11 : i64} {
  func.func @kernel(%arg0: i32, %arg1: memref<128x288xbf16, #tpu.memory_space<vmem>>, %arg2: memref<288x64xbf16, #tpu.memory_space<vmem>>, %arg3: memref<1x64xf32, #tpu.memory_space<vmem>>, %arg4: memref<128x64xbf16, #tpu.memory_space<vmem>>, %arg5: memref<2x64xf32, #tpu.memory_space<vmem>>) attributes {dimension_semantics = [#tpu.dimension_semantics<arbitrary>], iteration_bounds = array<i64: 1>, scalar_prefetch = 0 : i64, scratch_operands = 0 : i64, tpu.core_type = #tpu.core_type<tc>, window_params = [{transform_indices = @transform_0, window_bounds = array<i64: 128, 288>}, {pipeline_mode = #tpu.pipeline_mode<synchronous>, transform_indices = @transform_1, window_bounds = array<i64: 288, 64>}, {pipeline_mode = #tpu.pipeline_mode<synchronous>, transform_indices = @transform_2, window_bounds = array<i64: 1, 64>}, {transform_indices = @transform_3, window_bounds = array<i64: 128, 64>}, {pipeline_mode = #tpu.pipeline_mode<synchronous>, transform_indices = @transform_4, window_bounds = array<i64: 2, 64>}]} {
    %c0 = arith.constant 0 : index
    %c0_0 = arith.constant 0 : index
    %0 = vector.load %arg1[%c0, %c0_0] : memref<128x288xbf16, #tpu.memory_space<vmem>>, vector<128x288xbf16>
    %c0_1 = arith.constant 0 : index
    %c0_2 = arith.constant 0 : index
    %1 = vector.load %arg2[%c0_1, %c0_2] : memref<288x64xbf16, #tpu.memory_space<vmem>>, vector<288x64xbf16>
    %cst = arith.constant dense<0.000000e+00> : vector<128x64xf32>
    %2 = tpu.matmul %0, %1, %cst {dimension_numbers = #tpu.dot_dimension_numbers<[1], [0], [0], [1], [0, 0, 1, 1], [], []>} : vector<128x288xbf16>, vector<288x64xbf16>, vector<128x64xf32> -> vector<128x64xf32>
    %c0_3 = arith.constant 0 : index
    %c0_4 = arith.constant 0 : index
    %3 = vector.load %arg3[%c0_3, %c0_4] : memref<1x64xf32, #tpu.memory_space<vmem>>, vector<1x64xf32>
    %4 = vector.broadcast %3 : vector<1x64xf32> to vector<128x64xf32>
    %5 = arith.addf %2, %4 : vector<128x64xf32>
    %6 = arith.truncf %5 : vector<128x64xf32> to vector<128x64xbf16>
    %c0_5 = arith.constant 0 : index
    %c0_6 = arith.constant 0 : index
    %7 = vector.load %arg4[%c0_5, %c0_6] : memref<128x64xbf16, #tpu.memory_space<vmem>>, vector<128x64xbf16>
    tpu.vector_store %arg4[%c0_5, %c0_6], %6 {strides = array<i32>} : memref<128x64xbf16, #tpu.memory_space<vmem>>, vector<128x64xbf16>,
    %c0_i32 = arith.constant 0 : i32
    %8 = arith.cmpi eq, %arg0, %c0_i32 : i32
    %9 = arith.extui %8 : i1 to i32
    %c0_i32_7 = arith.constant 0 : i32
    %10 = arith.cmpi ne, %9, %c0_i32_7 : i32
    scf.if %10 {
      %cst_16 = arith.constant 0.000000e+00 : f32
      %30 = vector.broadcast %cst_16 : f32 to vector<2x64xf32>
      %c0_17 = arith.constant 0 : index
      %c0_18 = arith.constant 0 : index
      %31 = vector.load %arg5[%c0_17, %c0_18] : memref<2x64xf32, #tpu.memory_space<vmem>>, vector<2x64xf32>
      tpu.vector_store %arg5[%c0_17, %c0_18], %30 {strides = array<i32>} : memref<2x64xf32, #tpu.memory_space<vmem>>, vector<2x64xf32>,
    } else {
    }
    %c128_i32 = arith.constant 128 : i32
    %11 = arith.muli %arg0, %c128_i32 : i32
    %12 = tpu.iota {dimensions = array<i32: 0>} : vector<128x1xi32>
    %13 = vector.broadcast %11 : i32 to vector<128x1xi32>
    %14 = arith.addi %12, %13 : vector<128x1xi32>
    %c128_i32_8 = arith.constant 128 : i32
    %15 = vector.broadcast %c128_i32_8 : i32 to vector<128x1xi32>
    %16 = arith.cmpi slt, %14, %15 : vector<128x1xi32>
    %cst_9 = arith.constant 0.000000e+00 : f32
    %17 = vector.shape_cast %16 : vector<128x1xi1> to vector<128x1xi1>
    %18 = vector.broadcast %17 : vector<128x1xi1> to vector<128x64xi1>
    %19 = vector.broadcast %cst_9 : f32 to vector<128x64xf32>
    %20 = arith.select %18, %5, %19 : vector<128x64xi1>, vector<128x64xf32>
    %cst_10 = arith.constant dense<0.000000e+00> : vector<64xf32>
    %21 = vector.multi_reduction <add>, %20, %cst_10 [0] : vector<128x64xf32> to vector<64xf32>
    %22 = vector.shape_cast %21 : vector<64xf32> to vector<1x64xf32>
    %23 = arith.mulf %20, %20 : vector<128x64xf32>
    %cst_11 = arith.constant dense<0.000000e+00> : vector<64xf32>
    %24 = vector.multi_reduction <add>, %23, %cst_11 [0] : vector<128x64xf32> to vector<64xf32>
    %25 = vector.shape_cast %24 : vector<64xf32> to vector<1x64xf32>
    %26 = tpu.concatenate %22, %25 in 0 : vector<1x64xf32>, vector<1x64xf32> -> vector<2x64xf32>
    %c0_12 = arith.constant 0 : index
    %c0_13 = arith.constant 0 : index
    %27 = vector.load %arg5[%c0_12, %c0_13] : memref<2x64xf32, #tpu.memory_space<vmem>>, vector<2x64xf32>
    %28 = arith.addf %27, %26 : vector<2x64xf32>
    %c0_14 = arith.constant 0 : index
    %c0_15 = arith.constant 0 : index
    %29 = vector.load %arg5[%c0_14, %c0_15] : memref<2x64xf32, #tpu.memory_space<vmem>>, vector<2x64xf32>
    tpu.vector_store %arg5[%c0_14, %c0_15], %28 {strides = array<i32>} : memref<2x64xf32, #tpu.memory_space<vmem>>, vector<2x64xf32>,
    return
  }
  func.func @transform_0(%arg0: i32) -> (i32, i32) {
    %c0_i32 = arith.constant 0 : i32
    %c0_i32_0 = arith.constant 0 : i32
    return %arg0, %c0_i32 : i32, i32
  }
  func.func @transform_1(%arg0: i32) -> (i32, i32) {
    %c0_i32 = arith.constant 0 : i32
    %c0_i32_0 = arith.constant 0 : i32
    %c0_i32_1 = arith.constant 0 : i32
    return %c0_i32, %c0_i32_0 : i32, i32
  }
  func.func @transform_2(%arg0: i32) -> (i32, i32) {
    %c0_i32 = arith.constant 0 : i32
    %c0_i32_0 = arith.constant 0 : i32
    %c0_i32_1 = arith.constant 0 : i32
    return %c0_i32, %c0_i32_0 : i32, i32
  }
  func.func @transform_3(%arg0: i32) -> (i32, i32) {
    %c0_i32 = arith.constant 0 : i32
    %c0_i32_0 = arith.constant 0 : i32
    return %arg0, %c0_i32 : i32, i32
  }
  func.func @transform_4(%arg0: i32) -> (i32, i32) {
    %c0_i32 = arith.constant 0 : i32
    %c0_i32_0 = arith.constant 0 : i32
    %c0_i32_1 = arith.constant 0 : i32
    return %c0_i32, %c0_i32_0 : i32, i32
  }
}

module attributes {stable_mosaic.version = 11 : i64} {
  func.func @_bn_relu_kernel(%arg0: i32, %arg1: memref<32x128xbf16, #tpu.memory_space<vmem>>, %arg2: memref<1x128xf32, #tpu.memory_space<vmem>>, %arg3: memref<1x128xf32, #tpu.memory_space<vmem>>, %arg4: memref<32x128xbf16, #tpu.memory_space<vmem>>) attributes {dimension_semantics = [#tpu.dimension_semantics<parallel>], iteration_bounds = array<i64: 1>, scalar_prefetch = 0 : i64, scratch_operands = 0 : i64, tpu.core_type = #tpu.core_type<tc>, window_params = [{transform_indices = @transform_0, window_bounds = array<i64: 32, 128>}, {pipeline_mode = #tpu.pipeline_mode<synchronous>, transform_indices = @transform_1, window_bounds = array<i64: 1, 128>}, {pipeline_mode = #tpu.pipeline_mode<synchronous>, transform_indices = @transform_2, window_bounds = array<i64: 1, 128>}, {transform_indices = @transform_3, window_bounds = array<i64: 32, 128>}]} {
    %c0 = arith.constant 0 : index
    %c0_0 = arith.constant 0 : index
    %0 = vector.load %arg1[%c0, %c0_0] : memref<32x128xbf16, #tpu.memory_space<vmem>>, vector<32x128xbf16>
    %1 = arith.extf %0 : vector<32x128xbf16> to vector<32x128xf32>
    %c0_1 = arith.constant 0 : index
    %c0_2 = arith.constant 0 : index
    %2 = vector.load %arg2[%c0_1, %c0_2] : memref<1x128xf32, #tpu.memory_space<vmem>>, vector<1x128xf32>
    %3 = vector.broadcast %2 : vector<1x128xf32> to vector<32x128xf32>
    %4 = arith.mulf %1, %3 : vector<32x128xf32>
    %c0_3 = arith.constant 0 : index
    %c0_4 = arith.constant 0 : index
    %5 = vector.load %arg3[%c0_3, %c0_4] : memref<1x128xf32, #tpu.memory_space<vmem>>, vector<1x128xf32>
    %6 = vector.broadcast %5 : vector<1x128xf32> to vector<32x128xf32>
    %7 = arith.addf %4, %6 : vector<32x128xf32>
    %cst = arith.constant 0.000000e+00 : f32
    %8 = vector.broadcast %cst : f32 to vector<32x128xf32>
    %9 = arith.maximumf %7, %8 : vector<32x128xf32>
    %10 = arith.truncf %9 : vector<32x128xf32> to vector<32x128xbf16>
    %c0_5 = arith.constant 0 : index
    %c0_6 = arith.constant 0 : index
    %11 = vector.load %arg4[%c0_5, %c0_6] : memref<32x128xbf16, #tpu.memory_space<vmem>>, vector<32x128xbf16>
    tpu.vector_store %arg4[%c0_5, %c0_6], %10 {strides = array<i32>} : memref<32x128xbf16, #tpu.memory_space<vmem>>, vector<32x128xbf16>,
    return
  }
  func.func @transform_0(%arg0: i32) -> (i32, i32) {
    %c0_i32 = arith.constant 0 : i32
    %c0_i32_0 = arith.constant 0 : i32
    return %arg0, %c0_i32 : i32, i32
  }
  func.func @transform_1(%arg0: i32) -> (i32, i32) {
    %c0_i32 = arith.constant 0 : i32
    %c0_i32_0 = arith.constant 0 : i32
    %c0_i32_1 = arith.constant 0 : i32
    return %c0_i32, %c0_i32_0 : i32, i32
  }
  func.func @transform_2(%arg0: i32) -> (i32, i32) {
    %c0_i32 = arith.constant 0 : i32
    %c0_i32_0 = arith.constant 0 : i32
    %c0_i32_1 = arith.constant 0 : i32
    return %c0_i32, %c0_i32_0 : i32, i32
  }
  func.func @transform_3(%arg0: i32) -> (i32, i32) {
    %c0_i32 = arith.constant 0 : i32
    %c0_i32_0 = arith.constant 0 : i32
    return %arg0, %c0_i32 : i32, i32
  }
}

module attributes {stable_mosaic.version = 11 : i64} {
  func.func @kernel(%arg0: i32, %arg1: memref<32x576xbf16, #tpu.memory_space<vmem>>, %arg2: memref<576x128xbf16, #tpu.memory_space<vmem>>, %arg3: memref<1x128xf32, #tpu.memory_space<vmem>>, %arg4: memref<32x128xbf16, #tpu.memory_space<vmem>>, %arg5: memref<2x128xf32, #tpu.memory_space<vmem>>) attributes {dimension_semantics = [#tpu.dimension_semantics<arbitrary>], iteration_bounds = array<i64: 1>, scalar_prefetch = 0 : i64, scratch_operands = 0 : i64, tpu.core_type = #tpu.core_type<tc>, window_params = [{transform_indices = @transform_0, window_bounds = array<i64: 32, 576>}, {pipeline_mode = #tpu.pipeline_mode<synchronous>, transform_indices = @transform_1, window_bounds = array<i64: 576, 128>}, {pipeline_mode = #tpu.pipeline_mode<synchronous>, transform_indices = @transform_2, window_bounds = array<i64: 1, 128>}, {transform_indices = @transform_3, window_bounds = array<i64: 32, 128>}, {pipeline_mode = #tpu.pipeline_mode<synchronous>, transform_indices = @transform_4, window_bounds = array<i64: 2, 128>}]} {
    %c0 = arith.constant 0 : index
    %c0_0 = arith.constant 0 : index
    %0 = vector.load %arg1[%c0, %c0_0] : memref<32x576xbf16, #tpu.memory_space<vmem>>, vector<32x576xbf16>
    %c0_1 = arith.constant 0 : index
    %c0_2 = arith.constant 0 : index
    %1 = vector.load %arg2[%c0_1, %c0_2] : memref<576x128xbf16, #tpu.memory_space<vmem>>, vector<576x128xbf16>
    %cst = arith.constant dense<0.000000e+00> : vector<32x128xf32>
    %2 = tpu.matmul %0, %1, %cst {dimension_numbers = #tpu.dot_dimension_numbers<[1], [0], [0], [1], [0, 0, 1, 1], [], []>} : vector<32x576xbf16>, vector<576x128xbf16>, vector<32x128xf32> -> vector<32x128xf32>
    %c0_3 = arith.constant 0 : index
    %c0_4 = arith.constant 0 : index
    %3 = vector.load %arg3[%c0_3, %c0_4] : memref<1x128xf32, #tpu.memory_space<vmem>>, vector<1x128xf32>
    %4 = vector.broadcast %3 : vector<1x128xf32> to vector<32x128xf32>
    %5 = arith.addf %2, %4 : vector<32x128xf32>
    %6 = arith.truncf %5 : vector<32x128xf32> to vector<32x128xbf16>
    %c0_5 = arith.constant 0 : index
    %c0_6 = arith.constant 0 : index
    %7 = vector.load %arg4[%c0_5, %c0_6] : memref<32x128xbf16, #tpu.memory_space<vmem>>, vector<32x128xbf16>
    tpu.vector_store %arg4[%c0_5, %c0_6], %6 {strides = array<i32>} : memref<32x128xbf16, #tpu.memory_space<vmem>>, vector<32x128xbf16>,
    %c0_i32 = arith.constant 0 : i32
    %8 = arith.cmpi eq, %arg0, %c0_i32 : i32
    %9 = arith.extui %8 : i1 to i32
    %c0_i32_7 = arith.constant 0 : i32
    %10 = arith.cmpi ne, %9, %c0_i32_7 : i32
    scf.if %10 {
      %cst_16 = arith.constant 0.000000e+00 : f32
      %30 = vector.broadcast %cst_16 : f32 to vector<2x128xf32>
      %c0_17 = arith.constant 0 : index
      %c0_18 = arith.constant 0 : index
      %31 = vector.load %arg5[%c0_17, %c0_18] : memref<2x128xf32, #tpu.memory_space<vmem>>, vector<2x128xf32>
      tpu.vector_store %arg5[%c0_17, %c0_18], %30 {strides = array<i32>} : memref<2x128xf32, #tpu.memory_space<vmem>>, vector<2x128xf32>,
    } else {
    }
    %c32_i32 = arith.constant 32 : i32
    %11 = arith.muli %arg0, %c32_i32 : i32
    %12 = tpu.iota {dimensions = array<i32: 0>} : vector<32x1xi32>
    %13 = vector.broadcast %11 : i32 to vector<32x1xi32>
    %14 = arith.addi %12, %13 : vector<32x1xi32>
    %c32_i32_8 = arith.constant 32 : i32
    %15 = vector.broadcast %c32_i32_8 : i32 to vector<32x1xi32>
    %16 = arith.cmpi slt, %14, %15 : vector<32x1xi32>
    %cst_9 = arith.constant 0.000000e+00 : f32
    %17 = vector.shape_cast %16 : vector<32x1xi1> to vector<32x1xi1>
    %18 = vector.broadcast %17 : vector<32x1xi1> to vector<32x128xi1>
    %19 = vector.broadcast %cst_9 : f32 to vector<32x128xf32>
    %20 = arith.select %18, %5, %19 : vector<32x128xi1>, vector<32x128xf32>
    %cst_10 = arith.constant dense<0.000000e+00> : vector<128xf32>
    %21 = vector.multi_reduction <add>, %20, %cst_10 [0] : vector<32x128xf32> to vector<128xf32>
    %22 = vector.shape_cast %21 : vector<128xf32> to vector<1x128xf32>
    %23 = arith.mulf %20, %20 : vector<32x128xf32>
    %cst_11 = arith.constant dense<0.000000e+00> : vector<128xf32>
    %24 = vector.multi_reduction <add>, %23, %cst_11 [0] : vector<32x128xf32> to vector<128xf32>
    %25 = vector.shape_cast %24 : vector<128xf32> to vector<1x128xf32>
    %26 = tpu.concatenate %22, %25 in 0 : vector<1x128xf32>, vector<1x128xf32> -> vector<2x128xf32>
    %c0_12 = arith.constant 0 : index
    %c0_13 = arith.constant 0 : index
    %27 = vector.load %arg5[%c0_12, %c0_13] : memref<2x128xf32, #tpu.memory_space<vmem>>, vector<2x128xf32>
    %28 = arith.addf %27, %26 : vector<2x128xf32>
    %c0_14 = arith.constant 0 : index
    %c0_15 = arith.constant 0 : index
    %29 = vector.load %arg5[%c0_14, %c0_15] : memref<2x128xf32, #tpu.memory_space<vmem>>, vector<2x128xf32>
    tpu.vector_store %arg5[%c0_14, %c0_15], %28 {strides = array<i32>} : memref<2x128xf32, #tpu.memory_space<vmem>>, vector<2x128xf32>,
    return
  }
  func.func @transform_0(%arg0: i32) -> (i32, i32) {
    %c0_i32 = arith.constant 0 : i32
    %c0_i32_0 = arith.constant 0 : i32
    return %arg0, %c0_i32 : i32, i32
  }
  func.func @transform_1(%arg0: i32) -> (i32, i32) {
    %c0_i32 = arith.constant 0 : i32
    %c0_i32_0 = arith.constant 0 : i32
    %c0_i32_1 = arith.constant 0 : i32
    return %c0_i32, %c0_i32_0 : i32, i32
  }
  func.func @transform_2(%arg0: i32) -> (i32, i32) {
    %c0_i32 = arith.constant 0 : i32
    %c0_i32_0 = arith.constant 0 : i32
    %c0_i32_1 = arith.constant 0 : i32
    return %c0_i32, %c0_i32_0 : i32, i32
  }
  func.func @transform_3(%arg0: i32) -> (i32, i32) {
    %c0_i32 = arith.constant 0 : i32
    %c0_i32_0 = arith.constant 0 : i32
    return %arg0, %c0_i32 : i32, i32
  }
  func.func @transform_4(%arg0: i32) -> (i32, i32) {
    %c0_i32 = arith.constant 0 : i32
    %c0_i32_0 = arith.constant 0 : i32
    %c0_i32_1 = arith.constant 0 : i32
    return %c0_i32, %c0_i32_0 : i32, i32
  }
}

module attributes {stable_mosaic.version = 11 : i64} {
  func.func @kernel(%arg0: i32, %arg1: memref<8x1152xbf16, #tpu.memory_space<vmem>>, %arg2: memref<1152x256xbf16, #tpu.memory_space<vmem>>, %arg3: memref<1x256xf32, #tpu.memory_space<vmem>>, %arg4: memref<8x256xbf16, #tpu.memory_space<vmem>>, %arg5: memref<2x256xf32, #tpu.memory_space<vmem>>) attributes {dimension_semantics = [#tpu.dimension_semantics<arbitrary>], iteration_bounds = array<i64: 1>, scalar_prefetch = 0 : i64, scratch_operands = 0 : i64, tpu.core_type = #tpu.core_type<tc>, window_params = [{transform_indices = @transform_0, window_bounds = array<i64: 8, 1152>}, {pipeline_mode = #tpu.pipeline_mode<synchronous>, transform_indices = @transform_1, window_bounds = array<i64: 1152, 256>}, {pipeline_mode = #tpu.pipeline_mode<synchronous>, transform_indices = @transform_2, window_bounds = array<i64: 1, 256>}, {transform_indices = @transform_3, window_bounds = array<i64: 8, 256>}, {pipeline_mode = #tpu.pipeline_mode<synchronous>, transform_indices = @transform_4, window_bounds = array<i64: 2, 256>}]} {
    %c0 = arith.constant 0 : index
    %c0_0 = arith.constant 0 : index
    %0 = vector.load %arg1[%c0, %c0_0] : memref<8x1152xbf16, #tpu.memory_space<vmem>>, vector<8x1152xbf16>
    %c0_1 = arith.constant 0 : index
    %c0_2 = arith.constant 0 : index
    %1 = vector.load %arg2[%c0_1, %c0_2] : memref<1152x256xbf16, #tpu.memory_space<vmem>>, vector<1152x256xbf16>
    %cst = arith.constant dense<0.000000e+00> : vector<8x256xf32>
    %2 = tpu.matmul %0, %1, %cst {dimension_numbers = #tpu.dot_dimension_numbers<[1], [0], [0], [1], [0, 0, 1, 1], [], []>} : vector<8x1152xbf16>, vector<1152x256xbf16>, vector<8x256xf32> -> vector<8x256xf32>
    %c0_3 = arith.constant 0 : index
    %c0_4 = arith.constant 0 : index
    %3 = vector.load %arg3[%c0_3, %c0_4] : memref<1x256xf32, #tpu.memory_space<vmem>>, vector<1x256xf32>
    %4 = vector.broadcast %3 : vector<1x256xf32> to vector<8x256xf32>
    %5 = arith.addf %2, %4 : vector<8x256xf32>
    %6 = arith.truncf %5 : vector<8x256xf32> to vector<8x256xbf16>
    %c0_5 = arith.constant 0 : index
    %c0_6 = arith.constant 0 : index
    %7 = vector.load %arg4[%c0_5, %c0_6] : memref<8x256xbf16, #tpu.memory_space<vmem>>, vector<8x256xbf16>
    tpu.vector_store %arg4[%c0_5, %c0_6], %6 {strides = array<i32>} : memref<8x256xbf16, #tpu.memory_space<vmem>>, vector<8x256xbf16>,
    %c0_i32 = arith.constant 0 : i32
    %8 = arith.cmpi eq, %arg0, %c0_i32 : i32
    %9 = arith.extui %8 : i1 to i32
    %c0_i32_7 = arith.constant 0 : i32
    %10 = arith.cmpi ne, %9, %c0_i32_7 : i32
    scf.if %10 {
      %cst_16 = arith.constant 0.000000e+00 : f32
      %30 = vector.broadcast %cst_16 : f32 to vector<2x256xf32>
      %c0_17 = arith.constant 0 : index
      %c0_18 = arith.constant 0 : index
      %31 = vector.load %arg5[%c0_17, %c0_18] : memref<2x256xf32, #tpu.memory_space<vmem>>, vector<2x256xf32>
      tpu.vector_store %arg5[%c0_17, %c0_18], %30 {strides = array<i32>} : memref<2x256xf32, #tpu.memory_space<vmem>>, vector<2x256xf32>,
    } else {
    }
    %c8_i32 = arith.constant 8 : i32
    %11 = arith.muli %arg0, %c8_i32 : i32
    %12 = tpu.iota {dimensions = array<i32: 0>} : vector<8x1xi32>
    %13 = vector.broadcast %11 : i32 to vector<8x1xi32>
    %14 = arith.addi %12, %13 : vector<8x1xi32>
    %c8_i32_8 = arith.constant 8 : i32
    %15 = vector.broadcast %c8_i32_8 : i32 to vector<8x1xi32>
    %16 = arith.cmpi slt, %14, %15 : vector<8x1xi32>
    %cst_9 = arith.constant 0.000000e+00 : f32
    %17 = vector.shape_cast %16 : vector<8x1xi1> to vector<8x1xi1>
    %18 = vector.broadcast %17 : vector<8x1xi1> to vector<8x256xi1>
    %19 = vector.broadcast %cst_9 : f32 to vector<8x256xf32>
    %20 = arith.select %18, %5, %19 : vector<8x256xi1>, vector<8x256xf32>
    %cst_10 = arith.constant dense<0.000000e+00> : vector<256xf32>
    %21 = vector.multi_reduction <add>, %20, %cst_10 [0] : vector<8x256xf32> to vector<256xf32>
    %22 = vector.shape_cast %21 : vector<256xf32> to vector<1x256xf32>
    %23 = arith.mulf %20, %20 : vector<8x256xf32>
    %cst_11 = arith.constant dense<0.000000e+00> : vector<256xf32>
    %24 = vector.multi_reduction <add>, %23, %cst_11 [0] : vector<8x256xf32> to vector<256xf32>
    %25 = vector.shape_cast %24 : vector<256xf32> to vector<1x256xf32>
    %26 = tpu.concatenate %22, %25 in 0 : vector<1x256xf32>, vector<1x256xf32> -> vector<2x256xf32>
    %c0_12 = arith.constant 0 : index
    %c0_13 = arith.constant 0 : index
    %27 = vector.load %arg5[%c0_12, %c0_13] : memref<2x256xf32, #tpu.memory_space<vmem>>, vector<2x256xf32>
    %28 = arith.addf %27, %26 : vector<2x256xf32>
    %c0_14 = arith.constant 0 : index
    %c0_15 = arith.constant 0 : index
    %29 = vector.load %arg5[%c0_14, %c0_15] : memref<2x256xf32, #tpu.memory_space<vmem>>, vector<2x256xf32>
    tpu.vector_store %arg5[%c0_14, %c0_15], %28 {strides = array<i32>} : memref<2x256xf32, #tpu.memory_space<vmem>>, vector<2x256xf32>,
    return
  }
  func.func @transform_0(%arg0: i32) -> (i32, i32) {
    %c0_i32 = arith.constant 0 : i32
    %c0_i32_0 = arith.constant 0 : i32
    return %arg0, %c0_i32 : i32, i32
  }
  func.func @transform_1(%arg0: i32) -> (i32, i32) {
    %c0_i32 = arith.constant 0 : i32
    %c0_i32_0 = arith.constant 0 : i32
    %c0_i32_1 = arith.constant 0 : i32
    return %c0_i32, %c0_i32_0 : i32, i32
  }
  func.func @transform_2(%arg0: i32) -> (i32, i32) {
    %c0_i32 = arith.constant 0 : i32
    %c0_i32_0 = arith.constant 0 : i32
    %c0_i32_1 = arith.constant 0 : i32
    return %c0_i32, %c0_i32_0 : i32, i32
  }
  func.func @transform_3(%arg0: i32) -> (i32, i32) {
    %c0_i32 = arith.constant 0 : i32
    %c0_i32_0 = arith.constant 0 : i32
    return %arg0, %c0_i32 : i32, i32
  }
  func.func @transform_4(%arg0: i32) -> (i32, i32) {
    %c0_i32 = arith.constant 0 : i32
    %c0_i32_0 = arith.constant 0 : i32
    %c0_i32_1 = arith.constant 0 : i32
    return %c0_i32, %c0_i32_0 : i32, i32
  }
}

module attributes {stable_mosaic.version = 11 : i64} {
  func.func @_bn_relu_kernel(%arg0: i32, %arg1: memref<8x256xbf16, #tpu.memory_space<vmem>>, %arg2: memref<1x256xf32, #tpu.memory_space<vmem>>, %arg3: memref<1x256xf32, #tpu.memory_space<vmem>>, %arg4: memref<8x256xbf16, #tpu.memory_space<vmem>>) attributes {dimension_semantics = [#tpu.dimension_semantics<parallel>], iteration_bounds = array<i64: 1>, scalar_prefetch = 0 : i64, scratch_operands = 0 : i64, tpu.core_type = #tpu.core_type<tc>, window_params = [{transform_indices = @transform_0, window_bounds = array<i64: 8, 256>}, {pipeline_mode = #tpu.pipeline_mode<synchronous>, transform_indices = @transform_1, window_bounds = array<i64: 1, 256>}, {pipeline_mode = #tpu.pipeline_mode<synchronous>, transform_indices = @transform_2, window_bounds = array<i64: 1, 256>}, {transform_indices = @transform_3, window_bounds = array<i64: 8, 256>}]} {
    %c0 = arith.constant 0 : index
    %c0_0 = arith.constant 0 : index
    %0 = vector.load %arg1[%c0, %c0_0] : memref<8x256xbf16, #tpu.memory_space<vmem>>, vector<8x256xbf16>
    %1 = arith.extf %0 : vector<8x256xbf16> to vector<8x256xf32>
    %c0_1 = arith.constant 0 : index
    %c0_2 = arith.constant 0 : index
    %2 = vector.load %arg2[%c0_1, %c0_2] : memref<1x256xf32, #tpu.memory_space<vmem>>, vector<1x256xf32>
    %3 = vector.broadcast %2 : vector<1x256xf32> to vector<8x256xf32>
    %4 = arith.mulf %1, %3 : vector<8x256xf32>
    %c0_3 = arith.constant 0 : index
    %c0_4 = arith.constant 0 : index
    %5 = vector.load %arg3[%c0_3, %c0_4] : memref<1x256xf32, #tpu.memory_space<vmem>>, vector<1x256xf32>
    %6 = vector.broadcast %5 : vector<1x256xf32> to vector<8x256xf32>
    %7 = arith.addf %4, %6 : vector<8x256xf32>
    %cst = arith.constant 0.000000e+00 : f32
    %8 = vector.broadcast %cst : f32 to vector<8x256xf32>
    %9 = arith.maximumf %7, %8 : vector<8x256xf32>
    %10 = arith.truncf %9 : vector<8x256xf32> to vector<8x256xbf16>
    %c0_5 = arith.constant 0 : index
    %c0_6 = arith.constant 0 : index
    %11 = vector.load %arg4[%c0_5, %c0_6] : memref<8x256xbf16, #tpu.memory_space<vmem>>, vector<8x256xbf16>
    tpu.vector_store %arg4[%c0_5, %c0_6], %10 {strides = array<i32>} : memref<8x256xbf16, #tpu.memory_space<vmem>>, vector<8x256xbf16>,
    return
  }
  func.func @transform_0(%arg0: i32) -> (i32, i32) {
    %c0_i32 = arith.constant 0 : i32
    %c0_i32_0 = arith.constant 0 : i32
    return %arg0, %c0_i32 : i32, i32
  }
  func.func @transform_1(%arg0: i32) -> (i32, i32) {
    %c0_i32 = arith.constant 0 : i32
    %c0_i32_0 = arith.constant 0 : i32
    %c0_i32_1 = arith.constant 0 : i32
    return %c0_i32, %c0_i32_0 : i32, i32
  }
  func.func @transform_2(%arg0: i32) -> (i32, i32) {
    %c0_i32 = arith.constant 0 : i32
    %c0_i32_0 = arith.constant 0 : i32
    %c0_i32_1 = arith.constant 0 : i32
    return %c0_i32, %c0_i32_0 : i32, i32
  }
  func.func @transform_3(%arg0: i32) -> (i32, i32) {
    %c0_i32 = arith.constant 0 : i32
    %c0_i32_0 = arith.constant 0 : i32
    return %arg0, %c0_i32 : i32, i32
  }
}

module attributes {stable_mosaic.version = 11 : i64} {
  func.func @kernel(%arg0: i32, %arg1: memref<8x1024xbf16, #tpu.memory_space<vmem>>, %arg2: memref<1024x128xbf16, #tpu.memory_space<vmem>>, %arg3: memref<1x128xf32, #tpu.memory_space<vmem>>, %arg4: memref<8x128xf32, #tpu.memory_space<vmem>>) attributes {dimension_semantics = [#tpu.dimension_semantics<parallel>], iteration_bounds = array<i64: 1>, scalar_prefetch = 0 : i64, scratch_operands = 0 : i64, tpu.core_type = #tpu.core_type<tc>, window_params = [{transform_indices = @transform_0, window_bounds = array<i64: 8, 1024>}, {pipeline_mode = #tpu.pipeline_mode<synchronous>, transform_indices = @transform_1, window_bounds = array<i64: 1024, 128>}, {pipeline_mode = #tpu.pipeline_mode<synchronous>, transform_indices = @transform_2, window_bounds = array<i64: 1, 128>}, {transform_indices = @transform_3, window_bounds = array<i64: 8, 128>}]} {
    %c0 = arith.constant 0 : index
    %c0_0 = arith.constant 0 : index
    %0 = vector.load %arg1[%c0, %c0_0] : memref<8x1024xbf16, #tpu.memory_space<vmem>>, vector<8x1024xbf16>
    %c0_1 = arith.constant 0 : index
    %c0_2 = arith.constant 0 : index
    %1 = vector.load %arg2[%c0_1, %c0_2] : memref<1024x128xbf16, #tpu.memory_space<vmem>>, vector<1024x128xbf16>
    %cst = arith.constant dense<0.000000e+00> : vector<8x128xf32>
    %2 = tpu.matmul %0, %1, %cst {dimension_numbers = #tpu.dot_dimension_numbers<[1], [0], [0], [1], [0, 0, 1, 1], [], []>} : vector<8x1024xbf16>, vector<1024x128xbf16>, vector<8x128xf32> -> vector<8x128xf32>
    %c0_3 = arith.constant 0 : index
    %c0_4 = arith.constant 0 : index
    %3 = vector.load %arg3[%c0_3, %c0_4] : memref<1x128xf32, #tpu.memory_space<vmem>>, vector<1x128xf32>
    %4 = vector.broadcast %3 : vector<1x128xf32> to vector<8x128xf32>
    %5 = arith.addf %2, %4 : vector<8x128xf32>
    %c0_5 = arith.constant 0 : index
    %c0_6 = arith.constant 0 : index
    %6 = vector.load %arg4[%c0_5, %c0_6] : memref<8x128xf32, #tpu.memory_space<vmem>>, vector<8x128xf32>
    tpu.vector_store %arg4[%c0_5, %c0_6], %5 {strides = array<i32>} : memref<8x128xf32, #tpu.memory_space<vmem>>, vector<8x128xf32>,
    return
  }
  func.func @transform_0(%arg0: i32) -> (i32, i32) {
    %c0_i32 = arith.constant 0 : i32
    %c0_i32_0 = arith.constant 0 : i32
    return %arg0, %c0_i32 : i32, i32
  }
  func.func @transform_1(%arg0: i32) -> (i32, i32) {
    %c0_i32 = arith.constant 0 : i32
    %c0_i32_0 = arith.constant 0 : i32
    %c0_i32_1 = arith.constant 0 : i32
    return %c0_i32, %c0_i32_0 : i32, i32
  }
  func.func @transform_2(%arg0: i32) -> (i32, i32) {
    %c0_i32 = arith.constant 0 : i32
    %c0_i32_0 = arith.constant 0 : i32
    %c0_i32_1 = arith.constant 0 : i32
    return %c0_i32, %c0_i32_0 : i32, i32
  }
  func.func @transform_3(%arg0: i32) -> (i32, i32) {
    %c0_i32 = arith.constant 0 : i32
    %c0_i32_0 = arith.constant 0 : i32
    return %arg0, %c0_i32 : i32, i32
  }
}

</mosaic_0001>

<bundles_post_ra>
// kernel: net_simple_conv_forward.10
= control target key start
LH: loop header
LB: loop body
LE: loop exit
PB: predicated region body
PF: predicated region fallthrough
CT: control target
= control target key end

     0   :  { %vm604_vm0 = vcmask 257024   ;;  %s1472_s0 = inlined_call_operand.vmem [shape: bf16[512,32], index: 0, kind: input, shape index: {}]   ;;  %s1473_s1 = inlined_call_operand.vmem [shape: f32[1,32], index: 1, kind: input, shape index: {}]   ;;  %s1474_s2 = inlined_call_operand.vmem [shape: f32[1,32], index: 2, kind: input, shape index: {}]   ;;  %s1475_s3 = inlined_call_operand.vmem [shape: bf16[512,32], index: 3, kind: output, shape index: {}]  }
   0x1   :  { %v804_v0 = vld [vmem:[%s1472_s0] sm:$0xff]   ;;  %v931_v4 = vld [vmem:[%s1472_s0 + $0x8] sm:$0xff]   ;;  %v932_v5 = vld [vmem:[%s1472_s0 + $0x10] sm:$0xff]  }
   0x2   :  { %v988_v1 = vld [vmem:[%s1473_s1] ss:$0 sm:$0xff]  ;;  %v805_v2 = vunpack.c.l.bf16 %v804_v0  ;;  %v806_v3 = vunpack.c.h.bf16 %v804_v0  ;;  %v933_v6 = vld [vmem:[%s1472_s0 + $0x18] sm:$0xff]   ;;  %v809_v8 = vunpack.c.l.bf16 %v931_v4  ;;  %v810_v9 = vunpack.c.h.bf16 %v931_v4  ;;  %v935_v41 = vld [vmem:[%s1472_s0 + $0x28] sm:$0xff]  }
   0x3   :  { %v1002_v7 = vld [vmem:[%s1474_s2] ss:$0 sm:$0xff]  ;;  %v813_v10 = vunpack.c.l.bf16 %v932_v5  ;;  %v814_v11 = vunpack.c.h.bf16 %v932_v5  ;;  %v817_v14 = vunpack.c.l.bf16 %v933_v6  ;;  %v818_v15 = vunpack.c.h.bf16 %v933_v6  ;;  %v936_v42 = vld [vmem:[%s1472_s0 + $0x30] sm:$0xff]   ;;  %v937_v47 = vld [vmem:[%s1472_s0 + $0x38] sm:$0xff]  }
   0x4   :  { %v149_v12 = vmul.f32 %v805_v2, %v988_v1  ;;  %v150_v13 = vmul.f32 %v806_v3, %v988_v1  ;;  %v151_v16 = vmul.f32 %v809_v8, %v988_v1  ;;  %v152_v17 = vmul.f32 %v810_v9, %v988_v1  ;;  %v934_v36 = vld [vmem:[%s1472_s0 + $0x20] sm:$0xff]  }
   0x5   :  { %v153_v18 = vmul.f32 %v813_v10, %v988_v1  ;;  %v154_v19 = vmul.f32 %v814_v11, %v988_v1  ;;  %v155_v22 = vmul.f32 %v817_v14, %v988_v1  ;;  %v156_v23 = vmul.f32 %v818_v15, %v988_v1 }
   0x6   :  { %v220_v20 = vadd.f32 %v1002_v7, %v149_v12  ;;  %v221_v21 = vadd.f32 %v1002_v7, %v150_v13  ;;  %v222_v24 = vadd.f32 %v1002_v7, %v151_v16  ;;  %v223_v25 = vadd.f32 %v1002_v7, %v152_v17 }
   0x7   :  { %v224_v26 = vadd.f32 %v1002_v7, %v153_v18  ;;  %v225_v27 = vadd.f32 %v1002_v7, %v154_v19  ;;  %v226_v30 = vadd.f32 %v1002_v7, %v155_v22  ;;  %v227_v31 = vadd.f32 %v1002_v7, %v156_v23  ;;  %v938_v18 = vld [vmem:[%s1472_s0 + $0x40] sm:$0xff]   ;;  %v939_v23 = vld [vmem:[%s1472_s0 + $0x48] sm:$0xff]  }
   0x8   :  { %v284_v28 = vmax.f32 %v220_v20, 0.0  ;;  %v285_v29 = vmax.f32 %v221_v21, 0.0  ;;  %v286_v32 = vmax.f32 %v222_v24, 0.0  ;;  %v287_v33 = vmax.f32 %v223_v25, 0.0  ;;  %v940_v24 = vld [vmem:[%s1472_s0 + $0x50] sm:$0xff]  }
   0x9   :  { %v288_v34 = vmax.f32 %v224_v26, 0.0  ;;  %v289_v35 = vmax.f32 %v225_v27, 0.0  ;;  %v290_v39 = vmax.f32 %v226_v30, 0.0  ;;  %v291_v40 = vmax.f32 %v227_v31, 0.0 }
   0xa   :  { %v739_v37 = vpack.c.bf16 %v284_v28, %v284_v28  ;;  %v740_v38 = vpack.c.bf16 %v285_v29, %v285_v29  ;;  %v741_v43 = vpack.c.bf16 %v286_v32, %v286_v32  ;;  %v742_v44 = vpack.c.bf16 %v287_v33, %v287_v33  ;;  %v941_v29 = vld [vmem:[%s1472_s0 + $0x58] sm:$0xff]  }
   0xb   :  { %v743_v45 = vpack.c.bf16 %v288_v34, %v288_v34  ;;  %v744_v46 = vpack.c.bf16 %v289_v35, %v289_v35  ;;  %v745_v48 = vpack.c.bf16 %v290_v39, %v290_v39  ;;  %v746_v49 = vpack.c.bf16 %v291_v40, %v291_v40 }
   0xc   :  { %605 = vst.msk [vmem:[%s1475_s3] sm:$0xf] %vm604_vm0, %v739_v37  ;;  %606 = vst.msk [vmem:[%s1475_s3 + $0x4] sm:$0xf] %vm604_vm0, %v740_v38  ;;  %v821_v50 = vunpack.c.l.bf16 %v934_v36  ;;  %v822_v51 = vunpack.c.h.bf16 %v934_v36  ;;  %v825_v52 = vunpack.c.l.bf16 %v935_v41  ;;  %v826_v53 = vunpack.c.h.bf16 %v935_v41 }
   0xd   :  { %607 = vst.msk [vmem:[%s1475_s3 + $0x8] sm:$0xf] %vm604_vm0, %v741_v43  ;;  %608 = vst.msk [vmem:[%s1475_s3 + $0xc] sm:$0xf] %vm604_vm0, %v742_v44  ;;  %v829_v54 = vunpack.c.l.bf16 %v936_v42  ;;  %v830_v55 = vunpack.c.h.bf16 %v936_v42  ;;  %v833_v58 = vunpack.c.l.bf16 %v937_v47  ;;  %v834_v59 = vunpack.c.h.bf16 %v937_v47 }
   0xe   :  { %609 = vst.msk [vmem:[%s1475_s3 + $0x10] sm:$0xf] %vm604_vm0, %v743_v45  ;;  %610 = vst.msk [vmem:[%s1475_s3 + $0x14] sm:$0xf] %vm604_vm0, %v744_v46  ;;  %v157_v56 = vmul.f32 %v821_v50, %v988_v1  ;;  %v158_v57 = vmul.f32 %v822_v51, %v988_v1  ;;  %v159_v60 = vmul.f32 %v825_v52, %v988_v1  ;;  %v837_v32 = vunpack.c.l.bf16 %v938_v18 }
   0xf   :  { %611 = vst.msk [vmem:[%s1475_s3 + $0x18] sm:$0xf] %vm604_vm0, %v745_v48  ;;  %612 = vst.msk [vmem:[%s1475_s3 + $0x1c] sm:$0xf] %vm604_vm0, %v746_v49  ;;  %v160_v61 = vmul.f32 %v826_v53, %v988_v1  ;;  %v161_v62 = vmul.f32 %v829_v54, %v988_v1  ;;  %v162_v63 = vmul.f32 %v830_v55, %v988_v1  ;;  %v838_v33 = vunpack.c.h.bf16 %v938_v18 }
  0x10   :  { %v228_v0 = vadd.f32 %v1002_v7, %v157_v56  ;;  %v229_v2 = vadd.f32 %v1002_v7, %v158_v57  ;;  %v163_v3 = vmul.f32 %v833_v58, %v988_v1  ;;  %v164_v4 = vmul.f32 %v834_v59, %v988_v1 }
  0x11   :  { %v230_v5 = vadd.f32 %v1002_v7, %v159_v60  ;;  %v231_v6 = vadd.f32 %v1002_v7, %v160_v61  ;;  %v232_v8 = vadd.f32 %v1002_v7, %v161_v62  ;;  %v233_v9 = vadd.f32 %v1002_v7, %v162_v63  ;;  %v942_v62 = vld [vmem:[%s1472_s0 + $0x60] sm:$0xff]  }
  0x12   :  { %v292_v10 = vmax.f32 %v228_v0, 0.0  ;;  %v293_v11 = vmax.f32 %v229_v2, 0.0  ;;  %v234_v12 = vadd.f32 %v1002_v7, %v163_v3  ;;  %v235_v13 = vadd.f32 %v1002_v7, %v164_v4  ;;  %v943_v4 = vld [vmem:[%s1472_s0 + $0x68] sm:$0xff]  }
  0x13   :  { %v294_v14 = vmax.f32 %v230_v5, 0.0  ;;  %v295_v15 = vmax.f32 %v231_v6, 0.0  ;;  %v296_v16 = vmax.f32 %v232_v8, 0.0  ;;  %v297_v17 = vmax.f32 %v233_v9, 0.0  ;;  %v944_v5 = vld [vmem:[%s1472_s0 + $0x70] sm:$0xff]  }
  0x14   :  { %v747_v19 = vpack.c.bf16 %v292_v10, %v292_v10  ;;  %v748_v20 = vpack.c.bf16 %v293_v11, %v293_v11  ;;  %v298_v21 = vmax.f32 %v234_v12, 0.0  ;;  %v299_v22 = vmax.f32 %v235_v13, 0.0  ;;  %v945_v11 = vld [vmem:[%s1472_s0 + $0x78] sm:$0xff]  }
  0x15   :  { %v749_v25 = vpack.c.bf16 %v294_v14, %v294_v14  ;;  %v750_v26 = vpack.c.bf16 %v295_v15, %v295_v15  ;;  %v751_v27 = vpack.c.bf16 %v296_v16, %v296_v16  ;;  %v752_v28 = vpack.c.bf16 %v297_v17, %v297_v17 }
  0x16   :  { %613 = vst.msk [vmem:[%s1475_s3 + $0x20] sm:$0xf] %vm604_vm0, %v747_v19  ;;  %614 = vst.msk [vmem:[%s1475_s3 + $0x24] sm:$0xf] %vm604_vm0, %v748_v20  ;;  %v753_v30 = vpack.c.bf16 %v298_v21, %v298_v21  ;;  %v754_v31 = vpack.c.bf16 %v299_v22, %v299_v22  ;;  %v841_v34 = vunpack.c.l.bf16 %v939_v23  ;;  %v842_v35 = vunpack.c.h.bf16 %v939_v23 }
  0x17   :  { %615 = vst.msk [vmem:[%s1475_s3 + $0x28] sm:$0xf] %vm604_vm0, %v749_v25  ;;  %616 = vst.msk [vmem:[%s1475_s3 + $0x2c] sm:$0xf] %vm604_vm0, %v750_v26  ;;  %v845_v36 = vunpack.c.l.bf16 %v940_v24  ;;  %v846_v37 = vunpack.c.h.bf16 %v940_v24  ;;  %v165_v38 = vmul.f32 %v837_v32, %v988_v1  ;;  %v166_v39 = vmul.f32 %v838_v33, %v988_v1 }
  0x18   :  { %617 = vst.msk [vmem:[%s1475_s3 + $0x30] sm:$0xf] %vm604_vm0, %v751_v27  ;;  %618 = vst.msk [vmem:[%s1475_s3 + $0x34] sm:$0xf] %vm604_vm0, %v752_v28  ;;  %v849_v40 = vunpack.c.l.bf16 %v941_v29  ;;  %v850_v41 = vunpack.c.h.bf16 %v941_v29  ;;  %v167_v42 = vmul.f32 %v841_v34, %v988_v1  ;;  %v168_v43 = vmul.f32 %v842_v35, %v988_v1 }
  0x19   :  { %619 = vst.msk [vmem:[%s1475_s3 + $0x38] sm:$0xf] %vm604_vm0, %v753_v30  ;;  %620 = vst.msk [vmem:[%s1475_s3 + $0x3c] sm:$0xf] %vm604_vm0, %v754_v31  ;;  %v169_v44 = vmul.f32 %v845_v36, %v988_v1  ;;  %v170_v45 = vmul.f32 %v846_v37, %v988_v1  ;;  %v236_v46 = vadd.f32 %v1002_v7, %v165_v38  ;;  %v853_v14 = vunpack.c.l.bf16 %v942_v62 }
  0x1a   :  { %v237_v47 = vadd.f32 %v1002_v7, %v166_v39  ;;  %v171_v48 = vmul.f32 %v849_v40, %v988_v1  ;;  %v172_v49 = vmul.f32 %v850_v41, %v988_v1  ;;  %v238_v50 = vadd.f32 %v1002_v7, %v167_v42 }
  0x1b   :  { %v239_v51 = vadd.f32 %v1002_v7, %v168_v43  ;;  %v240_v52 = vadd.f32 %v1002_v7, %v169_v44  ;;  %v241_v53 = vadd.f32 %v1002_v7, %v170_v45  ;;  %v300_v54 = vmax.f32 %v236_v46, 0.0  ;;  %v946_v44 = vld [vmem:[%s1472_s0 + $0x80] sm:$0xff]  }
  0x1c   :  { %v301_v55 = vmax.f32 %v237_v47, 0.0  ;;  %v242_v56 = vadd.f32 %v1002_v7, %v171_v48  ;;  %v243_v57 = vadd.f32 %v1002_v7, %v172_v49  ;;  %v302_v58 = vmax.f32 %v238_v50, 0.0  ;;  %v947_v49 = vld [vmem:[%s1472_s0 + $0x88] sm:$0xff]   ;;  %v948_v50 = vld [vmem:[%s1472_s0 + $0x90] sm:$0xff]  }
  0x1d   :  { %v303_v59 = vmax.f32 %v239_v51, 0.0  ;;  %v304_v60 = vmax.f32 %v240_v52, 0.0  ;;  %v305_v61 = vmax.f32 %v241_v53, 0.0  ;;  %v755_v63 = vpack.c.bf16 %v300_v54, %v300_v54 }
  0x1e   :  { %v756_v0 = vpack.c.bf16 %v301_v55, %v301_v55  ;;  %v306_v2 = vmax.f32 %v242_v56, 0.0  ;;  %v307_v3 = vmax.f32 %v243_v57, 0.0  ;;  %v757_v6 = vpack.c.bf16 %v302_v58, %v302_v58  ;;  %v949_v55 = vld [vmem:[%s1472_s0 + $0x98] sm:$0xff]  }
  0x1f   :  { %v758_v8 = vpack.c.bf16 %v303_v59, %v303_v59  ;;  %v759_v9 = vpack.c.bf16 %v304_v60, %v304_v60  ;;  %v760_v10 = vpack.c.bf16 %v305_v61, %v305_v61  ;;  %621 = vst.msk [vmem:[%s1475_s3 + $0x40] sm:$0xf] %vm604_vm0, %v755_v63  ;;  %v854_v15 = vunpack.c.h.bf16 %v942_v62 }
  0x20   :  { %622 = vst.msk [vmem:[%s1475_s3 + $0x44] sm:$0xf] %vm604_vm0, %v756_v0  ;;  %v761_v12 = vpack.c.bf16 %v306_v2, %v306_v2  ;;  %v762_v13 = vpack.c.bf16 %v307_v3, %v307_v3  ;;  %623 = vst.msk [vmem:[%s1475_s3 + $0x48] sm:$0xf] %vm604_vm0, %v757_v6  ;;  %v857_v16 = vunpack.c.l.bf16 %v943_v4  ;;  %v858_v17 = vunpack.c.h.bf16 %v943_v4 }
  0x21   :  { %624 = vst.msk [vmem:[%s1475_s3 + $0x4c] sm:$0xf] %vm604_vm0, %v758_v8  ;;  %625 = vst.msk [vmem:[%s1475_s3 + $0x50] sm:$0xf] %vm604_vm0, %v759_v9  ;;  %v861_v18 = vunpack.c.l.bf16 %v944_v5  ;;  %v862_v19 = vunpack.c.h.bf16 %v944_v5  ;;  %v173_v20 = vmul.f32 %v853_v14, %v988_v1  ;;  %v174_v21 = vmul.f32 %v854_v15, %v988_v1 }
  0x22   :  { %626 = vst.msk [vmem:[%s1475_s3 + $0x54] sm:$0xf] %vm604_vm0, %v760_v10  ;;  %627 = vst.msk [vmem:[%s1475_s3 + $0x58] sm:$0xf] %vm604_vm0, %v761_v12  ;;  %v865_v22 = vunpack.c.l.bf16 %v945_v11  ;;  %v866_v23 = vunpack.c.h.bf16 %v945_v11  ;;  %v175_v24 = vmul.f32 %v857_v16, %v988_v1  ;;  %v176_v25 = vmul.f32 %v858_v17, %v988_v1 }
  0x23   :  { %628 = vst.msk [vmem:[%s1475_s3 + $0x5c] sm:$0xf] %vm604_vm0, %v762_v13  ;;  %v177_v26 = vmul.f32 %v861_v18, %v988_v1  ;;  %v178_v27 = vmul.f32 %v862_v19, %v988_v1  ;;  %v244_v28 = vadd.f32 %v1002_v7, %v173_v20  ;;  %v245_v29 = vadd.f32 %v1002_v7, %v174_v21 }
  0x24   :  { %v179_v30 = vmul.f32 %v865_v22, %v988_v1  ;;  %v180_v31 = vmul.f32 %v866_v23, %v988_v1  ;;  %v246_v32 = vadd.f32 %v1002_v7, %v175_v24  ;;  %v247_v33 = vadd.f32 %v1002_v7, %v176_v25 }
  0x25   :  { %v248_v34 = vadd.f32 %v1002_v7, %v177_v26  ;;  %v249_v35 = vadd.f32 %v1002_v7, %v178_v27  ;;  %v308_v36 = vmax.f32 %v244_v28, 0.0  ;;  %v309_v37 = vmax.f32 %v245_v29, 0.0  ;;  %v950_v26 = vld [vmem:[%s1472_s0 + $0xa0] sm:$0xff]  }
  0x26   :  { %v250_v38 = vadd.f32 %v1002_v7, %v179_v30  ;;  %v251_v39 = vadd.f32 %v1002_v7, %v180_v31  ;;  %v310_v40 = vmax.f32 %v246_v32, 0.0  ;;  %v311_v41 = vmax.f32 %v247_v33, 0.0  ;;  %v951_v31 = vld [vmem:[%s1472_s0 + $0xa8] sm:$0xff]   ;;  %v952_v32 = vld [vmem:[%s1472_s0 + $0xb0] sm:$0xff]  }
  0x27   :  { %v312_v42 = vmax.f32 %v248_v34, 0.0  ;;  %v313_v43 = vmax.f32 %v249_v35, 0.0  ;;  %v763_v45 = vpack.c.bf16 %v308_v36, %v308_v36  ;;  %v764_v46 = vpack.c.bf16 %v309_v37, %v309_v37  ;;  %v953_v37 = vld [vmem:[%s1472_s0 + $0xb8] sm:$0xff]  }
  0x28   :  { %v314_v47 = vmax.f32 %v250_v38, 0.0  ;;  %v315_v48 = vmax.f32 %v251_v39, 0.0  ;;  %v765_v51 = vpack.c.bf16 %v310_v40, %v310_v40  ;;  %v766_v52 = vpack.c.bf16 %v311_v41, %v311_v41 }
  0x29   :  { %v767_v53 = vpack.c.bf16 %v312_v42, %v312_v42  ;;  %v768_v54 = vpack.c.bf16 %v313_v43, %v313_v43  ;;  %629 = vst.msk [vmem:[%s1475_s3 + $0x60] sm:$0xf] %vm604_vm0, %v763_v45  ;;  %630 = vst.msk [vmem:[%s1475_s3 + $0x64] sm:$0xf] %vm604_vm0, %v764_v46  ;;  %v869_v58 = vunpack.c.l.bf16 %v946_v44  ;;  %v870_v59 = vunpack.c.h.bf16 %v946_v44 }
  0x2a   :  { %v769_v56 = vpack.c.bf16 %v314_v47, %v314_v47  ;;  %v770_v57 = vpack.c.bf16 %v315_v48, %v315_v48  ;;  %631 = vst.msk [vmem:[%s1475_s3 + $0x68] sm:$0xf] %vm604_vm0, %v765_v51  ;;  %632 = vst.msk [vmem:[%s1475_s3 + $0x6c] sm:$0xf] %vm604_vm0, %v766_v52  ;;  %v873_v60 = vunpack.c.l.bf16 %v947_v49  ;;  %v874_v61 = vunpack.c.h.bf16 %v947_v49 }
  0x2b   :  { %633 = vst.msk [vmem:[%s1475_s3 + $0x70] sm:$0xf] %vm604_vm0, %v767_v53  ;;  %634 = vst.msk [vmem:[%s1475_s3 + $0x74] sm:$0xf] %vm604_vm0, %v768_v54  ;;  %v877_v62 = vunpack.c.l.bf16 %v948_v50  ;;  %v878_v63 = vunpack.c.h.bf16 %v948_v50  ;;  %v181_v0 = vmul.f32 %v869_v58, %v988_v1  ;;  %v182_v2 = vmul.f32 %v870_v59, %v988_v1 }
  0x2c   :  { %635 = vst.msk [vmem:[%s1475_s3 + $0x78] sm:$0xf] %vm604_vm0, %v769_v56  ;;  %636 = vst.msk [vmem:[%s1475_s3 + $0x7c] sm:$0xf] %vm604_vm0, %v770_v57  ;;  %v881_v3 = vunpack.c.l.bf16 %v949_v55  ;;  %v882_v4 = vunpack.c.h.bf16 %v949_v55  ;;  %v183_v5 = vmul.f32 %v873_v60, %v988_v1  ;;  %v184_v6 = vmul.f32 %v874_v61, %v988_v1 }
  0x2d   :  { %v185_v8 = vmul.f32 %v877_v62, %v988_v1  ;;  %v186_v9 = vmul.f32 %v878_v63, %v988_v1  ;;  %v252_v10 = vadd.f32 %v1002_v7, %v181_v0  ;;  %v253_v11 = vadd.f32 %v1002_v7, %v182_v2 }
  0x2e   :  { %v187_v12 = vmul.f32 %v881_v3, %v988_v1  ;;  %v188_v13 = vmul.f32 %v882_v4, %v988_v1  ;;  %v254_v14 = vadd.f32 %v1002_v7, %v183_v5  ;;  %v255_v15 = vadd.f32 %v1002_v7, %v184_v6 }
  0x2f   :  { %v256_v16 = vadd.f32 %v1002_v7, %v185_v8  ;;  %v257_v17 = vadd.f32 %v1002_v7, %v186_v9  ;;  %v316_v18 = vmax.f32 %v252_v10, 0.0  ;;  %v317_v19 = vmax.f32 %v253_v11, 0.0  ;;  %v954_v8 = vld [vmem:[%s1472_s0 + $0xc0] sm:$0xff]  }
  0x30   :  { %v258_v20 = vadd.f32 %v1002_v7, %v187_v12  ;;  %v259_v21 = vadd.f32 %v1002_v7, %v188_v13  ;;  %v318_v22 = vmax.f32 %v254_v14, 0.0  ;;  %v319_v23 = vmax.f32 %v255_v15, 0.0  ;;  %v955_v13 = vld [vmem:[%s1472_s0 + $0xc8] sm:$0xff]   ;;  %v956_v14 = vld [vmem:[%s1472_s0 + $0xd0] sm:$0xff]  }
  0x31   :  { %v320_v24 = vmax.f32 %v256_v16, 0.0  ;;  %v321_v25 = vmax.f32 %v257_v17, 0.0  ;;  %v771_v27 = vpack.c.bf16 %v316_v18, %v316_v18  ;;  %v772_v28 = vpack.c.bf16 %v317_v19, %v317_v19  ;;  %v957_v19 = vld [vmem:[%s1472_s0 + $0xd8] sm:$0xff]  }
  0x32   :  { %v322_v29 = vmax.f32 %v258_v20, 0.0  ;;  %v323_v30 = vmax.f32 %v259_v21, 0.0  ;;  %v773_v33 = vpack.c.bf16 %v318_v22, %v318_v22  ;;  %v774_v34 = vpack.c.bf16 %v319_v23, %v319_v23 }
  0x33   :  { %v775_v35 = vpack.c.bf16 %v320_v24, %v320_v24  ;;  %v776_v36 = vpack.c.bf16 %v321_v25, %v321_v25  ;;  %637 = vst.msk [vmem:[%s1475_s3 + $0x80] sm:$0xf] %vm604_vm0, %v771_v27  ;;  %638 = vst.msk [vmem:[%s1475_s3 + $0x84] sm:$0xf] %vm604_vm0, %v772_v28  ;;  %v885_v40 = vunpack.c.l.bf16 %v950_v26  ;;  %v886_v41 = vunpack.c.h.bf16 %v950_v26 }
  0x34   :  { %v777_v38 = vpack.c.bf16 %v322_v29, %v322_v29  ;;  %v778_v39 = vpack.c.bf16 %v323_v30, %v323_v30  ;;  %639 = vst.msk [vmem:[%s1475_s3 + $0x88] sm:$0xf] %vm604_vm0, %v773_v33  ;;  %640 = vst.msk [vmem:[%s1475_s3 + $0x8c] sm:$0xf] %vm604_vm0, %v774_v34  ;;  %v889_v42 = vunpack.c.l.bf16 %v951_v31  ;;  %v890_v43 = vunpack.c.h.bf16 %v951_v31 }
  0x35   :  { %641 = vst.msk [vmem:[%s1475_s3 + $0x90] sm:$0xf] %vm604_vm0, %v775_v35  ;;  %642 = vst.msk [vmem:[%s1475_s3 + $0x94] sm:$0xf] %vm604_vm0, %v776_v36  ;;  %v893_v44 = vunpack.c.l.bf16 %v952_v32  ;;  %v894_v45 = vunpack.c.h.bf16 %v952_v32  ;;  %v189_v46 = vmul.f32 %v885_v40, %v988_v1  ;;  %v190_v47 = vmul.f32 %v886_v41, %v988_v1 }
  0x36   :  { %643 = vst.msk [vmem:[%s1475_s3 + $0x98] sm:$0xf] %vm604_vm0, %v777_v38  ;;  %644 = vst.msk [vmem:[%s1475_s3 + $0x9c] sm:$0xf] %vm604_vm0, %v778_v39  ;;  %v897_v48 = vunpack.c.l.bf16 %v953_v37  ;;  %v898_v49 = vunpack.c.h.bf16 %v953_v37  ;;  %v191_v50 = vmul.f32 %v889_v42, %v988_v1  ;;  %v192_v51 = vmul.f32 %v890_v43, %v988_v1 }
  0x37   :  { %v193_v52 = vmul.f32 %v893_v44, %v988_v1  ;;  %v194_v53 = vmul.f32 %v894_v45, %v988_v1  ;;  %v260_v54 = vadd.f32 %v1002_v7, %v189_v46  ;;  %v261_v55 = vadd.f32 %v1002_v7, %v190_v47 }
  0x38   :  { %v195_v56 = vmul.f32 %v897_v48, %v988_v1  ;;  %v196_v57 = vmul.f32 %v898_v49, %v988_v1  ;;  %v262_v58 = vadd.f32 %v1002_v7, %v191_v50  ;;  %v263_v59 = vadd.f32 %v1002_v7, %v192_v51 }
  0x39   :  { %v264_v60 = vadd.f32 %v1002_v7, %v193_v52  ;;  %v265_v61 = vadd.f32 %v1002_v7, %v194_v53  ;;  %v324_v62 = vmax.f32 %v260_v54, 0.0  ;;  %v325_v63 = vmax.f32 %v261_v55, 0.0  ;;  %v958_v52 = vld [vmem:[%s1472_s0 + $0xe0] sm:$0xff]  }
  0x3a   :  { %v266_v0 = vadd.f32 %v1002_v7, %v195_v56  ;;  %v267_v2 = vadd.f32 %v1002_v7, %v196_v57  ;;  %v326_v3 = vmax.f32 %v262_v58, 0.0  ;;  %v327_v4 = vmax.f32 %v263_v59, 0.0  ;;  %v959_v57 = vld [vmem:[%s1472_s0 + $0xe8] sm:$0xff]   ;;  %v960_v58 = vld [vmem:[%s1472_s0 + $0xf0] sm:$0xff]  }
  0x3b   :  { %v328_v5 = vmax.f32 %v264_v60, 0.0  ;;  %v329_v6 = vmax.f32 %v265_v61, 0.0  ;;  %v779_v9 = vpack.c.bf16 %v324_v62, %v324_v62  ;;  %v780_v10 = vpack.c.bf16 %v325_v63, %v325_v63  ;;  %v961_v63 = vld [vmem:[%s1472_s0 + $0xf8] sm:$0xff]  }
  0x3c   :  { %v330_v11 = vmax.f32 %v266_v0, 0.0  ;;  %v331_v12 = vmax.f32 %v267_v2, 0.0  ;;  %v781_v15 = vpack.c.bf16 %v326_v3, %v326_v3  ;;  %v782_v16 = vpack.c.bf16 %v327_v4, %v327_v4 }
  0x3d   :  { %v783_v17 = vpack.c.bf16 %v328_v5, %v328_v5  ;;  %v784_v18 = vpack.c.bf16 %v329_v6, %v329_v6  ;;  %645 = vst.msk [vmem:[%s1475_s3 + $0xa0] sm:$0xf] %vm604_vm0, %v779_v9  ;;  %646 = vst.msk [vmem:[%s1475_s3 + $0xa4] sm:$0xf] %vm604_vm0, %v780_v10  ;;  %v901_v22 = vunpack.c.l.bf16 %v954_v8  ;;  %v902_v23 = vunpack.c.h.bf16 %v954_v8 }
  0x3e   :  { %v785_v20 = vpack.c.bf16 %v330_v11, %v330_v11  ;;  %v786_v21 = vpack.c.bf16 %v331_v12, %v331_v12  ;;  %647 = vst.msk [vmem:[%s1475_s3 + $0xa8] sm:$0xf] %vm604_vm0, %v781_v15  ;;  %648 = vst.msk [vmem:[%s1475_s3 + $0xac] sm:$0xf] %vm604_vm0, %v782_v16  ;;  %v905_v24 = vunpack.c.l.bf16 %v955_v13  ;;  %v906_v25 = vunpack.c.h.bf16 %v955_v13 }
  0x3f   :  { %649 = vst.msk [vmem:[%s1475_s3 + $0xb0] sm:$0xf] %vm604_vm0, %v783_v17  ;;  %650 = vst.msk [vmem:[%s1475_s3 + $0xb4] sm:$0xf] %vm604_vm0, %v784_v18  ;;  %v909_v26 = vunpack.c.l.bf16 %v956_v14  ;;  %v910_v27 = vunpack.c.h.bf16 %v956_v14  ;;  %v197_v28 = vmul.f32 %v901_v22, %v988_v1  ;;  %v198_v29 = vmul.f32 %v902_v23, %v988_v1 }
  0x40   :  { %651 = vst.msk [vmem:[%s1475_s3 + $0xb8] sm:$0xf] %vm604_vm0, %v785_v20  ;;  %652 = vst.msk [vmem:[%s1475_s3 + $0xbc] sm:$0xf] %vm604_vm0, %v786_v21  ;;  %v913_v30 = vunpack.c.l.bf16 %v957_v19  ;;  %v914_v31 = vunpack.c.h.bf16 %v957_v19  ;;  %v199_v32 = vmul.f32 %v905_v24, %v988_v1  ;;  %v200_v33 = vmul.f32 %v906_v25, %v988_v1 }
  0x41   :  { %v201_v34 = vmul.f32 %v909_v26, %v988_v1  ;;  %v202_v35 = vmul.f32 %v910_v27, %v988_v1  ;;  %v268_v36 = vadd.f32 %v1002_v7, %v197_v28  ;;  %v269_v37 = vadd.f32 %v1002_v7, %v198_v29 }
  0x42   :  { %v203_v38 = vmul.f32 %v913_v30, %v988_v1  ;;  %v204_v39 = vmul.f32 %v914_v31, %v988_v1  ;;  %v270_v40 = vadd.f32 %v1002_v7, %v199_v32  ;;  %v271_v41 = vadd.f32 %v1002_v7, %v200_v33 }
  0x43   :  { %v272_v42 = vadd.f32 %v1002_v7, %v201_v34  ;;  %v273_v43 = vadd.f32 %v1002_v7, %v202_v35  ;;  %v332_v44 = vmax.f32 %v268_v36, 0.0  ;;  %v333_v45 = vmax.f32 %v269_v37, 0.0 }
  0x44   :  { %v274_v46 = vadd.f32 %v1002_v7, %v203_v38  ;;  %v275_v47 = vadd.f32 %v1002_v7, %v204_v39  ;;  %v334_v48 = vmax.f32 %v270_v40, 0.0  ;;  %v335_v49 = vmax.f32 %v271_v41, 0.0 }
  0x45   :  { %v336_v50 = vmax.f32 %v272_v42, 0.0  ;;  %v337_v51 = vmax.f32 %v273_v43, 0.0  ;;  %v787_v53 = vpack.c.bf16 %v332_v44, %v332_v44  ;;  %v788_v54 = vpack.c.bf16 %v333_v45, %v333_v45 }
  0x46   :  { %v338_v55 = vmax.f32 %v274_v46, 0.0  ;;  %v339_v56 = vmax.f32 %v275_v47, 0.0  ;;  %v789_v59 = vpack.c.bf16 %v334_v48, %v334_v48  ;;  %v790_v60 = vpack.c.bf16 %v335_v49, %v335_v49 }
  0x47   :  { %v791_v61 = vpack.c.bf16 %v336_v50, %v336_v50  ;;  %v792_v62 = vpack.c.bf16 %v337_v51, %v337_v51  ;;  %653 = vst.msk [vmem:[%s1475_s3 + $0xc0] sm:$0xf] %vm604_vm0, %v787_v53  ;;  %654 = vst.msk [vmem:[%s1475_s3 + $0xc4] sm:$0xf] %vm604_vm0, %v788_v54  ;;  %v917_v3 = vunpack.c.l.bf16 %v958_v52  ;;  %v918_v4 = vunpack.c.h.bf16 %v958_v52 }
  0x48   :  { %v793_v0 = vpack.c.bf16 %v338_v55, %v338_v55  ;;  %v794_v2 = vpack.c.bf16 %v339_v56, %v339_v56  ;;  %655 = vst.msk [vmem:[%s1475_s3 + $0xc8] sm:$0xf] %vm604_vm0, %v789_v59  ;;  %656 = vst.msk [vmem:[%s1475_s3 + $0xcc] sm:$0xf] %vm604_vm0, %v790_v60  ;;  %v921_v5 = vunpack.c.l.bf16 %v959_v57  ;;  %v922_v6 = vunpack.c.h.bf16 %v959_v57 }
  0x49   :  { %657 = vst.msk [vmem:[%s1475_s3 + $0xd0] sm:$0xf] %vm604_vm0, %v791_v61  ;;  %658 = vst.msk [vmem:[%s1475_s3 + $0xd4] sm:$0xf] %vm604_vm0, %v792_v62  ;;  %v925_v8 = vunpack.c.l.bf16 %v960_v58  ;;  %v926_v9 = vunpack.c.h.bf16 %v960_v58  ;;  %v205_v10 = vmul.f32 %v917_v3, %v988_v1  ;;  %v206_v11 = vmul.f32 %v918_v4, %v988_v1 }
  0x4a   :  { %659 = vst.msk [vmem:[%s1475_s3 + $0xd8] sm:$0xf] %vm604_vm0, %v793_v0  ;;  %660 = vst.msk [vmem:[%s1475_s3 + $0xdc] sm:$0xf] %vm604_vm0, %v794_v2  ;;  %v929_v12 = vunpack.c.l.bf16 %v961_v63  ;;  %v930_v13 = vunpack.c.h.bf16 %v961_v63  ;;  %v207_v14 = vmul.f32 %v921_v5, %v988_v1  ;;  %v208_v15 = vmul.f32 %v922_v6, %v988_v1 }
  0x4b   :  { %v209_v16 = vmul.f32 %v925_v8, %v988_v1  ;;  %v210_v17 = vmul.f32 %v926_v9, %v988_v1  ;;  %v276_v18 = vadd.f32 %v1002_v7, %v205_v10  ;;  %v277_v19 = vadd.f32 %v1002_v7, %v206_v11 }
  0x4c   :  { %v211_v20 = vmul.f32 %v929_v12, %v988_v1  ;;  %v212_v21 = vmul.f32 %v930_v13, %v988_v1  ;;  %v278_v22 = vadd.f32 %v1002_v7, %v207_v14  ;;  %v279_v23 = vadd.f32 %v1002_v7, %v208_v15 }
  0x4d   :  { %v280_v24 = vadd.f32 %v1002_v7, %v209_v16  ;;  %v281_v25 = vadd.f32 %v1002_v7, %v210_v17  ;;  %v340_v26 = vmax.f32 %v276_v18, 0.0  ;;  %v341_v27 = vmax.f32 %v277_v19, 0.0 }
  0x4e   :  { %v282_v28 = vadd.f32 %v1002_v7, %v211_v20  ;;  %v283_v29 = vadd.f32 %v1002_v7, %v212_v21  ;;  %v342_v30 = vmax.f32 %v278_v22, 0.0  ;;  %v343_v31 = vmax.f32 %v279_v23, 0.0 }
  0x4f   :  { %v344_v32 = vmax.f32 %v280_v24, 0.0  ;;  %v345_v33 = vmax.f32 %v281_v25, 0.0  ;;  %v795_v34 = vpack.c.bf16 %v340_v26, %v340_v26  ;;  %v796_v1 = vpack.c.bf16 %v341_v27, %v341_v27 }
  0x50   :  { %v346_v35 = vmax.f32 %v282_v28, 0.0  ;;  %v347_v36 = vmax.f32 %v283_v29, 0.0  ;;  %v797_v37 = vpack.c.bf16 %v342_v30, %v342_v30  ;;  %v798_v38 = vpack.c.bf16 %v343_v31, %v343_v31 }
  0x51   :  { %v799_v39 = vpack.c.bf16 %v344_v32, %v344_v32  ;;  %v800_v40 = vpack.c.bf16 %v345_v33, %v345_v33  ;;  %661 = vst.msk [vmem:[%s1475_s3 + $0xe0] sm:$0xf] %vm604_vm0, %v795_v34  ;;  %662 = vst.msk [vmem:[%s1475_s3 + $0xe4] sm:$0xf] %vm604_vm0, %v796_v1 }
  0x52   :  { %v801_v7 = vpack.c.bf16 %v346_v35, %v346_v35  ;;  %v802_v41 = vpack.c.bf16 %v347_v36, %v347_v36  ;;  %663 = vst.msk [vmem:[%s1475_s3 + $0xe8] sm:$0xf] %vm604_vm0, %v797_v37  ;;  %664 = vst.msk [vmem:[%s1475_s3 + $0xec] sm:$0xf] %vm604_vm0, %v798_v38 }
  0x53   :  { %665 = vst.msk [vmem:[%s1475_s3 + $0xf0] sm:$0xf] %vm604_vm0, %v799_v39  ;;  %666 = vst.msk [vmem:[%s1475_s3 + $0xf4] sm:$0xf] %vm604_vm0, %v800_v40 }
  0x54   :  { %667 = vst.msk [vmem:[%s1475_s3 + $0xf8] sm:$0xf] %vm604_vm0, %v801_v7  ;;  %668 = vst.msk [vmem:[%s1475_s3 + $0xfc] sm:$0xf] %vm604_vm0, %v802_v41 }

// kernel: net_simple_conv_forward.9
= control target key start
LH: loop header
LB: loop body
LE: loop exit
PB: predicated region body
PF: predicated region fallthrough
CT: control target
= control target key end

     0   :  { %vm360_vm0 = vcmask 1044480   ;;  %vm361_vm1 = vcmask 1045504   ;;  %vm263_vm2 = vcmask 220160   ;;  %v2052_v1 = vmov 65535   ;;  %s2963_s1 = inlined_call_operand.vmem [shape: bf16[27,32], index: 1, kind: input, shape index: {}]   ;;  %s2964_s0 = inlined_call_operand.vmem [shape: bf16[512,27], index: 0, kind: input, shape index: {}]   ;;  %s2965_s2 = inlined_call_operand.vmem [shape: f32[1,32], index: 2, kind: input, shape index: {}]   ;;  %s2966_s4 = inlined_call_operand.vmem [shape: f32[2,32], index: 4, kind: output, shape index: {1}]   ;;  %s2967_s3 = inlined_call_operand.vmem [shape: bf16[512,32], index: 3, kind: output, shape index: {0}]  }
   0x1   :  { %v2018_v0 = vld [vmem:[%s2963_s1] sm:$0xff]   ;;  %v362_v2 = vsel %vm360_vm0, 4294967295, %v2052_v1  ;;  %v2019_v3 = vld [vmem:[%s2963_s1 + $0x8] sm:$0x3f]   ;;  %v2022_v8 = vld [vmem:[%s2964_s0 + $0x10] sm:$0xff]   ;;  %vm981_vm3 = vcmask 254976  }
   0x2   :  { %1944 = vmatprep.subr.bf16.mxu0 %v2018_v0  ;;  %v363_v4 = vsel %vm361_vm1, %v362_v2, 0  ;;  %v2020_v5 = vld [vmem:[%s2964_s0] sm:$0xff]   ;;  %2012 = vmatprep.subr.bf16.mxu1 %v2018_v0  ;;  %v2021_v7 = vld [vmem:[%s2964_s0 + $0x8] sm:$0xff]   ;;  %v2023_v9 = vld [vmem:[%s2964_s0 + $0x18] sm:$0xff]   ;;  %vm912_vm4 = vcmask 257024   ;;  %v2053_v44 = vmov 0.0  }
   0x3   :  { %1945 = vmatpush3.bf16.msra.mxu0 %v2018_v0  ;;  %v365_v6 = vand.u32 %v2019_v3, %v363_v4  ;;  %2014 = vmatpush3.bf16.msra.mxu1 %v2018_v0  ;;  %v2024_v10 = vld [vmem:[%s2964_s0 + $0x20] sm:$0xff]   ;;  %v2037_v12 = vld [vmem:[%s2964_s0 + $0x88] sm:$0xff]   ;;  %v2038_v13 = vld [vmem:[%s2964_s0 + $0x90] sm:$0xff]   ;;  %982 = vst.msk [vmem:[%s2966_s4] sm:$0x3] %vm981_vm3, %v2053_v44  ;;  %vm1370_vm5 = vcmask 261120  }
   0x4   :  { %1948 = vmatprep.mubr.msk.bf16.mxu0 %vm263_vm2, %v2020_v5  ;;  %v2036_v11 = vld [vmem:[%s2964_s0 + $0x80] sm:$0xff]   ;;  %v2025_v14 = vld [vmem:[%s2964_s0 + $0x28] sm:$0xff]   ;;  %v2026_v15 = vld [vmem:[%s2964_s0 + $0x30] sm:$0xff]   ;;  %vm1701_vm6 = vcmask 1040384  }
   0x5   :  { %1946 = vmatprep.subr.bf16.mxu0 %v365_v6  ;;  %2013 = vmatprep.subr.bf16.mxu1 %v365_v6  ;;  %v2039_v16 = vld [vmem:[%s2964_s0 + $0x98] sm:$0xff]   ;;  %v2040_v17 = vld [vmem:[%s2964_s0 + $0xa0] sm:$0xff]   ;;  %v2041_v20 = vld [vmem:[%s2964_s0 + $0xa8] sm:$0xff]  }
   0x6   :  { %1980 = vmatprep.mubr.msk.bf16.mxu1 %vm263_vm2, %v2036_v11  ;;  %v2027_v18 = vld [vmem:[%s2964_s0 + $0x38] sm:$0xff]   ;;  %v2028_v19 = vld [vmem:[%s2964_s0 + $0x40] sm:$0xff]   ;;  %v2042_v21 = vld [vmem:[%s2964_s0 + $0xb0] sm:$0xff]  }
   0x7   :  { %1947 = vmatpush3.bf16.msra.mxu0 %v365_v6  ;;  %2015 = vmatpush3.bf16.msra.mxu1 %v365_v6  ;;  %v2029_v22 = vld [vmem:[%s2964_s0 + $0x48] sm:$0xff]   ;;  %v2030_v23 = vld [vmem:[%s2964_s0 + $0x50] sm:$0xff]   ;;  %v2043_v24 = vld [vmem:[%s2964_s0 + $0xb8] sm:$0xff]  }
   0x8   :  { %v2044_v25 = vld [vmem:[%s2964_s0 + $0xc0] sm:$0xff]   ;;  %v2031_v26 = vld [vmem:[%s2964_s0 + $0x58] sm:$0xff]   ;;  %v2045_v28 = vld [vmem:[%s2964_s0 + $0xc8] sm:$0xff]  }
   0x9   :  { %v2032_v27 = vld [vmem:[%s2964_s0 + $0x60] sm:$0xff]   ;;  %v2046_v29 = vld [vmem:[%s2964_s0 + $0xd0] sm:$0xff]   ;;  %v2033_v30 = vld [vmem:[%s2964_s0 + $0x68] sm:$0xff]  }
   0xa   :  { %1949 = vmatmul.mubr.msk.bf16.vlgmr.msra.gmra.mrb[0].mxu0 %vm263_vm2, %v2021_v7  ;;  %1981 = vmatmul.mubr.msk.bf16.vlgmr.msra.gmra.mrb[0].mxu1 %vm263_vm2, %v2037_v12  ;;  %v2034_v31 = vld [vmem:[%s2964_s0 + $0x70] sm:$0xff]   ;;  %v2047_v32 = vld [vmem:[%s2964_s0 + $0xd8] sm:$0xff]   ;;  %v2048_v33 = vld [vmem:[%s2964_s0 + $0xe0] sm:$0xff]  }
   0xb   :  { %1952 = vmatprep.mubr.msk.bf16.mxu0 %vm263_vm2, %v2022_v8  ;;  %1984 = vmatprep.mubr.msk.bf16.mxu1 %vm263_vm2, %v2038_v13  ;;  %v2035_v34 = vld [vmem:[%s2964_s0 + $0x78] sm:$0xff]   ;;  %v2049_v35 = vld [vmem:[%s2964_s0 + $0xe8] sm:$0xff]   ;;  %v2050_v36 = vld [vmem:[%s2964_s0 + $0xf0] sm:$0xff]  }
   0xc   :  { %v2051_v37 = vld [vmem:[%s2964_s0 + $0xf8] sm:$0xff]   ;;  %v2216_v38 = vld [vmem:[%s2965_s2] ss:$0 sm:$0xff] }
  0x12   :  { %1953 = vmatmul.mubr.msk.bf16.gmra.mrb[4].mxu0 %vm263_vm2, %v2023_v9  ;;  %1985 = vmatmul.mubr.msk.bf16.gmra.mrb[4].mxu1 %vm263_vm2, %v2039_v16 }
  0x13   :  { %1956 = vmatprep.mubr.msk.bf16.mxu0 %vm263_vm2, %v2024_v10  ;;  %1988 = vmatprep.mubr.msk.bf16.mxu1 %vm263_vm2, %v2040_v17 }
  0x1a   :  { %1957 = vmatmul.mubr.msk.bf16.gmra.mrb[8].mxu0 %vm263_vm2, %v2025_v14  ;;  %1989 = vmatmul.mubr.msk.bf16.gmra.mrb[8].mxu1 %vm263_vm2, %v2041_v20 }
  0x1b   :  { %1960 = vmatprep.mubr.msk.bf16.mxu0 %vm263_vm2, %v2026_v15  ;;  %1992 = vmatprep.mubr.msk.bf16.mxu1 %vm263_vm2, %v2042_v21 }
  0x22   :  { %1961 = vmatmul.mubr.msk.bf16.gmra.mrb[12].mxu0 %vm263_vm2, %v2027_v18  ;;  %1993 = vmatmul.mubr.msk.bf16.gmra.mrb[12].mxu1 %vm263_vm2, %v2043_v24 }
  0x23   :  { %1964 = vmatprep.mubr.msk.bf16.mxu0 %vm263_vm2, %v2028_v19  ;;  %1996 = vmatprep.mubr.msk.bf16.mxu1 %vm263_vm2, %v2044_v25 }
  0x2a   :  { %1965 = vmatmul.mubr.msk.bf16.gmra.mrb[16].mxu0 %vm263_vm2, %v2029_v22  ;;  %1997 = vmatmul.mubr.msk.bf16.gmra.mrb[16].mxu1 %vm263_vm2, %v2045_v28 }
  0x2b   :  { %1968 = vmatprep.mubr.msk.bf16.mxu0 %vm263_vm2, %v2030_v23  ;;  %2000 = vmatprep.mubr.msk.bf16.mxu1 %vm263_vm2, %v2046_v29 }
  0x32   :  { %1969 = vmatmul.mubr.msk.bf16.gmra.mrb[20].mxu0 %vm263_vm2, %v2031_v26  ;;  %2001 = vmatmul.mubr.msk.bf16.gmra.mrb[20].mxu1 %vm263_vm2, %v2047_v32 }
  0x33   :  { %1972 = vmatprep.mubr.msk.bf16.mxu0 %vm263_vm2, %v2032_v27  ;;  %2004 = vmatprep.mubr.msk.bf16.mxu1 %vm263_vm2, %v2048_v33 }
  0x3a   :  { %1973 = vmatmul.mubr.msk.bf16.gmra.mrb[24].mxu0 %vm263_vm2, %v2033_v30  ;;  %2005 = vmatmul.mubr.msk.bf16.gmra.mrb[24].mxu1 %vm263_vm2, %v2049_v35 }
  0x3b   :  { %1976 = vmatprep.mubr.msk.bf16.mxu0 %vm263_vm2, %v2034_v31  ;;  %2008 = vmatprep.mubr.msk.bf16.mxu1 %vm263_vm2, %v2050_v36 }
  0x42   :  { %1977 = vmatmul.mubr.msk.bf16.gmra.mrb[28].mxu0 %vm263_vm2, %v2035_v34  ;;  %2009 = vmatmul.mubr.msk.bf16.gmra.mrb[28].mxu1 %vm263_vm2, %v2051_v37 }
  0xdd   :  { %v1950_v39 = vpop.f32.mrb[0].mxu0  ;;  %v1982_v11 = vpop.f32.mrb[0].mxu1 }
  0xde   :  { %v410_v40 = vadd.f32 %v1950_v39, %v2216_v38  ;;  %v401_v41 = vpop.f32.mrb[1].mxu0  ;;  %v529_v16 = vpop.f32.mrb[1].mxu1  ;;  %v2267_v23 = vadd.f32 %v1982_v11, %v2216_v38 }
  0xdf   :  { %v402_v42 = vadd.f32 %v2216_v38, %v401_v41  ;;  %v1951_v43 = vpop.f32.mrb[2].mxu0  ;;  %v2259_v20 = vpop.f32.mrb[2].mxu1  ;;  %v2270_v24 = vadd.f32 %v2216_v38, %v529_v16 }
  0xe0   :  { %v1848_v45 = vpack.c.bf16 %v410_v40, %v410_v40  ;;  %v413_v46 = vadd.f32 %v1951_v43, %v2216_v38  ;;  %v404_v47 = vpop.f32.mrb[3].mxu0  ;;  %v1506_v51 = vmul.f32 %v410_v40, %v410_v40  ;;  %v1374_v59 = vsel %vm1370_vm5, %v410_v40, 0.0  ;;  %v2272_v25 = vpop.f32.mrb[3].mxu1 }
  0xe1   :  { %v1846_v48 = vpack.c.bf16 %v402_v42, %v402_v42  ;;  %v1504_v49 = vmul.f32 %v402_v42, %v402_v42  ;;  %v405_v50 = vadd.f32 %v2216_v38, %v404_v47  ;;  %v1371_v53 = vsel %vm1370_vm5, %v402_v42, 0.0 }
  0xe2   :  { %915 = vst.msk [vmem:[%s2967_s3 + $0x8] sm:$0xf] %vm912_vm4, %v1848_v45  ;;  %v1849_v52 = vpack.c.bf16 %v413_v46, %v413_v46  ;;  %v1507_v57 = vmul.f32 %v413_v46, %v413_v46  ;;  %v1571_v3 = vsel %vm1370_vm5, %v1506_v51, 0.0  ;;  %v1376_v6 = vsel %vm1370_vm5, %v413_v46, 0.0 }
  0xe3   :  { %913 = vst.msk [vmem:[%s2967_s3] sm:$0xf] %vm912_vm4, %v1846_v48  ;;  %v1847_v54 = vpack.c.bf16 %v405_v50, %v405_v50  ;;  %v1372_v55 = vsel %vm1370_vm5, %v405_v50, 0.0  ;;  %v1505_v56 = vmul.f32 %v405_v50, %v405_v50  ;;  %v1568_v60 = vsel %vm1370_vm5, %v1504_v49, 0.0 }
  0xe4   :  { %916 = vst.msk [vmem:[%s2967_s3 + $0xc] sm:$0xf] %vm912_vm4, %v1849_v52  ;;  %v1373_v58 = vadd.f32 %v1372_v55, %v1371_v53  ;;  %v1573_v7 = vsel %vm1370_vm5, %v1507_v57, 0.0  ;;  %v1880_v33 = vpack.c.bf16 %v2267_v23, %v2267_v23  ;;  %v1878_v43 = vpack.c.bf16 %v2270_v24, %v2270_v24 }
  0xe5   :  { %914 = vst.msk [vmem:[%s2967_s3 + $0x4] sm:$0xf] %vm912_vm4, %v1847_v54  ;;  %v1569_v61 = vsel %vm1370_vm5, %v1505_v56, 0.0  ;;  %v1954_v62 = vpop.f32.mrb[4].mxu0  ;;  %v2296_v49 = vpop.f32.mrb[4].mxu1  ;;  %v2337_v16 = vadd.f32 %v2259_v20, %v2216_v38 }
  0xe6   :  { %v1375_v63 = vadd.f32 %v1374_v59, %v1373_v58  ;;  %v1570_v0 = vadd.f32 %v1569_v61, %v1568_v60  ;;  %v426_v1 = vadd.f32 %v1954_v62, %v2216_v38  ;;  %v417_v2 = vpop.f32.mrb[5].mxu0  ;;  %947 = vst.msk [vmem:[%s2967_s3 + $0x88] sm:$0xf] %vm912_vm4, %v1880_v33  ;;  %945 = vst.msk [vmem:[%s2967_s3 + $0x80] sm:$0xf] %vm912_vm4, %v1878_v43  ;;  %v2304_v54 = vpop.f32.mrb[5].mxu1 }
  0xe7   :  { %v418_v4 = vadd.f32 %v2216_v38, %v417_v2  ;;  %v1955_v5 = vpop.f32.mrb[6].mxu0  ;;  %v2312_v59 = vpop.f32.mrb[6].mxu1 }
  0xe8   :  { %v1572_v8 = vadd.f32 %v1571_v3, %v1570_v0  ;;  %v1852_v9 = vpack.c.bf16 %v426_v1, %v426_v1  ;;  %v420_v10 = vpop.f32.mrb[7].mxu0  ;;  %v1377_v13 = vadd.f32 %v1376_v6, %v1375_v63  ;;  %v429_v18 = vadd.f32 %v1955_v5, %v2216_v38  ;;  %v2320_v62 = vpop.f32.mrb[7].mxu1 }
  0xe9   :  { %v1850_v12 = vpack.c.bf16 %v418_v4, %v418_v4  ;;  %v1378_v14 = vsel %vm1370_vm5, %v418_v4, 0.0  ;;  %v1508_v15 = vmul.f32 %v418_v4, %v418_v4  ;;  %v421_v19 = vadd.f32 %v2216_v38, %v420_v10 }
  0xea   :  { %919 = vst.msk [vmem:[%s2967_s3 + $0x18] sm:$0xf] %vm912_vm4, %v1852_v9  ;;  %v1574_v17 = vadd.f32 %v1573_v7, %v1572_v8  ;;  %v1379_v21 = vadd.f32 %v1378_v14, %v1377_v13  ;;  %v1510_v26 = vmul.f32 %v426_v1, %v426_v1  ;;  %v1853_v28 = vpack.c.bf16 %v429_v18, %v429_v18 }
  0xeb   :  { %917 = vst.msk [vmem:[%s2967_s3 + $0x10] sm:$0xf] %vm912_vm4, %v1850_v12  ;;  %v1575_v22 = vsel %vm1370_vm5, %v1508_v15, 0.0  ;;  %v1851_v29 = vpack.c.bf16 %v421_v19, %v421_v19  ;;  %v1380_v30 = vsel %vm1370_vm5, %v421_v19, 0.0  ;;  %v1509_v31 = vmul.f32 %v421_v19, %v421_v19 }
  0xec   :  { %v1576_v27 = vadd.f32 %v1575_v22, %v1574_v17  ;;  %v1382_v34 = vsel %vm1370_vm5, %v426_v1, 0.0  ;;  %920 = vst.msk [vmem:[%s2967_s3 + $0x1c] sm:$0xf] %vm912_vm4, %v1853_v28  ;;  %v1381_v35 = vadd.f32 %v1380_v30, %v1379_v21  ;;  %v1511_v39 = vmul.f32 %v429_v18, %v429_v18 }
  0xed   :  { %v1958_v32 = vpop.f32.mrb[8].mxu0  ;;  %918 = vst.msk [vmem:[%s2967_s3 + $0x14] sm:$0xf] %vm912_vm4, %v1851_v29  ;;  %v1577_v40 = vsel %vm1370_vm5, %v1509_v31, 0.0  ;;  %v1579_v44 = vsel %vm1370_vm5, %v1510_v26, 0.0  ;;  %v1384_v50 = vsel %vm1370_vm5, %v429_v18, 0.0 }
  0xee   :  { %v442_v36 = vadd.f32 %v1958_v32, %v2216_v38  ;;  %v433_v37 = vpop.f32.mrb[9].mxu0  ;;  %v1383_v45 = vadd.f32 %v1382_v34, %v1381_v35  ;;  %v1578_v46 = vadd.f32 %v1577_v40, %v1576_v27  ;;  %v1581_v60 = vsel %vm1370_vm5, %v1511_v39, 0.0  ;;  %v2340_v26 = vpop.f32.mrb[8].mxu1 }
  0xef   :  { %v434_v41 = vadd.f32 %v2216_v38, %v433_v37  ;;  %v1959_v42 = vpop.f32.mrb[10].mxu0  ;;  %v2344_v31 = vpop.f32.mrb[9].mxu1  ;;  %v1881_v39 = vpack.c.bf16 %v2337_v16, %v2337_v16 }
  0xf0   :  { %v1856_v47 = vpack.c.bf16 %v442_v36, %v442_v36  ;;  %v436_v48 = vpop.f32.mrb[11].mxu0  ;;  %v1580_v55 = vadd.f32 %v1579_v44, %v1578_v46  ;;  %v1385_v56 = vadd.f32 %v1384_v50, %v1383_v45  ;;  %v445_v57 = vadd.f32 %v1959_v42, %v2216_v38  ;;  %v2352_v35 = vpop.f32.mrb[10].mxu1 }
  0xf1   :  { %v1854_v51 = vpack.c.bf16 %v434_v41, %v434_v41  ;;  %v1386_v52 = vsel %vm1370_vm5, %v434_v41, 0.0  ;;  %v1512_v53 = vmul.f32 %v434_v41, %v434_v41  ;;  %v437_v58 = vadd.f32 %v2216_v38, %v436_v48  ;;  %v2362_v40 = vpop.f32.mrb[11].mxu1  ;;  %948 = vst.msk [vmem:[%s2967_s3 + $0x8c] sm:$0xf] %vm912_vm4, %v1881_v39 }
  0xf2   :  { %923 = vst.msk [vmem:[%s2967_s3 + $0x28] sm:$0xf] %vm912_vm4, %v1856_v47  ;;  %v1514_v63 = vmul.f32 %v442_v36, %v442_v36  ;;  %v1387_v0 = vadd.f32 %v1386_v52, %v1385_v56  ;;  %v1582_v1 = vadd.f32 %v1581_v60, %v1580_v55  ;;  %v1857_v2 = vpack.c.bf16 %v445_v57, %v445_v57 }
  0xf3   :  { %921 = vst.msk [vmem:[%s2967_s3 + $0x20] sm:$0xf] %vm912_vm4, %v1854_v51  ;;  %v1583_v61 = vsel %vm1370_vm5, %v1512_v53, 0.0  ;;  %v1855_v3 = vpack.c.bf16 %v437_v58, %v437_v58  ;;  %v1388_v4 = vsel %vm1370_vm5, %v437_v58, 0.0  ;;  %v1513_v5 = vmul.f32 %v437_v58, %v437_v58 }
  0xf4   :  { %v1390_v7 = vsel %vm1370_vm5, %v442_v36, 0.0  ;;  %v1584_v8 = vadd.f32 %v1583_v61, %v1582_v1  ;;  %924 = vst.msk [vmem:[%s2967_s3 + $0x2c] sm:$0xf] %vm912_vm4, %v1857_v2  ;;  %v1389_v9 = vadd.f32 %v1388_v4, %v1387_v0  ;;  %v1515_v12 = vmul.f32 %v445_v57, %v445_v57 }
  0xf5   :  { %v1962_v6 = vpop.f32.mrb[12].mxu0  ;;  %922 = vst.msk [vmem:[%s2967_s3 + $0x24] sm:$0xf] %vm912_vm4, %v1855_v3  ;;  %v1585_v13 = vsel %vm1370_vm5, %v1513_v5, 0.0  ;;  %v1587_v17 = vsel %vm1370_vm5, %v1514_v63, 0.0  ;;  %v1392_v27 = vsel %vm1370_vm5, %v445_v57, 0.0 }
  0xf6   :  { %v458_v10 = vadd.f32 %v1962_v6, %v2216_v38  ;;  %v449_v11 = vpop.f32.mrb[13].mxu0  ;;  %v1391_v18 = vadd.f32 %v1390_v7, %v1389_v9  ;;  %v1586_v19 = vadd.f32 %v1585_v13, %v1584_v8  ;;  %v1589_v36 = vsel %vm1370_vm5, %v1515_v12, 0.0  ;;  %v2382_v3 = vpop.f32.mrb[12].mxu1 }
  0xf7   :  { %v450_v14 = vadd.f32 %v2216_v38, %v449_v11  ;;  %v1963_v15 = vpop.f32.mrb[14].mxu0  ;;  %v2386_v8 = vpop.f32.mrb[13].mxu1 }
  0xf8   :  { %v1860_v21 = vpack.c.bf16 %v458_v10, %v458_v10  ;;  %v452_v22 = vpop.f32.mrb[15].mxu0  ;;  %v1588_v32 = vadd.f32 %v1587_v17, %v1586_v19  ;;  %v1393_v20 = vadd.f32 %v1392_v27, %v1391_v18  ;;  %v461_v33 = vadd.f32 %v1963_v15, %v2216_v38  ;;  %v2394_v13 = vpop.f32.mrb[14].mxu1 }
  0xf9   :  { %v1858_v28 = vpack.c.bf16 %v450_v14, %v450_v14  ;;  %v1394_v29 = vsel %vm1370_vm5, %v450_v14, 0.0  ;;  %v1516_v30 = vmul.f32 %v450_v14, %v450_v14  ;;  %v453_v34 = vadd.f32 %v2216_v38, %v452_v22  ;;  %v2406_v18 = vpop.f32.mrb[15].mxu1 }
  0xfa   :  { %927 = vst.msk [vmem:[%s2967_s3 + $0x38] sm:$0xf] %vm912_vm4, %v1860_v21  ;;  %v1518_v41 = vmul.f32 %v458_v10, %v458_v10  ;;  %v1395_v42 = vadd.f32 %v1394_v29, %v1393_v20  ;;  %v1590_v43 = vadd.f32 %v1589_v36, %v1588_v32  ;;  %v1861_v44 = vpack.c.bf16 %v461_v33, %v461_v33 }
  0xfb   :  { %925 = vst.msk [vmem:[%s2967_s3 + $0x30] sm:$0xf] %vm912_vm4, %v1858_v28  ;;  %v1591_v37 = vsel %vm1370_vm5, %v1516_v30, 0.0  ;;  %v1859_v45 = vpack.c.bf16 %v453_v34, %v453_v34  ;;  %v1396_v46 = vsel %vm1370_vm5, %v453_v34, 0.0  ;;  %v1517_v47 = vmul.f32 %v453_v34, %v453_v34 }
  0xfc   :  { %v1592_v50 = vadd.f32 %v1591_v37, %v1590_v43  ;;  %928 = vst.msk [vmem:[%s2967_s3 + $0x3c] sm:$0xf] %vm912_vm4, %v1861_v44  ;;  %v1397_v51 = vadd.f32 %v1396_v46, %v1395_v42  ;;  %v1398_v55 = vsel %vm1370_vm5, %v458_v10, 0.0  ;;  %v1519_v56 = vmul.f32 %v461_v33, %v461_v33 }
  0xfd   :  { %v1966_v48 = vpop.f32.mrb[16].mxu0  ;;  %926 = vst.msk [vmem:[%s2967_s3 + $0x34] sm:$0xf] %vm912_vm4, %v1859_v45  ;;  %v1593_v57 = vsel %vm1370_vm5, %v1517_v47, 0.0  ;;  %v1595_v61 = vsel %vm1370_vm5, %v1518_v41, 0.0  ;;  %v1400_v4 = vsel %vm1370_vm5, %v461_v33, 0.0  ;;  %v2404_v17 = vadd.f32 %v2216_v38, %v2272_v25 }
  0xfe   :  { %v474_v52 = vadd.f32 %v1966_v48, %v2216_v38  ;;  %v465_v53 = vpop.f32.mrb[17].mxu0  ;;  %v1399_v63 = vadd.f32 %v1398_v55, %v1397_v51  ;;  %v1594_v0 = vadd.f32 %v1593_v57, %v1592_v50  ;;  %v1597_v14 = vsel %vm1370_vm5, %v1519_v56, 0.0  ;;  %v2428_v50 = vpop.f32.mrb[16].mxu1 }
  0xff   :  { %v466_v58 = vadd.f32 %v2216_v38, %v465_v53  ;;  %v1967_v60 = vpop.f32.mrb[18].mxu0  ;;  %v1879_v36 = vpack.c.bf16 %v2404_v17, %v2404_v17  ;;  %v2432_v56 = vpop.f32.mrb[17].mxu1 }
 0x100   :  { %v1864_v1 = vpack.c.bf16 %v474_v52, %v474_v52  ;;  %v468_v2 = vpop.f32.mrb[19].mxu0  ;;  %v1596_v9 = vadd.f32 %v1595_v61, %v1594_v0  ;;  %v1401_v10 = vadd.f32 %v1400_v4, %v1399_v63  ;;  %v477_v11 = vadd.f32 %v1967_v60, %v2216_v38  ;;  %v2440_v63 = vpop.f32.mrb[18].mxu1 }
 0x101   :  { %v1862_v5 = vpack.c.bf16 %v466_v58, %v466_v58  ;;  %v1402_v6 = vsel %vm1370_vm5, %v466_v58, 0.0  ;;  %v1520_v7 = vmul.f32 %v466_v58, %v466_v58  ;;  %v469_v12 = vadd.f32 %v2216_v38, %v468_v2  ;;  %946 = vst.msk [vmem:[%s2967_s3 + $0x84] sm:$0xf] %vm912_vm4, %v1879_v36  ;;  %v2452_v4 = vpop.f32.mrb[19].mxu1 }
 0x102   :  { %931 = vst.msk [vmem:[%s2967_s3 + $0x48] sm:$0xf] %vm912_vm4, %v1864_v1  ;;  %v1522_v19 = vmul.f32 %v474_v52, %v474_v52  ;;  %v1403_v21 = vadd.f32 %v1402_v6, %v1401_v10  ;;  %v1598_v22 = vadd.f32 %v1597_v14, %v1596_v9  ;;  %v1865_v27 = vpack.c.bf16 %v477_v11, %v477_v11 }
 0x103   :  { %929 = vst.msk [vmem:[%s2967_s3 + $0x40] sm:$0xf] %vm912_vm4, %v1862_v5  ;;  %v1599_v15 = vsel %vm1370_vm5, %v1520_v7, 0.0  ;;  %v1863_v28 = vpack.c.bf16 %v469_v12, %v469_v12  ;;  %v1404_v29 = vsel %vm1370_vm5, %v469_v12, 0.0  ;;  %v1521_v30 = vmul.f32 %v469_v12, %v469_v12 }
 0x104   :  { %v1600_v20 = vadd.f32 %v1599_v15, %v1598_v22  ;;  %932 = vst.msk [vmem:[%s2967_s3 + $0x4c] sm:$0xf] %vm912_vm4, %v1865_v27  ;;  %v1405_v33 = vadd.f32 %v1404_v29, %v1403_v21  ;;  %v1406_v37 = vsel %vm1370_vm5, %v474_v52, 0.0  ;;  %v1523_v39 = vmul.f32 %v477_v11, %v477_v11 }
 0x105   :  { %v1970_v32 = vpop.f32.mrb[20].mxu0  ;;  %930 = vst.msk [vmem:[%s2967_s3 + $0x44] sm:$0xf] %vm912_vm4, %v1863_v28  ;;  %v1601_v41 = vsel %vm1370_vm5, %v1521_v30, 0.0  ;;  %v1603_v44 = vsel %vm1370_vm5, %v1522_v19, 0.0  ;;  %v1408_v51 = vsel %vm1370_vm5, %v477_v11, 0.0  ;;  %v2450_v2 = vadd.f32 %v2296_v49, %v2216_v38 }
 0x106   :  { %v490_v25 = vadd.f32 %v1970_v32, %v2216_v38  ;;  %v481_v34 = vpop.f32.mrb[21].mxu0  ;;  %v1407_v45 = vadd.f32 %v1406_v37, %v1405_v33  ;;  %v1602_v46 = vadd.f32 %v1601_v41, %v1600_v20  ;;  %v1605_v0 = vsel %vm1370_vm5, %v1523_v39, 0.0  ;;  %v2470_v37 = vpop.f32.mrb[20].mxu1 }
 0x107   :  { %v482_v42 = vadd.f32 %v2216_v38, %v481_v34  ;;  %v1971_v43 = vpop.f32.mrb[22].mxu0  ;;  %v1884_v32 = vpack.c.bf16 %v2450_v2, %v2450_v2 }
 0x108   :  { %v1868_v47 = vpack.c.bf16 %v490_v25, %v490_v25  ;;  %v484_v48 = vpop.f32.mrb[23].mxu0  ;;  %v1604_v57 = vadd.f32 %v1603_v44, %v1602_v46  ;;  %v1409_v58 = vadd.f32 %v1408_v51, %v1407_v45  ;;  %v493_v60 = vadd.f32 %v1971_v43, %v2216_v38  ;;  %v2478_v44 = vpop.f32.mrb[21].mxu1 }
 0x109   :  { %v1866_v52 = vpack.c.bf16 %v482_v42, %v482_v42  ;;  %v1410_v53 = vsel %vm1370_vm5, %v482_v42, 0.0  ;;  %v1524_v55 = vmul.f32 %v482_v42, %v482_v42  ;;  %v485_v61 = vadd.f32 %v2216_v38, %v484_v48  ;;  %951 = vst.msk [vmem:[%s2967_s3 + $0x98] sm:$0xf] %vm912_vm4, %v1884_v32  ;;  %v2486_v51 = vpop.f32.mrb[22].mxu1 }
 0x10a   :  { %935 = vst.msk [vmem:[%s2967_s3 + $0x58] sm:$0xf] %vm912_vm4, %v1868_v47  ;;  %v1526_v5 = vmul.f32 %v490_v25, %v490_v25  ;;  %v1411_v6 = vadd.f32 %v1410_v53, %v1409_v58  ;;  %v1606_v7 = vadd.f32 %v1605_v0, %v1604_v57  ;;  %v1869_v9 = vpack.c.bf16 %v493_v60, %v493_v60 }
 0x10b   :  { %933 = vst.msk [vmem:[%s2967_s3 + $0x50] sm:$0xf] %vm912_vm4, %v1866_v52  ;;  %v1607_v1 = vsel %vm1370_vm5, %v1524_v55, 0.0  ;;  %v1867_v10 = vpack.c.bf16 %v485_v61, %v485_v61  ;;  %v1412_v11 = vsel %vm1370_vm5, %v485_v61, 0.0  ;;  %v1525_v12 = vmul.f32 %v485_v61, %v485_v61  ;;  %v2494_v55 = vpop.f32.mrb[23].mxu1 }
 0x10c   :  { %v1414_v15 = vsel %vm1370_vm5, %v490_v25, 0.0  ;;  %v1608_v19 = vadd.f32 %v1607_v1, %v1606_v7  ;;  %936 = vst.msk [vmem:[%s2967_s3 + $0x5c] sm:$0xf] %vm912_vm4, %v1869_v9  ;;  %v1413_v49 = vadd.f32 %v1412_v11, %v1411_v6  ;;  %v1527_v27 = vmul.f32 %v493_v60, %v493_v60 }
 0x10d   :  { %v1974_v14 = vpop.f32.mrb[24].mxu0  ;;  %934 = vst.msk [vmem:[%s2967_s3 + $0x54] sm:$0xf] %vm912_vm4, %v1867_v10  ;;  %v1609_v28 = vsel %vm1370_vm5, %v1525_v12, 0.0  ;;  %v1611_v20 = vsel %vm1370_vm5, %v1526_v5, 0.0  ;;  %v1416_v39 = vsel %vm1370_vm5, %v493_v60, 0.0 }
 0x10e   :  { %v506_v21 = vadd.f32 %v1974_v14, %v2216_v38  ;;  %v497_v22 = vpop.f32.mrb[25].mxu0  ;;  %v1415_v33 = vadd.f32 %v1414_v15, %v1413_v49  ;;  %v1610_v25 = vadd.f32 %v1609_v28, %v1608_v19  ;;  %v1613_v52 = vsel %vm1370_vm5, %v1527_v27, 0.0  ;;  %v2514_v32 = vpop.f32.mrb[24].mxu1 }
 0x10f   :  { %v498_v29 = vadd.f32 %v2216_v38, %v497_v22  ;;  %v1975_v30 = vpop.f32.mrb[26].mxu0 }
 0x110   :  { %v1872_v34 = vpack.c.bf16 %v506_v21, %v506_v21  ;;  %v500_v36 = vpop.f32.mrb[27].mxu0  ;;  %v1612_v45 = vadd.f32 %v1611_v20, %v1610_v25  ;;  %v1417_v46 = vadd.f32 %v1416_v39, %v1415_v33  ;;  %v509_v47 = vadd.f32 %v1975_v30, %v2216_v38 }
 0x111   :  { %v1870_v41 = vpack.c.bf16 %v498_v29, %v498_v29  ;;  %v1418_v42 = vsel %vm1370_vm5, %v498_v29, 0.0  ;;  %v1528_v43 = vmul.f32 %v498_v29, %v498_v29  ;;  %v501_v48 = vadd.f32 %v2216_v38, %v500_v36  ;;  %v2518_v36 = vpop.f32.mrb[25].mxu1 }
 0x112   :  { %939 = vst.msk [vmem:[%s2967_s3 + $0x68] sm:$0xf] %vm912_vm4, %v1872_v34  ;;  %v1530_v57 = vmul.f32 %v506_v21, %v506_v21  ;;  %v1419_v58 = vadd.f32 %v1418_v42, %v1417_v46  ;;  %v1614_v60 = vadd.f32 %v1613_v52, %v1612_v45  ;;  %v1873_v61 = vpack.c.bf16 %v509_v47, %v509_v47 }
 0x113   :  { %937 = vst.msk [vmem:[%s2967_s3 + $0x60] sm:$0xf] %vm912_vm4, %v1870_v41  ;;  %v1615_v53 = vsel %vm1370_vm5, %v1528_v43, 0.0  ;;  %v1871_v0 = vpack.c.bf16 %v501_v48, %v501_v48  ;;  %v1420_v1 = vsel %vm1370_vm5, %v501_v48, 0.0  ;;  %v1529_v5 = vmul.f32 %v501_v48, %v501_v48  ;;  %v2526_v43 = vpop.f32.mrb[26].mxu1 }
 0x114   :  { %v1422_v7 = vsel %vm1370_vm5, %v506_v21, 0.0  ;;  %v1616_v9 = vadd.f32 %v1615_v53, %v1614_v60  ;;  %940 = vst.msk [vmem:[%s2967_s3 + $0x6c] sm:$0xf] %vm912_vm4, %v1873_v61  ;;  %v1421_v10 = vadd.f32 %v1420_v1, %v1419_v58  ;;  %v1531_v14 = vmul.f32 %v509_v47, %v509_v47  ;;  %v2536_v48 = vpop.f32.mrb[27].mxu1 }
 0x115   :  { %v1978_v6 = vpop.f32.mrb[28].mxu0  ;;  %938 = vst.msk [vmem:[%s2967_s3 + $0x64] sm:$0xf] %vm912_vm4, %v1871_v0  ;;  %v1617_v15 = vsel %vm1370_vm5, %v1529_v5, 0.0  ;;  %v2511_v21 = vadd.f32 %v2216_v38, %v2304_v54  ;;  %v1619_v22 = vsel %vm1370_vm5, %v1530_v57, 0.0  ;;  %v1424_v20 = vsel %vm1370_vm5, %v509_v47, 0.0 }
 0x116   :  { %v522_v11 = vadd.f32 %v1978_v6, %v2216_v38  ;;  %v513_v12 = vpop.f32.mrb[29].mxu0  ;;  %v1423_v27 = vadd.f32 %v1422_v7, %v1421_v10  ;;  %v1618_v28 = vadd.f32 %v1617_v15, %v1616_v9  ;;  %v1621_v45 = vsel %vm1370_vm5, %v1531_v14, 0.0 }
 0x117   :  { %v514_v19 = vadd.f32 %v2216_v38, %v513_v12  ;;  %v1979_v49 = vpop.f32.mrb[30].mxu0  ;;  %v1882_v47 = vpack.c.bf16 %v2511_v21, %v2511_v21  ;;  %v1536_v58 = vmul.f32 %v2270_v24, %v2270_v24  ;;  %v2552_v9 = vadd.f32 %v2312_v59, %v2216_v38 }
 0x118   :  { %v1876_v29 = vpack.c.bf16 %v522_v11, %v522_v11  ;;  %v516_v30 = vpop.f32.mrb[31].mxu0  ;;  %v1620_v39 = vadd.f32 %v1619_v22, %v1618_v28  ;;  %v1425_v54 = vadd.f32 %v1424_v20, %v1423_v27  ;;  %v525_v41 = vadd.f32 %v1979_v49, %v2216_v38  ;;  %v2567_v49 = vpop.f32.mrb[28].mxu1 }
 0x119   :  { %v1874_v33 = vpack.c.bf16 %v514_v19, %v514_v19  ;;  %v1426_v25 = vsel %vm1370_vm5, %v514_v19, 0.0  ;;  %v1532_v34 = vmul.f32 %v514_v19, %v514_v19  ;;  %v517_v42 = vadd.f32 %v2216_v38, %v516_v30  ;;  %949 = vst.msk [vmem:[%s2967_s3 + $0x90] sm:$0xf] %vm912_vm4, %v1882_v47 }
 0x11a   :  { %943 = vst.msk [vmem:[%s2967_s3 + $0x78] sm:$0xf] %vm912_vm4, %v1876_v29  ;;  %v1427_v52 = vadd.f32 %v1426_v25, %v1425_v54  ;;  %v1622_v53 = vadd.f32 %v1621_v45, %v1620_v39  ;;  %v1877_v57 = vpack.c.bf16 %v525_v41, %v525_v41  ;;  %v1534_v60 = vmul.f32 %v522_v11, %v522_v11 }
 0x11b   :  { %941 = vst.msk [vmem:[%s2967_s3 + $0x70] sm:$0xf] %vm912_vm4, %v1874_v33  ;;  %v1623_v46 = vsel %vm1370_vm5, %v1532_v34, 0.0  ;;  %v1875_v61 = vpack.c.bf16 %v517_v42, %v517_v42  ;;  %v1428_v0 = vsel %vm1370_vm5, %v517_v42, 0.0  ;;  %v1533_v1 = vmul.f32 %v517_v42, %v517_v42 }
 0x11c   :  { %v1430_v5 = vsel %vm1370_vm5, %v522_v11, 0.0  ;;  %v1624_v6 = vadd.f32 %v1623_v46, %v1622_v53  ;;  %944 = vst.msk [vmem:[%s2967_s3 + $0x7c] sm:$0xf] %vm912_vm4, %v1877_v57  ;;  %v1429_v7 = vadd.f32 %v1428_v0, %v1427_v52  ;;  %v1535_v10 = vmul.f32 %v525_v41, %v525_v41 }
 0x11d   :  { %942 = vst.msk [vmem:[%s2967_s3 + $0x74] sm:$0xf] %vm912_vm4, %v1875_v61  ;;  %v1625_v12 = vsel %vm1370_vm5, %v1533_v1, 0.0  ;;  %v549_v11 = vadd.f32 %v2216_v38, %v2320_v62  ;;  %v2563_v14 = vadd.f32 %v2340_v26, %v2216_v38  ;;  %v1885_v59 = vpack.c.bf16 %v2552_v9, %v2552_v9  ;;  %v2573_v62 = vpop.f32.mrb[29].mxu1 }
 0x11e   :  { %v1431_v15 = vadd.f32 %v1430_v5, %v1429_v7  ;;  %v1626_v19 = vadd.f32 %v1625_v12, %v1624_v6  ;;  %v1627_v22 = vsel %vm1370_vm5, %v1534_v60, 0.0  ;;  %v1432_v27 = vsel %vm1370_vm5, %v525_v41, 0.0  ;;  %v2581_v33 = vpop.f32.mrb[30].mxu1 }
 0x11f   :  { %v1434_v28 = vsel %vm1370_vm5, %v2270_v24, 0.0  ;;  %v1883_v29 = vpack.c.bf16 %v549_v11, %v549_v11  ;;  %952 = vst.msk [vmem:[%s2967_s3 + $0x9c] sm:$0xf] %vm912_vm4, %v1885_v59  ;;  %v1888_v20 = vpack.c.bf16 %v2563_v14, %v2563_v14  ;;  %v1629_v25 = vsel %vm1370_vm5, %v1535_v10, 0.0  ;;  %v2593_v54 = vpop.f32.mrb[31].mxu1 }
 0x120   :  { %v1628_v30 = vadd.f32 %v1627_v22, %v1626_v19  ;;  %v1433_v26 = vadd.f32 %v1432_v27, %v1431_v15  ;;  %v1631_v34 = vsel %vm1370_vm5, %v1536_v58, 0.0  ;;  %v1537_v24 = vmul.f32 %v2404_v17, %v2404_v17 }
 0x121   :  { %950 = vst.msk [vmem:[%s2967_s3 + $0x94] sm:$0xf] %vm912_vm4, %v1883_v29  ;;  %v562_v39 = vadd.f32 %v2216_v38, %v2344_v31  ;;  %955 = vst.msk [vmem:[%s2967_s3 + $0xa8] sm:$0xf] %vm912_vm4, %v1888_v20  ;;  %v2601_v45 = vadd.f32 %v2352_v35, %v2216_v38  ;;  %v1438_v46 = vsel %vm1370_vm5, %v2267_v23, 0.0  ;;  %v1538_v47 = vmul.f32 %v2267_v23, %v2267_v23 }
 0x122   :  { %v1435_v41 = vadd.f32 %v1434_v28, %v1433_v26  ;;  %v1630_v42 = vadd.f32 %v1629_v25, %v1628_v30  ;;  %v1436_v31 = vsel %vm1370_vm5, %v2404_v17, 0.0  ;;  %v1539_v57 = vmul.f32 %v2337_v16, %v2337_v16 }
 0x123   :  { %v1886_v52 = vpack.c.bf16 %v562_v39, %v562_v39  ;;  %v1889_v60 = vpack.c.bf16 %v2601_v45, %v2601_v45  ;;  %v1633_v35 = vsel %vm1370_vm5, %v1537_v24, 0.0  ;;  %v1540_v61 = vmul.f32 %v2511_v21, %v2511_v21 }
 0x124   :  { %v1632_v53 = vadd.f32 %v1631_v34, %v1630_v42  ;;  %v1437_v58 = vadd.f32 %v1436_v31, %v1435_v41  ;;  %v565_v23 = vadd.f32 %v2216_v38, %v2362_v40  ;;  %v2624_v17 = vadd.f32 %v2382_v3, %v2216_v38 }
 0x125   :  { %953 = vst.msk [vmem:[%s2967_s3 + $0xa0] sm:$0xf] %vm912_vm4, %v1886_v52  ;;  %956 = vst.msk [vmem:[%s2967_s3 + $0xac] sm:$0xf] %vm912_vm4, %v1889_v60  ;;  %v2632_v5 = vadd.f32 %v2216_v38, %v2386_v8  ;;  %v2636_v6 = vadd.f32 %v2394_v13, %v2216_v38  ;;  %v1635_v40 = vsel %vm1370_vm5, %v1538_v47, 0.0  ;;  %v1440_v3 = vsel %vm1370_vm5, %v2337_v16, 0.0 }
 0x126   :  { %v1439_v0 = vadd.f32 %v1438_v46, %v1437_v58  ;;  %v1634_v1 = vadd.f32 %v1633_v35, %v1632_v53  ;;  %v1442_v7 = vsel %vm1370_vm5, %v2511_v21, 0.0  ;;  %v1887_v10 = vpack.c.bf16 %v565_v23, %v565_v23 }
 0x127   :  { %v1892_v19 = vpack.c.bf16 %v2624_v17, %v2624_v17  ;;  %v1637_v8 = vsel %vm1370_vm5, %v1539_v57, 0.0  ;;  %v1639_v59 = vsel %vm1370_vm5, %v1540_v61, 0.0  ;;  %v1541_v13 = vmul.f32 %v549_v11, %v549_v11 }
 0x128   :  { %v1636_v12 = vadd.f32 %v1635_v40, %v1634_v1  ;;  %v1441_v15 = vadd.f32 %v1440_v3, %v1439_v0  ;;  %954 = vst.msk [vmem:[%s2967_s3 + $0xa4] sm:$0xf] %vm912_vm4, %v1887_v10  ;;  %v1890_v16 = vpack.c.bf16 %v2632_v5, %v2632_v5  ;;  %v1542_v21 = vmul.f32 %v2450_v2, %v2450_v2 }
 0x129   :  { %959 = vst.msk [vmem:[%s2967_s3 + $0xb8] sm:$0xf] %vm912_vm4, %v1892_v19  ;;  %v1893_v28 = vpack.c.bf16 %v2636_v6, %v2636_v6  ;;  %v1444_v29 = vsel %vm1370_vm5, %v549_v11, 0.0  ;;  %v2668_v30 = vadd.f32 %v2216_v38, %v2406_v18  ;;  %v1446_v26 = vsel %vm1370_vm5, %v2450_v2, 0.0 }
 0x12a   :  { %v1443_v22 = vadd.f32 %v1442_v7, %v1441_v15  ;;  %v1638_v27 = vadd.f32 %v1637_v8, %v1636_v12  ;;  %957 = vst.msk [vmem:[%s2967_s3 + $0xb0] sm:$0xf] %vm912_vm4, %v1890_v16  ;;  %v2678_v11 = vadd.f32 %v2428_v50, %v2216_v38  ;;  %v1543_v34 = vmul.f32 %v2552_v9, %v2552_v9 }
 0x12b   :  { %960 = vst.msk [vmem:[%s2967_s3 + $0xbc] sm:$0xf] %vm912_vm4, %v1893_v28  ;;  %v1641_v18 = vsel %vm1370_vm5, %v1541_v13, 0.0  ;;  %v1544_v24 = vmul.f32 %v562_v39, %v562_v39  ;;  %v1891_v2 = vpack.c.bf16 %v2668_v30, %v2668_v30  ;;  %v1643_v41 = vsel %vm1370_vm5, %v1542_v21, 0.0 }
 0x12c   :  { %v1640_v20 = vadd.f32 %v1639_v59, %v1638_v27  ;;  %v1445_v25 = vadd.f32 %v1444_v29, %v1443_v22  ;;  %v1896_v47 = vpack.c.bf16 %v2678_v11, %v2678_v11  ;;  %v1448_v50 = vsel %vm1370_vm5, %v2552_v9, 0.0 }
 0x12d   :  { %v1450_v31 = vsel %vm1370_vm5, %v562_v39, 0.0  ;;  %958 = vst.msk [vmem:[%s2967_s3 + $0xb4] sm:$0xf] %vm912_vm4, %v1891_v2  ;;  %v2697_v52 = vadd.f32 %v2216_v38, %v2432_v56  ;;  %v2701_v53 = vadd.f32 %v2440_v63, %v2216_v38  ;;  %v2709_v9 = vadd.f32 %v2216_v38, %v2452_v4 }
 0x12e   :  { %v1447_v42 = vadd.f32 %v1446_v26, %v1445_v25  ;;  %v1642_v46 = vadd.f32 %v1641_v18, %v1640_v20  ;;  %963 = vst.msk [vmem:[%s2967_s3 + $0xc8] sm:$0xf] %vm912_vm4, %v1896_v47  ;;  %v2713_v39 = vadd.f32 %v2470_v37, %v2216_v38  ;;  %v1645_v56 = vsel %vm1370_vm5, %v1543_v34, 0.0 }
 0x12f   :  { %v1647_v63 = vsel %vm1370_vm5, %v1544_v24, 0.0  ;;  %v1545_v60 = vmul.f32 %v565_v23, %v565_v23  ;;  %v1894_v35 = vpack.c.bf16 %v2697_v52, %v2697_v52  ;;  %v1897_v1 = vpack.c.bf16 %v2701_v53, %v2701_v53 }
 0x130   :  { %v1644_v57 = vadd.f32 %v1643_v41, %v1642_v46  ;;  %v1449_v58 = vadd.f32 %v1448_v50, %v1447_v42  ;;  %v1546_v4 = vmul.f32 %v2563_v14, %v2563_v14  ;;  %v1452_v40 = vsel %vm1370_vm5, %v565_v23, 0.0 }
 0x131   :  { %961 = vst.msk [vmem:[%s2967_s3 + $0xc0] sm:$0xf] %vm912_vm4, %v1894_v35  ;;  %v1895_v37 = vpack.c.bf16 %v2709_v9, %v2709_v9  ;;  %v1547_v7 = vmul.f32 %v2601_v45, %v2601_v45  ;;  %964 = vst.msk [vmem:[%s2967_s3 + $0xcc] sm:$0xf] %vm912_vm4, %v1897_v1  ;;  %v1900_v23 = vpack.c.bf16 %v2713_v39, %v2713_v39  ;;  %v1454_v12 = vsel %vm1370_vm5, %v2563_v14, 0.0 }
 0x132   :  { %v1451_v61 = vadd.f32 %v1450_v31, %v1449_v58  ;;  %v1646_v0 = vadd.f32 %v1645_v56, %v1644_v57  ;;  %v1649_v15 = vsel %vm1370_vm5, %v1545_v60, 0.0  ;;  %v1548_v19 = vmul.f32 %v2632_v5, %v2632_v5 }
 0x133   :  { %962 = vst.msk [vmem:[%s2967_s3 + $0xc4] sm:$0xf] %vm912_vm4, %v1895_v37  ;;  %v2749_v8 = vadd.f32 %v2216_v38, %v2478_v44  ;;  %967 = vst.msk [vmem:[%s2967_s3 + $0xd8] sm:$0xf] %vm912_vm4, %v1900_v23  ;;  %v2757_v14 = vadd.f32 %v2486_v51, %v2216_v38  ;;  %v1651_v16 = vsel %vm1370_vm5, %v1546_v4, 0.0  ;;  %v1456_v21 = vsel %vm1370_vm5, %v2601_v45, 0.0 }
 0x134   :  { %v1648_v3 = vadd.f32 %v1647_v63, %v1646_v0  ;;  %v1453_v10 = vadd.f32 %v1452_v40, %v1451_v61  ;;  %v1458_v44 = vsel %vm1370_vm5, %v2632_v5, 0.0  ;;  %v1653_v27 = vsel %vm1370_vm5, %v1547_v7, 0.0 }
 0x135   :  { %v1898_v22 = vpack.c.bf16 %v2749_v8, %v2749_v8  ;;  %v1901_v26 = vpack.c.bf16 %v2757_v14, %v2757_v14  ;;  %v1655_v51 = vsel %vm1370_vm5, %v1548_v19, 0.0  ;;  %v1549_v20 = vmul.f32 %v2668_v30, %v2668_v30 }
 0x136   :  { %v1455_v59 = vadd.f32 %v1454_v12, %v1453_v10  ;;  %v1650_v13 = vadd.f32 %v1649_v15, %v1648_v3  ;;  %v2778_v45 = vadd.f32 %v2216_v38, %v2494_v55  ;;  %v2782_v5 = vadd.f32 %v2514_v32, %v2216_v38 }
 0x137   :  { %965 = vst.msk [vmem:[%s2967_s3 + $0xd0] sm:$0xf] %vm912_vm4, %v1898_v22  ;;  %968 = vst.msk [vmem:[%s2967_s3 + $0xdc] sm:$0xf] %vm912_vm4, %v1901_v26  ;;  %v2790_v18 = vadd.f32 %v2216_v38, %v2518_v36  ;;  %v2794_v24 = vadd.f32 %v2526_v43, %v2216_v38  ;;  %v1550_v55 = vmul.f32 %v2624_v17, %v2624_v17  ;;  %v1460_v32 = vsel %vm1370_vm5, %v2668_v30, 0.0 }
 0x138   :  { %v1652_v28 = vadd.f32 %v1651_v16, %v1650_v13  ;;  %v1457_v29 = vadd.f32 %v1456_v21, %v1455_v59  ;;  %v1899_v2 = vpack.c.bf16 %v2778_v45, %v2778_v45  ;;  %v1462_v41 = vsel %vm1370_vm5, %v2624_v17, 0.0 }
 0x139   :  { %v1904_v36 = vpack.c.bf16 %v2782_v5, %v2782_v5  ;;  %v1551_v43 = vmul.f32 %v2636_v6, %v2636_v6  ;;  %v1657_v47 = vsel %vm1370_vm5, %v1549_v20, 0.0  ;;  %v1552_v50 = vmul.f32 %v2697_v52, %v2697_v52 }
 0x13a   :  { %v1459_v25 = vadd.f32 %v1458_v44, %v1457_v29  ;;  %v1654_v34 = vadd.f32 %v1653_v27, %v1652_v28  ;;  %966 = vst.msk [vmem:[%s2967_s3 + $0xd4] sm:$0xf] %vm912_vm4, %v1899_v2  ;;  %v1902_v17 = vpack.c.bf16 %v2790_v18, %v2790_v18  ;;  %v1905_v57 = vpack.c.bf16 %v2794_v24, %v2794_v24 }
 0x13b   :  { %971 = vst.msk [vmem:[%s2967_s3 + $0xe8] sm:$0xf] %vm912_vm4, %v1904_v36  ;;  %v1659_v58 = vsel %vm1370_vm5, %v1550_v55, 0.0  ;;  %v1464_v56 = vsel %vm1370_vm5, %v2636_v6, 0.0  ;;  %v1466_v63 = vsel %vm1370_vm5, %v2697_v52, 0.0  ;;  %v2834_v60 = vadd.f32 %v2216_v38, %v2536_v48 }
 0x13c   :  { %v1656_v42 = vadd.f32 %v1655_v51, %v1654_v34  ;;  %v1461_v46 = vadd.f32 %v1460_v32, %v1459_v25  ;;  %969 = vst.msk [vmem:[%s2967_s3 + $0xe0] sm:$0xf] %vm912_vm4, %v1902_v17  ;;  %972 = vst.msk [vmem:[%s2967_s3 + $0xec] sm:$0xf] %vm912_vm4, %v1905_v57  ;;  %v2842_v6 = vadd.f32 %v2567_v49, %v2216_v38  ;;  %v1661_v52 = vsel %vm1370_vm5, %v1551_v43, 0.0 }
 0x13d   :  { %v1663_v0 = vsel %vm1370_vm5, %v1552_v50, 0.0  ;;  %v1553_v1 = vmul.f32 %v2709_v9, %v2709_v9  ;;  %v1903_v48 = vpack.c.bf16 %v2834_v60, %v2834_v60  ;;  %v1554_v3 = vmul.f32 %v2678_v11, %v2678_v11 }
 0x13e   :  { %v1463_v30 = vadd.f32 %v1462_v41, %v1461_v46  ;;  %v1658_v31 = vadd.f32 %v1657_v47, %v1656_v42  ;;  %v1908_v37 = vpack.c.bf16 %v2842_v6, %v2842_v6  ;;  %v1468_v49 = vsel %vm1370_vm5, %v2709_v9, 0.0 }
 0x13f   :  { %970 = vst.msk [vmem:[%s2967_s3 + $0xe4] sm:$0xf] %vm912_vm4, %v1903_v48  ;;  %v642_v7 = vadd.f32 %v2216_v38, %v2573_v62  ;;  %v2864_v10 = vadd.f32 %v2581_v33, %v2216_v38  ;;  %v1470_v23 = vsel %vm1370_vm5, %v2678_v11, 0.0  ;;  %v2874_v9 = vadd.f32 %v2216_v38, %v2593_v54 }
 0x140   :  { %v1660_v35 = vadd.f32 %v1659_v58, %v1658_v31  ;;  %v1465_v61 = vadd.f32 %v1464_v56, %v1463_v30  ;;  %975 = vst.msk [vmem:[%s2967_s3 + $0xf8] sm:$0xf] %vm912_vm4, %v1908_v37  ;;  %v1555_v62 = vmul.f32 %v2701_v53, %v2701_v53  ;;  %v1665_v33 = vsel %vm1370_vm5, %v1553_v1, 0.0 }
 0x141   :  { %v1556_v19 = vmul.f32 %v2749_v8, %v2749_v8  ;;  %v1906_v11 = vpack.c.bf16 %v642_v7, %v642_v7  ;;  %v1909_v16 = vpack.c.bf16 %v2864_v10, %v2864_v10  ;;  %v1667_v21 = vsel %vm1370_vm5, %v1554_v3, 0.0 }
 0x142   :  { %v1467_v4 = vadd.f32 %v1466_v63, %v1465_v61  ;;  %v1662_v40 = vadd.f32 %v1661_v52, %v1660_v35  ;;  %v1472_v38 = vsel %vm1370_vm5, %v2701_v53, 0.0  ;;  %v1474_v54 = vsel %vm1370_vm5, %v2749_v8, 0.0 }
 0x143   :  { %973 = vst.msk [vmem:[%s2967_s3 + $0xf0] sm:$0xf] %vm912_vm4, %v1906_v11  ;;  %v1907_v44 = vpack.c.bf16 %v2874_v9, %v2874_v9  ;;  %976 = vst.msk [vmem:[%s2967_s3 + $0xfc] sm:$0xf] %vm912_vm4, %v1909_v16  ;;  %v1669_v53 = vsel %vm1370_vm5, %v1555_v62, 0.0  ;;  %v1671_v28 = vsel %vm1370_vm5, %v1556_v19, 0.0  ;;  %v1557_v8 = vmul.f32 %v2778_v45, %v2778_v45 }
 0x144   :  { %v1664_v12 = vadd.f32 %v1663_v0, %v1662_v40  ;;  %v1469_v15 = vadd.f32 %v1468_v49, %v1467_v4  ;;  %v1558_v51 = vmul.f32 %v2713_v39, %v2713_v39  ;;  %v1476_v20 = vsel %vm1370_vm5, %v2778_v45, 0.0 }
 0x145   :  { %974 = vst.msk [vmem:[%s2967_s3 + $0xf4] sm:$0xf] %vm912_vm4, %v1907_v44  ;;  %v1478_v55 = vsel %vm1370_vm5, %v2713_v39, 0.0  ;;  %v1559_v32 = vmul.f32 %v2757_v14, %v2757_v14  ;;  %v1673_v2 = vsel %vm1370_vm5, %v1557_v8, 0.0  ;;  %v1560_v41 = vmul.f32 %v2790_v18, %v2790_v18 }
 0x146   :  { %v1471_v59 = vadd.f32 %v1470_v23, %v1469_v15  ;;  %v1666_v13 = vadd.f32 %v1665_v33, %v1664_v12  ;;  %v1675_v36 = vsel %vm1370_vm5, %v1558_v51, 0.0  ;;  %v1480_v45 = vsel %vm1370_vm5, %v2757_v14, 0.0 }
 0x147   :  { %v1482_v43 = vsel %vm1370_vm5, %v2790_v18, 0.0  ;;  %v1677_v50 = vsel %vm1370_vm5, %v1559_v32, 0.0  ;;  %v1679_v17 = vsel %vm1370_vm5, %v1560_v41, 0.0  ;;  %v1561_v30 = vmul.f32 %v2834_v60, %v2834_v60 }
 0x148   :  { %v1668_v22 = vadd.f32 %v1667_v21, %v1666_v13  ;;  %v1473_v27 = vadd.f32 %v1472_v38, %v1471_v59  ;;  %v1562_v58 = vmul.f32 %v2782_v5, %v2782_v5  ;;  %v1484_v14 = vsel %vm1370_vm5, %v2834_v60, 0.0 }
 0x149   :  { %v1486_v18 = vsel %vm1370_vm5, %v2782_v5, 0.0  ;;  %v1563_v35 = vmul.f32 %v2794_v24, %v2794_v24  ;;  %v1681_v61 = vsel %vm1370_vm5, %v1561_v30, 0.0  ;;  %v1564_v52 = vmul.f32 %v642_v7, %v642_v7 }
 0x14a   :  { %v1475_v29 = vadd.f32 %v1474_v54, %v1473_v27  ;;  %v1670_v26 = vadd.f32 %v1669_v53, %v1668_v22  ;;  %v1683_v48 = vsel %vm1370_vm5, %v1562_v58, 0.0  ;;  %v1488_v4 = vsel %vm1370_vm5, %v2794_v24, 0.0 }
 0x14b   :  { %v1490_v60 = vsel %vm1370_vm5, %v642_v7, 0.0  ;;  %v1685_v3 = vsel %vm1370_vm5, %v1563_v35, 0.0  ;;  %v1687_v5 = vsel %vm1370_vm5, %v1564_v52, 0.0  ;;  %v1565_v49 = vmul.f32 %v2874_v9, %v2874_v9 }
 0x14c   :  { %v1672_v25 = vadd.f32 %v1671_v28, %v1670_v26  ;;  %v1477_v34 = vadd.f32 %v1476_v20, %v1475_v29  ;;  %v1566_v15 = vmul.f32 %v2842_v6, %v2842_v6  ;;  %v1492_v62 = vsel %vm1370_vm5, %v2874_v9, 0.0 }
 0x14d   :  { %v1494_v7 = vsel %vm1370_vm5, %v2842_v6, 0.0  ;;  %v1567_v19 = vmul.f32 %v2864_v10, %v2864_v10  ;;  %v1689_v11 = vsel %vm1370_vm5, %v1565_v49, 0.0  ;;  %v1496_v21 = vsel %vm1370_vm5, %v2864_v10, 0.0  ;;  %v1703_v10 = vld [vmem:[%s2966_s4] sm:$0x3] }
 0x14e   :  { %v1479_v42 = vadd.f32 %v1478_v55, %v1477_v34  ;;  %v1674_v46 = vadd.f32 %v1673_v2, %v1672_v25  ;;  %v1691_v16 = vsel %vm1370_vm5, %v1566_v15, 0.0 }
 0x14f   :  { %v1693_v9 = vsel %vm1370_vm5, %v1567_v19, 0.0 }
 0x150   :  { %v1676_v47 = vadd.f32 %v1675_v36, %v1674_v46  ;;  %v1481_v39 = vadd.f32 %v1480_v45, %v1479_v42 }
 0x152   :  { %v1483_v31 = vadd.f32 %v1482_v43, %v1481_v39  ;;  %v1678_v57 = vadd.f32 %v1677_v50, %v1676_v47 }
 0x154   :  { %v1680_v56 = vadd.f32 %v1679_v17, %v1678_v57  ;;  %v1485_v63 = vadd.f32 %v1484_v14, %v1483_v31 }
 0x156   :  { %v1487_v0 = vadd.f32 %v1486_v18, %v1485_v63  ;;  %v1682_v1 = vadd.f32 %v1681_v61, %v1680_v56 }
 0x158   :  { %v1684_v40 = vadd.f32 %v1683_v48, %v1682_v1  ;;  %v1489_v37 = vadd.f32 %v1488_v4, %v1487_v0 }
 0x15a   :  { %v1491_v23 = vadd.f32 %v1490_v60, %v1489_v37  ;;  %v1686_v12 = vadd.f32 %v1685_v3, %v1684_v40 }
 0x15c   :  { %v1688_v24 = vadd.f32 %v1687_v5, %v1686_v12  ;;  %v1493_v33 = vadd.f32 %v1492_v62, %v1491_v23 }
 0x15e   :  { %v1495_v59 = vadd.f32 %v1494_v7, %v1493_v33  ;;  %v1690_v13 = vadd.f32 %v1689_v11, %v1688_v24 }
 0x160   :  { %v1497_v38 = vadd.f32 %v1496_v21, %v1495_v59  ;;  %v1692_v54 = vadd.f32 %v1691_v16, %v1690_v13 }
 0x162   :  { %v1498_v44 = vrot.slane %v1497_v38, 4  ;;  %v1694_v22 = vadd.f32 %v1693_v9, %v1692_v54 }
 0x164   :  { %v1499_v27 = vadd.f32 %v1498_v44, %v1497_v38  ;;  %v1695_v6 = vrot.slane %v1694_v22, 4 }
 0x166   :  { %v1500_v53 = vrot.slane %v1499_v27, 2  ;;  %v1696_v28 = vadd.f32 %v1695_v6, %v1694_v22 }
 0x168   :  { %v1501_v8 = vadd.f32 %v1500_v53, %v1499_v27  ;;  %v1697_v29 = vrot.slane %v1696_v28, 2 }
 0x16a   :  { %v1502_v26 = vrot.slane %v1501_v8, 1  ;;  %v1698_v51 = vadd.f32 %v1697_v29, %v1696_v28 }
 0x16c   :  { %v1699_v20 = vrot.slane %v1698_v51, 1  ;;  %v1503_v25 = vadd.f32 %v1502_v26, %v1501_v8 }
 0x16e   :  { %v1700_v34 = vadd.f32 %v1699_v20, %v1698_v51 }
 0x170   :  { %v1702_v55 = vsel %vm1701_vm6, %v1503_v25, %v1700_v34 }
 0x171   :  { %v1704_v32 = vadd.f32 %v1703_v10, %v1702_v55 }
 0x173   :  { %1706 = vst.msk [vmem:[%s2966_s4] sm:$0x3] %vm981_vm3, %v1704_v32 }

// kernel: net_simple_conv_forward.12
= control target key start
LH: loop header
LB: loop body
LE: loop exit
PB: predicated region body
PF: predicated region fallthrough
CT: control target
= control target key end

     0   :  { %vm172_vm0 = vcmask 519168   ;;  %s416_s0 = inlined_call_operand.vmem [shape: bf16[128,64], index: 0, kind: input, shape index: {}]   ;;  %s417_s1 = inlined_call_operand.vmem [shape: f32[1,64], index: 1, kind: input, shape index: {}]   ;;  %s418_s2 = inlined_call_operand.vmem [shape: f32[1,64], index: 2, kind: input, shape index: {}]   ;;  %s419_s3 = inlined_call_operand.vmem [shape: bf16[128,64], index: 3, kind: output, shape index: {}]  }
   0x1   :  { %v228_v0 = vld [vmem:[%s416_s0] sm:$0xff]   ;;  %v259_v4 = vld [vmem:[%s416_s0 + $0x8] sm:$0xff]   ;;  %v260_v5 = vld [vmem:[%s416_s0 + $0x10] sm:$0xff]  }
   0x2   :  { %v292_v1 = vld [vmem:[%s417_s1] ss:$0 sm:$0xff]  ;;  %v229_v2 = vunpack.c.l.bf16 %v228_v0  ;;  %v230_v3 = vunpack.c.h.bf16 %v228_v0  ;;  %v261_v6 = vld [vmem:[%s416_s0 + $0x18] sm:$0xff]   ;;  %v233_v8 = vunpack.c.l.bf16 %v259_v4  ;;  %v234_v9 = vunpack.c.h.bf16 %v259_v4  ;;  %v263_v41 = vld [vmem:[%s416_s0 + $0x28] sm:$0xff]  }
   0x3   :  { %v306_v7 = vld [vmem:[%s418_s2] ss:$0 sm:$0xff]  ;;  %v237_v10 = vunpack.c.l.bf16 %v260_v5  ;;  %v238_v11 = vunpack.c.h.bf16 %v260_v5  ;;  %v241_v14 = vunpack.c.l.bf16 %v261_v6  ;;  %v242_v15 = vunpack.c.h.bf16 %v261_v6  ;;  %v264_v42 = vld [vmem:[%s416_s0 + $0x30] sm:$0xff]   ;;  %v265_v47 = vld [vmem:[%s416_s0 + $0x38] sm:$0xff]  }
   0x4   :  { %v53_v12 = vmul.f32 %v229_v2, %v292_v1  ;;  %v54_v13 = vmul.f32 %v230_v3, %v292_v1  ;;  %v55_v16 = vmul.f32 %v233_v8, %v292_v1  ;;  %v56_v17 = vmul.f32 %v234_v9, %v292_v1  ;;  %v262_v36 = vld [vmem:[%s416_s0 + $0x20] sm:$0xff]  }
   0x5   :  { %v57_v18 = vmul.f32 %v237_v10, %v292_v1  ;;  %v58_v19 = vmul.f32 %v238_v11, %v292_v1  ;;  %v59_v22 = vmul.f32 %v241_v14, %v292_v1  ;;  %v60_v23 = vmul.f32 %v242_v15, %v292_v1 }
   0x6   :  { %v76_v20 = vadd.f32 %v306_v7, %v53_v12  ;;  %v77_v21 = vadd.f32 %v306_v7, %v54_v13  ;;  %v78_v24 = vadd.f32 %v306_v7, %v55_v16  ;;  %v79_v25 = vadd.f32 %v306_v7, %v56_v17 }
   0x7   :  { %v80_v26 = vadd.f32 %v306_v7, %v57_v18  ;;  %v81_v27 = vadd.f32 %v306_v7, %v58_v19  ;;  %v82_v30 = vadd.f32 %v306_v7, %v59_v22  ;;  %v83_v31 = vadd.f32 %v306_v7, %v60_v23 }
   0x8   :  { %v92_v28 = vmax.f32 %v76_v20, 0.0  ;;  %v93_v29 = vmax.f32 %v77_v21, 0.0  ;;  %v94_v32 = vmax.f32 %v78_v24, 0.0  ;;  %v95_v33 = vmax.f32 %v79_v25, 0.0 }
   0x9   :  { %v96_v34 = vmax.f32 %v80_v26, 0.0  ;;  %v97_v35 = vmax.f32 %v81_v27, 0.0  ;;  %v98_v39 = vmax.f32 %v82_v30, 0.0  ;;  %v99_v40 = vmax.f32 %v83_v31, 0.0 }
   0xa   :  { %v211_v37 = vpack.c.bf16 %v92_v28, %v92_v28  ;;  %v212_v38 = vpack.c.bf16 %v93_v29, %v93_v29  ;;  %v213_v43 = vpack.c.bf16 %v94_v32, %v94_v32  ;;  %v214_v44 = vpack.c.bf16 %v95_v33, %v95_v33 }
   0xb   :  { %v215_v45 = vpack.c.bf16 %v96_v34, %v96_v34  ;;  %v216_v46 = vpack.c.bf16 %v97_v35, %v97_v35  ;;  %v217_v48 = vpack.c.bf16 %v98_v39, %v98_v39  ;;  %v218_v49 = vpack.c.bf16 %v99_v40, %v99_v40 }
   0xc   :  { %173 = vst.msk [vmem:[%s419_s3] sm:$0xf] %vm172_vm0, %v211_v37  ;;  %174 = vst.msk [vmem:[%s419_s3 + $0x4] sm:$0xf] %vm172_vm0, %v212_v38  ;;  %v245_v50 = vunpack.c.l.bf16 %v262_v36  ;;  %v246_v51 = vunpack.c.h.bf16 %v262_v36  ;;  %v249_v52 = vunpack.c.l.bf16 %v263_v41  ;;  %v250_v53 = vunpack.c.h.bf16 %v263_v41 }
   0xd   :  { %175 = vst.msk [vmem:[%s419_s3 + $0x8] sm:$0xf] %vm172_vm0, %v213_v43  ;;  %176 = vst.msk [vmem:[%s419_s3 + $0xc] sm:$0xf] %vm172_vm0, %v214_v44  ;;  %v253_v54 = vunpack.c.l.bf16 %v264_v42  ;;  %v254_v55 = vunpack.c.h.bf16 %v264_v42  ;;  %v257_v58 = vunpack.c.l.bf16 %v265_v47  ;;  %v258_v59 = vunpack.c.h.bf16 %v265_v47 }
   0xe   :  { %177 = vst.msk [vmem:[%s419_s3 + $0x10] sm:$0xf] %vm172_vm0, %v215_v45  ;;  %178 = vst.msk [vmem:[%s419_s3 + $0x14] sm:$0xf] %vm172_vm0, %v216_v46  ;;  %v61_v56 = vmul.f32 %v245_v50, %v292_v1  ;;  %v62_v57 = vmul.f32 %v246_v51, %v292_v1  ;;  %v63_v60 = vmul.f32 %v249_v52, %v292_v1 }
   0xf   :  { %179 = vst.msk [vmem:[%s419_s3 + $0x18] sm:$0xf] %vm172_vm0, %v217_v48  ;;  %180 = vst.msk [vmem:[%s419_s3 + $0x1c] sm:$0xf] %vm172_vm0, %v218_v49  ;;  %v64_v61 = vmul.f32 %v250_v53, %v292_v1  ;;  %v65_v62 = vmul.f32 %v253_v54, %v292_v1  ;;  %v66_v63 = vmul.f32 %v254_v55, %v292_v1 }
  0x10   :  { %v84_v0 = vadd.f32 %v306_v7, %v61_v56  ;;  %v85_v2 = vadd.f32 %v306_v7, %v62_v57  ;;  %v67_v3 = vmul.f32 %v257_v58, %v292_v1  ;;  %v68_v4 = vmul.f32 %v258_v59, %v292_v1 }
  0x11   :  { %v86_v5 = vadd.f32 %v306_v7, %v63_v60  ;;  %v87_v6 = vadd.f32 %v306_v7, %v64_v61  ;;  %v88_v8 = vadd.f32 %v306_v7, %v65_v62  ;;  %v89_v9 = vadd.f32 %v306_v7, %v66_v63 }
  0x12   :  { %v100_v10 = vmax.f32 %v84_v0, 0.0  ;;  %v101_v11 = vmax.f32 %v85_v2, 0.0  ;;  %v90_v12 = vadd.f32 %v306_v7, %v67_v3  ;;  %v91_v13 = vadd.f32 %v306_v7, %v68_v4 }
  0x13   :  { %v102_v14 = vmax.f32 %v86_v5, 0.0  ;;  %v103_v15 = vmax.f32 %v87_v6, 0.0  ;;  %v104_v16 = vmax.f32 %v88_v8, 0.0  ;;  %v105_v17 = vmax.f32 %v89_v9, 0.0 }
  0x14   :  { %v219_v18 = vpack.c.bf16 %v100_v10, %v100_v10  ;;  %v220_v1 = vpack.c.bf16 %v101_v11, %v101_v11  ;;  %v106_v19 = vmax.f32 %v90_v12, 0.0  ;;  %v107_v20 = vmax.f32 %v91_v13, 0.0 }
  0x15   :  { %v221_v21 = vpack.c.bf16 %v102_v14, %v102_v14  ;;  %v222_v22 = vpack.c.bf16 %v103_v15, %v103_v15  ;;  %v223_v23 = vpack.c.bf16 %v104_v16, %v104_v16  ;;  %v224_v24 = vpack.c.bf16 %v105_v17, %v105_v17 }
  0x16   :  { %181 = vst.msk [vmem:[%s419_s3 + $0x20] sm:$0xf] %vm172_vm0, %v219_v18  ;;  %182 = vst.msk [vmem:[%s419_s3 + $0x24] sm:$0xf] %vm172_vm0, %v220_v1  ;;  %v225_v7 = vpack.c.bf16 %v106_v19, %v106_v19  ;;  %v226_v25 = vpack.c.bf16 %v107_v20, %v107_v20 }
  0x17   :  { %183 = vst.msk [vmem:[%s419_s3 + $0x28] sm:$0xf] %vm172_vm0, %v221_v21  ;;  %184 = vst.msk [vmem:[%s419_s3 + $0x2c] sm:$0xf] %vm172_vm0, %v222_v22 }
  0x18   :  { %185 = vst.msk [vmem:[%s419_s3 + $0x30] sm:$0xf] %vm172_vm0, %v223_v23  ;;  %186 = vst.msk [vmem:[%s419_s3 + $0x34] sm:$0xf] %vm172_vm0, %v224_v24 }
  0x19   :  { %187 = vst.msk [vmem:[%s419_s3 + $0x38] sm:$0xf] %vm172_vm0, %v225_v7  ;;  %188 = vst.msk [vmem:[%s419_s3 + $0x3c] sm:$0xf] %vm172_vm0, %v226_v25 }

// kernel: net_simple_conv_forward.11
= control target key start
LH: loop header
LB: loop body
LE: loop exit
PB: predicated region body
PF: predicated region fallthrough
CT: control target
= control target key end

     0   :  { %vm320_vm0 = vcmask 261120   ;;  %vm624_vm1 = vcmask 517120   ;;  %v1074_v42 = vmov 0.0   ;;  %vm603_vm2 = vcmask 519168   ;;  %s1380_s1 = inlined_call_operand.vmem [shape: bf16[288,64], index: 1, kind: input, shape index: {}]   ;;  %s1381_s0 = inlined_call_operand.vmem [shape: bf16[128,288], index: 0, kind: input, shape index: {}]   ;;  %s1382_s4 = inlined_call_operand.vmem [shape: f32[2,64], index: 4, kind: output, shape index: {1}]   ;;  %s1383_s2 = inlined_call_operand.vmem [shape: f32[1,64], index: 2, kind: input, shape index: {}]   ;;  %s1384_s3 = inlined_call_operand.vmem [shape: bf16[128,64], index: 3, kind: output, shape index: {0}]  }
   0x1   :  { %v1024_v0 = vld [vmem:[%s1380_s1 + $0x40] sm:$0xff]   ;;  %v1026_v2 = vld [vmem:[%s1380_s1 + $0x48] sm:$0xff]   ;;  %v1028_v4 = vld [vmem:[%s1380_s1 + $0x50] sm:$0xff]   ;;  %625 = vst.msk [vmem:[%s1382_s4] sm:$0x3] %vm624_vm1, %v1074_v42  ;;  %vm725_vm3 = vcmask 523264  }
   0x2   :  { %v1025_v1 = vld [vmem:[%s1380_s1] sm:$0xff]   ;;  %913 = vmatprep.subr.bf16.mxu0 %v1024_v0  ;;  %1007 = vmatprep.subr.bf16.mxu1 %v1024_v0  ;;  %v1027_v3 = vld [vmem:[%s1380_s1 + $0x8] sm:$0xff]   ;;  %v1029_v5 = vld [vmem:[%s1380_s1 + $0x10] sm:$0xff]   ;;  %vm816_vm4 = vcmask 1040384  }
   0x3   :  { %914 = vmatpush3.bf16.msra.mxu0 %v1025_v1  ;;  %1015 = vmatpush3.bf16.msra.mxu1 %v1025_v1  ;;  %v1030_v6 = vld [vmem:[%s1380_s1 + $0x58] sm:$0xff]   ;;  %v1032_v8 = vld [vmem:[%s1380_s1 + $0x60] sm:$0xff]   ;;  %v1034_v10 = vld [vmem:[%s1380_s1 + $0x68] sm:$0xff]  }
   0x4   :  { %915 = vmatprep.subr.bf16.mxu0 %v1026_v2  ;;  %1008 = vmatprep.subr.bf16.mxu1 %v1026_v2  ;;  %v1031_v7 = vld [vmem:[%s1380_s1 + $0x18] sm:$0xff]   ;;  %v1033_v9 = vld [vmem:[%s1380_s1 + $0x20] sm:$0xff]   ;;  %v1035_v13 = vld [vmem:[%s1380_s1 + $0x28] sm:$0xff]  }
   0x5   :  { %v1042_v11 = vld [vmem:[%s1381_s0 + $0x4] ss:$12 sps:$4 sm:$0xff]   ;;  %v1045_v12 = vld [vmem:[%s1381_s0 + $0x94] ss:$12 sps:$4 sm:$0xff]   ;;  %v1038_v16 = vld [vmem:[%s1380_s1 + $0x78] sm:$0xff]  }
   0x6   :  { %v1036_v14 = vld [vmem:[%s1380_s1 + $0x70] sm:$0xff]   ;;  %377 = vmatprep.mubr.bf16.mxu0 %v1042_v11  ;;  %425 = vmatprep.mubr.bf16.mxu1 %v1045_v12  ;;  %v1039_v17 = vld [vmem:[%s1380_s1 + $0x38] sm:$0xff]   ;;  %v1040_v18 = vld [vmem:[%s1381_s0] ss:$12 sps:$4 sm:$0xff]  }
   0x7   :  { %916 = vmatpush3.bf16.msra.mxu0 %v1027_v3  ;;  %1016 = vmatpush3.bf16.msra.mxu1 %v1027_v3  ;;  %v1037_v15 = vld [vmem:[%s1380_s1 + $0x30] sm:$0xff]   ;;  %v1050_v19 = vld [vmem:[%s1380_s1 + $0x80] sm:$0xff]   ;;  %v1046_v21 = vld [vmem:[%s1381_s0 + $0x1c] ss:$12 sps:$4 sm:$0xff]  }
   0x8   :  { %917 = vmatprep.subr.bf16.mxu0 %v1028_v4  ;;  %1009 = vmatprep.subr.bf16.mxu1 %v1028_v4  ;;  %v1043_v20 = vld [vmem:[%s1381_s0 + $0x90] ss:$12 sps:$4 sm:$0xff]   ;;  %v1048_v22 = vld [vmem:[%s1381_s0 + $0xac] ss:$12 sps:$4 sm:$0xff]   ;;  %v1052_v25 = vld [vmem:[%s1381_s0 + $0xa8] ss:$12 sps:$4 sm:$0xff]  }
   0x9   :  { %v1053_v23 = vld [vmem:[%s1380_s1 + $0x88] sm:$0xff]   ;;  %v1051_v24 = vld [vmem:[%s1381_s0 + $0x18] ss:$12 sps:$4 sm:$0xff]   ;;  %v1054_v26 = vld [vmem:[%s1381_s0 + $0x34] ss:$12 sps:$4 sm:$0xff]  }
   0xa   :  { %v1056_v27 = vld [vmem:[%s1381_s0 + $0x8] ss:$12 sps:$4 sm:$0xff]   ;;  %v1057_v28 = vld [vmem:[%s1381_s0 + $0x30] ss:$12 sps:$4 sm:$0xff]   ;;  %v1058_v29 = vld [vmem:[%s1381_s0 + $0x20] ss:$12 sps:$4 sm:$0xff]  }
   0xb   :  { %918 = vmatpush3.bf16.msra.mxu0 %v1029_v5  ;;  %1017 = vmatpush3.bf16.msra.mxu1 %v1029_v5  ;;  %v1059_v30 = vld [vmem:[%s1381_s0 + $0x4c] ss:$12 sps:$4 sm:$0xff]   ;;  %v1062_v32 = vld [vmem:[%s1381_s0 + $0x48] ss:$12 sps:$4 sm:$0xff]   ;;  %v1063_v33 = vld [vmem:[%s1381_s0 + $0x50] ss:$12 sps:$4 sm:$0xff]  }
   0xc   :  { %919 = vmatprep.subr.bf16.mxu0 %v1030_v6  ;;  %1010 = vmatprep.subr.bf16.mxu1 %v1030_v6  ;;  %v1061_v31 = vld [vmem:[%s1381_s0 + $0x38] ss:$12 sps:$4 sm:$0xff]   ;;  %v1066_v35 = vld [vmem:[%s1381_s0 + $0x68] ss:$12 sps:$4 sm:$0xff]   ;;  %v1067_v36 = vld [vmem:[%s1381_s0 + $0x60] ss:$12 sps:$4 sm:$0xff]  }
   0xd   :  { %v1064_v34 = vld [vmem:[%s1381_s0 + $0x64] ss:$12 sps:$4 sm:$0xff]   ;;  %v1068_v37 = vld [vmem:[%s1381_s0 + $0x80] ss:$12 sps:$4 sm:$0xff]   ;;  %v1069_v38 = vld [vmem:[%s1381_s0 + $0x7c] ss:$12 sps:$4 sm:$0xff]  }
   0xe   :  { %v1071_v39 = vld [vmem:[%s1381_s0 + $0x98] ss:$12 sps:$4 sm:$0xff]   ;;  %v1073_v41 = vld [vmem:[%s1381_s0 + $0xb0] ss:$12 sps:$4 sm:$0xff]   ;;  %v1249_v3 = vld [vmem:[%s1383_s2] ss:$0 sm:$0xff] }
   0xf   :  { %920 = vmatpush3.bf16.msra.mxu0 %v1031_v7  ;;  %1018 = vmatpush3.bf16.msra.mxu1 %v1031_v7  ;;  %v1072_v40 = vld [vmem:[%s1381_s0 + $0x78] ss:$12 sps:$4 sm:$0xff]  }
  0x10   :  { %921 = vmatprep.subr.bf16.mxu0 %v1032_v8  ;;  %1011 = vmatprep.subr.bf16.mxu1 %v1032_v8 }
  0x13   :  { %922 = vmatpush3.bf16.msra.mxu0 %v1033_v9  ;;  %1019 = vmatpush3.bf16.msra.mxu1 %v1033_v9 }
  0x14   :  { %923 = vmatprep.subr.bf16.mxu0 %v1034_v10  ;;  %1012 = vmatprep.subr.bf16.mxu1 %v1034_v10 }
  0x17   :  { %924 = vmatpush3.bf16.msra.mxu0 %v1035_v13  ;;  %1020 = vmatpush3.bf16.msra.mxu1 %v1035_v13 }
  0x18   :  { %925 = vmatprep.subr.bf16.mxu0 %v1036_v14  ;;  %1013 = vmatprep.subr.bf16.mxu1 %v1036_v14 }
  0x1b   :  { %926 = vmatpush3.bf16.msra.mxu0 %v1037_v15  ;;  %1021 = vmatpush3.bf16.msra.mxu1 %v1037_v15 }
  0x1c   :  { %927 = vmatprep.subr.bf16.mxu0 %v1038_v16  ;;  %1014 = vmatprep.subr.bf16.mxu1 %v1038_v16 }
  0x1f   :  { %928 = vmatpush3.bf16.msra.mxu0 %v1039_v17  ;;  %1022 = vmatpush3.bf16.msra.mxu1 %v1039_v17 }
  0x20   :  { %987 = vmatprep.subr.bf16.mxu1 %v1050_v19 }
  0x22   :  { %378 = vmatmul.mubr.bf16.vlgmr.msra.gmra.mrb[0].mxu0 %v1040_v18  ;;  %426 = vmatmul.mubr.bf16.vlgmr.msra.gmra.mrb[0].mxu1 %v1043_v20 }
  0x23   :  { %385 = vmatprep.mubr.bf16.mxu0 %v1046_v21  ;;  %433 = vmatprep.mubr.bf16.mxu1 %v1048_v22 }
  0x24   :  { %988 = vmatpush3.bf16.msra.mxu1 %v1050_v19 }
  0x25   :  { %989 = vmatprep.subr.bf16.mxu1 %v1053_v23 }
  0x28   :  { %990 = vmatpush3.bf16.msra.mxu1 %v1053_v23 }
  0x2a   :  { %386 = vmatmul.mubr.bf16.gmra.mrb[4].mxu0 %v1051_v24  ;;  %434 = vmatmul.mubr.bf16.gmra.mrb[4].mxu1 %v1052_v25 }
  0x2b   :  { %393 = vmatprep.mubr.bf16.mxu0 %v1054_v26  ;;  %991 = vmatprep.mubr.msk.bf16.mxu1 %vm320_vm0, %v1056_v27 }
  0x32   :  { %394 = vmatmul.mubr.bf16.gmra.mrb[8].mxu0 %v1057_v28  ;;  %992 = vmatmul.mubr.msk.bf16.vlgmr.msra.gmra.mrb[8].mxu1 %vm320_vm0, %v1058_v29 }
  0x33   :  { %401 = vmatprep.mubr.bf16.mxu0 %v1059_v30  ;;  %995 = vmatprep.mubr.msk.bf16.mxu1 %vm320_vm0, %v1061_v31 }
  0x3a   :  { %402 = vmatmul.mubr.bf16.gmra.mrb[12].mxu0 %v1062_v32  ;;  %996 = vmatmul.mubr.msk.bf16.gmra.mrb[12].mxu1 %vm320_vm0, %v1063_v33 }
  0x3b   :  { %409 = vmatprep.mubr.bf16.mxu0 %v1064_v34  ;;  %999 = vmatprep.mubr.msk.bf16.mxu1 %vm320_vm0, %v1066_v35 }
  0x42   :  { %410 = vmatmul.mubr.bf16.gmra.mrb[16].mxu0 %v1067_v36  ;;  %1000 = vmatmul.mubr.msk.bf16.gmra.mrb[16].mxu1 %vm320_vm0, %v1068_v37 }
  0x43   :  { %417 = vmatprep.mubr.bf16.mxu0 %v1069_v38  ;;  %1003 = vmatprep.mubr.msk.bf16.mxu1 %vm320_vm0, %v1071_v39 }
  0x4a   :  { %418 = vmatmul.mubr.bf16.gmra.mrb[20].mxu0 %v1072_v40  ;;  %1004 = vmatmul.mubr.msk.bf16.gmra.mrb[20].mxu1 %vm320_vm0, %v1073_v41 }
  0xf5   :  { %v929_v43 = vpop.f32.mrb[0].mxu0  ;;  %v965_v44 = vpop.f32.mrb[0].mxu1 }
  0xf6   :  { %v930_v45 = vpop.f32.mrb[1].mxu0  ;;  %v966_v46 = vpop.f32.mrb[1].mxu1 }
  0xf7   :  { %v931_v47 = vadd.f32 %v930_v45, %v929_v43  ;;  %v932_v48 = vpop.f32.mrb[2].mxu0  ;;  %v1238_v49 = vadd.f32 %v966_v46, %v965_v44  ;;  %v968_v50 = vpop.f32.mrb[2].mxu1 }
  0xf8   :  { %v933_v51 = vpop.f32.mrb[3].mxu0  ;;  %v969_v52 = vpop.f32.mrb[3].mxu1 }
  0xf9   :  { %v934_v53 = vadd.f32 %v933_v51, %v932_v48  ;;  %v1240_v54 = vadd.f32 %v969_v52, %v968_v50  ;;  %v380_v7 = vadd.f32 %v931_v47, %v1249_v3 }
  0xfb   :  { %v383_v22 = vadd.f32 %v934_v53, %v1249_v3 }
  0xfd   :  { %v935_v55 = vpop.f32.mrb[4].mxu0  ;;  %v971_v56 = vpop.f32.mrb[4].mxu1 }
  0xfe   :  { %v936_v57 = vpop.f32.mrb[5].mxu0  ;;  %v972_v58 = vpop.f32.mrb[5].mxu1 }
  0xff   :  { %v937_v59 = vadd.f32 %v936_v57, %v935_v55  ;;  %v938_v60 = vpop.f32.mrb[6].mxu0  ;;  %v1242_v61 = vadd.f32 %v972_v58, %v971_v56  ;;  %v974_v62 = vpop.f32.mrb[6].mxu1 }
 0x100   :  { %v939_v63 = vpop.f32.mrb[7].mxu0  ;;  %v975_v0 = vpop.f32.mrb[7].mxu1 }
 0x101   :  { %v940_v1 = vadd.f32 %v939_v63, %v938_v60  ;;  %v1244_v2 = vadd.f32 %v975_v0, %v974_v62  ;;  %v388_v4 = vadd.f32 %v937_v59, %v1249_v3 }
 0x103   :  { %v391_v11 = vadd.f32 %v940_v1, %v1249_v3 }
 0x105   :  { %v941_v5 = vpop.f32.mrb[8].mxu0  ;;  %v993_v6 = vpop.f32.mrb[8].mxu1 }
 0x106   :  { %v485_v8 = vadd.f32 %v993_v6, %v388_v4  ;;  %v942_v9 = vpop.f32.mrb[9].mxu0  ;;  %v476_v10 = vpop.f32.mrb[9].mxu1 }
 0x107   :  { %v943_v12 = vadd.f32 %v942_v9, %v941_v5  ;;  %v477_v13 = vadd.f32 %v476_v10, %v380_v7  ;;  %v944_v14 = vpop.f32.mrb[10].mxu0  ;;  %v994_v15 = vpop.f32.mrb[10].mxu1 }
 0x108   :  { %v899_v16 = vpack.c.bf16 %v485_v8, %v485_v8  ;;  %v488_v17 = vadd.f32 %v994_v15, %v391_v11  ;;  %v945_v18 = vpop.f32.mrb[11].mxu0  ;;  %v479_v19 = vpop.f32.mrb[11].mxu1  ;;  %v765_v23 = vmul.f32 %v485_v8, %v485_v8  ;;  %v729_v34 = vsel %vm725_vm3, %v485_v8, 0.0 }
 0x109   :  { %v897_v20 = vpack.c.bf16 %v477_v13, %v477_v13  ;;  %v946_v21 = vadd.f32 %v945_v18, %v944_v14  ;;  %v763_v25 = vmul.f32 %v477_v13, %v477_v13  ;;  %v480_v26 = vadd.f32 %v479_v19, %v383_v22 }
 0x10a   :  { %606 = vst.msk [vmem:[%s1384_s3 + $0x8] sm:$0xf] %vm603_vm2, %v899_v16  ;;  %v900_v24 = vpack.c.bf16 %v488_v17, %v488_v17  ;;  %v726_v27 = vsel %vm725_vm3, %v477_v13, 0.0  ;;  %v396_v33 = vadd.f32 %v943_v12, %v1249_v3  ;;  %v782_v35 = vsel %vm725_vm3, %v765_v23, 0.0 }
 0x10b   :  { %604 = vst.msk [vmem:[%s1384_s3] sm:$0xf] %vm603_vm2, %v897_v20  ;;  %v898_v28 = vpack.c.bf16 %v480_v26, %v480_v26  ;;  %v727_v29 = vsel %vm725_vm3, %v480_v26, 0.0  ;;  %v764_v30 = vmul.f32 %v480_v26, %v480_v26  ;;  %v766_v36 = vmul.f32 %v488_v17, %v488_v17 }
 0x10c   :  { %607 = vst.msk [vmem:[%s1384_s3 + $0xc] sm:$0xf] %vm603_vm2, %v900_v24  ;;  %v728_v37 = vadd.f32 %v727_v29, %v726_v27  ;;  %v779_v40 = vsel %vm725_vm3, %v763_v25, 0.0  ;;  %v731_v46 = vsel %vm725_vm3, %v488_v17, 0.0  ;;  %v399_v51 = vadd.f32 %v946_v21, %v1249_v3 }
 0x10d   :  { %v947_v31 = vpop.f32.mrb[12].mxu0  ;;  %v997_v32 = vpop.f32.mrb[12].mxu1  ;;  %605 = vst.msk [vmem:[%s1384_s3 + $0x4] sm:$0xf] %vm603_vm2, %v898_v28  ;;  %v780_v41 = vsel %vm725_vm3, %v764_v30, 0.0  ;;  %v784_v63 = vsel %vm725_vm3, %v766_v36, 0.0 }
 0x10e   :  { %v948_v38 = vpop.f32.mrb[13].mxu0  ;;  %v492_v39 = vpop.f32.mrb[13].mxu1  ;;  %v730_v47 = vadd.f32 %v729_v34, %v728_v37  ;;  %v781_v48 = vadd.f32 %v780_v41, %v779_v40  ;;  %v428_v40 = vadd.f32 %v1238_v49, %v1249_v3 }
 0x10f   :  { %v949_v42 = vadd.f32 %v948_v38, %v947_v31  ;;  %v493_v43 = vadd.f32 %v492_v39, %v396_v33  ;;  %v950_v44 = vpop.f32.mrb[14].mxu0  ;;  %v998_v45 = vpop.f32.mrb[14].mxu1  ;;  %v436_v39 = vadd.f32 %v1242_v61, %v1249_v3 }
 0x110   :  { %v951_v50 = vpop.f32.mrb[15].mxu0  ;;  %v495_v52 = vpop.f32.mrb[15].mxu1  ;;  %v783_v58 = vadd.f32 %v782_v35, %v781_v48  ;;  %v732_v59 = vadd.f32 %v731_v46, %v730_v47 }
 0x111   :  { %v404_v53 = vadd.f32 %v949_v42, %v1249_v3  ;;  %v901_v55 = vpack.c.bf16 %v493_v43, %v493_v43  ;;  %v733_v56 = vsel %vm725_vm3, %v493_v43, 0.0  ;;  %v767_v57 = vmul.f32 %v493_v43, %v493_v43 }
 0x112   :  { %v952_v60 = vadd.f32 %v951_v50, %v950_v44  ;;  %v496_v62 = vadd.f32 %v495_v52, %v399_v51  ;;  %v734_v4 = vadd.f32 %v733_v56, %v732_v59  ;;  %v785_v5 = vadd.f32 %v784_v63, %v783_v58 }
 0x113   :  { %v501_v0 = vadd.f32 %v997_v32, %v404_v53  ;;  %608 = vst.msk [vmem:[%s1384_s3 + $0x10] sm:$0xf] %vm603_vm2, %v901_v55  ;;  %v786_v1 = vsel %vm725_vm3, %v767_v57, 0.0 }
 0x114   :  { %v407_v6 = vadd.f32 %v952_v60, %v1249_v3  ;;  %v902_v7 = vpack.c.bf16 %v496_v62, %v496_v62  ;;  %v735_v10 = vsel %vm725_vm3, %v496_v62, 0.0  ;;  %v787_v14 = vadd.f32 %v786_v1, %v785_v5 }
 0x115   :  { %v903_v8 = vpack.c.bf16 %v501_v0, %v501_v0  ;;  %v769_v9 = vmul.f32 %v501_v0, %v501_v0  ;;  %v737_v11 = vsel %vm725_vm3, %v501_v0, 0.0  ;;  %v953_v12 = vpop.f32.mrb[16].mxu0  ;;  %v1291_v13 = vpop.f32.mrb[16].mxu1  ;;  %v736_v16 = vadd.f32 %v735_v10, %v734_v4 }
 0x116   :  { %v504_v15 = vadd.f32 %v998_v45, %v407_v6  ;;  %609 = vst.msk [vmem:[%s1384_s3 + $0x14] sm:$0xf] %vm603_vm2, %v902_v7  ;;  %v768_v17 = vmul.f32 %v496_v62, %v496_v62  ;;  %v954_v18 = vpop.f32.mrb[17].mxu0  ;;  %v508_v19 = vpop.f32.mrb[17].mxu1  ;;  %v439_v4 = vadd.f32 %v1244_v2, %v1249_v3 }
 0x117   :  { %610 = vst.msk [vmem:[%s1384_s3 + $0x18] sm:$0xf] %vm603_vm2, %v903_v8  ;;  %v790_v20 = vsel %vm725_vm3, %v769_v9, 0.0  ;;  %v955_v21 = vadd.f32 %v954_v18, %v953_v12  ;;  %v956_v22 = vpop.f32.mrb[18].mxu0  ;;  %v1302_v23 = vpop.f32.mrb[18].mxu1  ;;  %v738_v26 = vadd.f32 %v737_v11, %v736_v16  ;;  %v431_v8 = vadd.f32 %v1240_v54, %v1249_v3 }
 0x118   :  { %v904_v24 = vpack.c.bf16 %v504_v15, %v504_v15  ;;  %v770_v25 = vmul.f32 %v504_v15, %v504_v15  ;;  %v788_v27 = vsel %vm725_vm3, %v768_v17, 0.0  ;;  %v957_v28 = vpop.f32.mrb[19].mxu0  ;;  %v511_v29 = vpop.f32.mrb[19].mxu1  ;;  %v739_v33 = vsel %vm725_vm3, %v504_v15, 0.0 }
 0x119   :  { %v789_v30 = vadd.f32 %v788_v27, %v787_v14  ;;  %v958_v31 = vadd.f32 %v957_v28, %v956_v22  ;;  %v412_v32 = vadd.f32 %v955_v21, %v1249_v3  ;;  %v740_v34 = vadd.f32 %v739_v33, %v738_v26 }
 0x11a   :  { %611 = vst.msk [vmem:[%s1384_s3 + $0x1c] sm:$0xf] %vm603_vm2, %v904_v24  ;;  %v792_v35 = vsel %vm725_vm3, %v770_v25, 0.0 }
 0x11b   :  { %v791_v36 = vadd.f32 %v790_v20, %v789_v30  ;;  %v509_v37 = vadd.f32 %v508_v19, %v412_v32  ;;  %v415_v38 = vadd.f32 %v958_v31, %v1249_v3 }
 0x11d   :  { %v905_v41 = vpack.c.bf16 %v509_v37, %v509_v37  ;;  %v741_v42 = vsel %vm725_vm3, %v509_v37, 0.0  ;;  %v771_v43 = vmul.f32 %v509_v37, %v509_v37  ;;  %v793_v44 = vadd.f32 %v792_v35, %v791_v36  ;;  %v959_v45 = vpop.f32.mrb[20].mxu0  ;;  %v1005_v46 = vpop.f32.mrb[20].mxu1 }
 0x11e   :  { %v742_v47 = vadd.f32 %v741_v42, %v740_v34  ;;  %v512_v48 = vadd.f32 %v511_v29, %v415_v38  ;;  %v533_v50 = vadd.f32 %v1005_v46, %v436_v39  ;;  %v960_v51 = vpop.f32.mrb[21].mxu0  ;;  %v524_v52 = vpop.f32.mrb[21].mxu1 }
 0x11f   :  { %612 = vst.msk [vmem:[%s1384_s3 + $0x20] sm:$0xf] %vm603_vm2, %v905_v41  ;;  %v794_v61 = vsel %vm725_vm3, %v771_v43, 0.0  ;;  %v961_v49 = vadd.f32 %v960_v51, %v959_v45  ;;  %v525_v53 = vadd.f32 %v524_v52, %v428_v40  ;;  %v962_v55 = vpop.f32.mrb[22].mxu0  ;;  %v1006_v56 = vpop.f32.mrb[22].mxu1 }
 0x120   :  { %v795_v57 = vadd.f32 %v794_v61, %v793_v44  ;;  %v906_v58 = vpack.c.bf16 %v512_v48, %v512_v48  ;;  %v743_v59 = vsel %vm725_vm3, %v512_v48, 0.0  ;;  %v772_v60 = vmul.f32 %v512_v48, %v512_v48  ;;  %v963_v62 = vpop.f32.mrb[23].mxu0  ;;  %v527_v63 = vpop.f32.mrb[23].mxu1 }
 0x121   :  { %v744_v0 = vadd.f32 %v743_v59, %v742_v47  ;;  %v911_v1 = vpack.c.bf16 %v533_v50, %v533_v50  ;;  %v420_v6 = vadd.f32 %v961_v49, %v1249_v3  ;;  %v909_v7 = vpack.c.bf16 %v525_v53, %v525_v53  ;;  %v818_v59 = vld [vmem:[%s1382_s4] sm:$0x3] }
 0x122   :  { %613 = vst.msk [vmem:[%s1384_s3 + $0x24] sm:$0xf] %vm603_vm2, %v906_v58  ;;  %v796_v5 = vsel %vm725_vm3, %v772_v60, 0.0  ;;  %v536_v2 = vadd.f32 %v1006_v56, %v439_v4  ;;  %v964_v11 = vadd.f32 %v963_v62, %v962_v55  ;;  %v528_v12 = vadd.f32 %v527_v63, %v431_v8 }
 0x123   :  { %v797_v9 = vadd.f32 %v796_v5, %v795_v57  ;;  %618 = vst.msk [vmem:[%s1384_s3 + $0x38] sm:$0xf] %vm603_vm2, %v911_v1  ;;  %v517_v10 = vadd.f32 %v1291_v13, %v420_v6  ;;  %616 = vst.msk [vmem:[%s1384_s3 + $0x30] sm:$0xf] %vm603_vm2, %v909_v7  ;;  %v749_v27 = vsel %vm725_vm3, %v525_v53, 0.0  ;;  %v777_v31 = vmul.f32 %v533_v50, %v533_v50 }
 0x124   :  { %v912_v14 = vpack.c.bf16 %v536_v2, %v536_v2  ;;  %v423_v17 = vadd.f32 %v964_v11, %v1249_v3  ;;  %v910_v13 = vpack.c.bf16 %v528_v12, %v528_v12  ;;  %v775_v3 = vmul.f32 %v525_v53, %v525_v53 }
 0x125   :  { %v907_v15 = vpack.c.bf16 %v517_v10, %v517_v10  ;;  %v745_v54 = vsel %vm725_vm3, %v517_v10, 0.0  ;;  %v773_v16 = vmul.f32 %v517_v10, %v517_v10  ;;  %v776_v28 = vmul.f32 %v528_v12, %v528_v12 }
 0x126   :  { %v746_v18 = vadd.f32 %v745_v54, %v744_v0  ;;  %619 = vst.msk [vmem:[%s1384_s3 + $0x3c] sm:$0xf] %vm603_vm2, %v912_v14  ;;  %v520_v20 = vadd.f32 %v1302_v23, %v423_v17  ;;  %617 = vst.msk [vmem:[%s1384_s3 + $0x34] sm:$0xf] %vm603_vm2, %v910_v13  ;;  %v802_v32 = vsel %vm725_vm3, %v775_v3, 0.0  ;;  %v751_v33 = vsel %vm725_vm3, %v528_v12, 0.0 }
 0x127   :  { %614 = vst.msk [vmem:[%s1384_s3 + $0x28] sm:$0xf] %vm603_vm2, %v907_v15  ;;  %v798_v19 = vsel %vm725_vm3, %v773_v16, 0.0  ;;  %v753_v36 = vsel %vm725_vm3, %v533_v50, 0.0  ;;  %v778_v37 = vmul.f32 %v536_v2, %v536_v2  ;;  %v804_v38 = vsel %vm725_vm3, %v776_v28, 0.0 }
 0x128   :  { %v799_v21 = vadd.f32 %v798_v19, %v797_v9  ;;  %v908_v22 = vpack.c.bf16 %v520_v20, %v520_v20  ;;  %v747_v24 = vsel %vm725_vm3, %v520_v20, 0.0  ;;  %v774_v25 = vmul.f32 %v520_v20, %v520_v20 }
 0x129   :  { %v748_v26 = vadd.f32 %v747_v24, %v746_v18  ;;  %v806_v41 = vsel %vm725_vm3, %v777_v31, 0.0  ;;  %v755_v42 = vsel %vm725_vm3, %v536_v2, 0.0  ;;  %v808_v45 = vsel %vm725_vm3, %v778_v37, 0.0 }
 0x12a   :  { %615 = vst.msk [vmem:[%s1384_s3 + $0x2c] sm:$0xf] %vm603_vm2, %v908_v22  ;;  %v800_v23 = vsel %vm725_vm3, %v774_v25, 0.0 }
 0x12b   :  { %v750_v29 = vadd.f32 %v749_v27, %v748_v26  ;;  %v801_v30 = vadd.f32 %v800_v23, %v799_v21 }
 0x12d   :  { %v752_v34 = vadd.f32 %v751_v33, %v750_v29  ;;  %v803_v35 = vadd.f32 %v802_v32, %v801_v30 }
 0x12f   :  { %v754_v39 = vadd.f32 %v753_v36, %v752_v34  ;;  %v805_v40 = vadd.f32 %v804_v38, %v803_v35 }
 0x131   :  { %v756_v43 = vadd.f32 %v755_v42, %v754_v39  ;;  %v807_v44 = vadd.f32 %v806_v41, %v805_v40 }
 0x133   :  { %v757_v46 = vrot.slane %v756_v43, 4  ;;  %v809_v47 = vadd.f32 %v808_v45, %v807_v44 }
 0x135   :  { %v758_v48 = vadd.f32 %v757_v46, %v756_v43  ;;  %v810_v51 = vrot.slane %v809_v47, 4 }
 0x137   :  { %v759_v52 = vrot.slane %v758_v48, 2  ;;  %v811_v61 = vadd.f32 %v810_v51, %v809_v47 }
 0x139   :  { %v760_v50 = vadd.f32 %v759_v52, %v758_v48  ;;  %v812_v49 = vrot.slane %v811_v61, 2 }
 0x13b   :  { %v761_v53 = vrot.slane %v760_v50, 1  ;;  %v813_v55 = vadd.f32 %v812_v49, %v811_v61 }
 0x13d   :  { %v814_v56 = vrot.slane %v813_v55, 1  ;;  %v762_v57 = vadd.f32 %v761_v53, %v760_v50 }
 0x13f   :  { %v815_v58 = vadd.f32 %v814_v56, %v813_v55 }
 0x141   :  { %v817_v60 = vsel %vm816_vm4, %v762_v57, %v815_v58 }
 0x142   :  { %v819_v62 = vadd.f32 %v818_v59, %v817_v60 }
 0x144   :  { %821 = vst.msk [vmem:[%s1382_s4] sm:$0x3] %vm624_vm1, %v819_v62 }

// kernel: net_simple_conv_forward.14
= control target key start
LH: loop header
LB: loop body
LE: loop exit
PB: predicated region body
PF: predicated region fallthrough
CT: control target
= control target key end

     0   :  { %s140_s0 = inlined_call_operand.vmem [shape: bf16[32,128], index: 0, kind: input, shape index: {}]   ;;  %s141_s1 = inlined_call_operand.vmem [shape: f32[1,128], index: 1, kind: input, shape index: {}]   ;;  %s142_s2 = inlined_call_operand.vmem [shape: f32[1,128], index: 2, kind: input, shape index: {}]   ;;  %s143_s3 = inlined_call_operand.vmem [shape: bf16[32,128], index: 3, kind: output, shape index: {}]  }
   0x1   :  { %v83_v0 = vld [vmem:[%s140_s0] sm:$0xff]   ;;  %v100_v4 = vld [vmem:[%s140_s0 + $0x8] sm:$0xff]  }
   0x2   :  { %v72_v1 = vld [vmem:[%s141_s1] ss:$0 sm:$0xff]  ;;  %v84_v2 = vunpack.c.l.bf16 %v83_v0  ;;  %v85_v3 = vunpack.c.h.bf16 %v83_v0  ;;  %v88_v6 = vunpack.c.l.bf16 %v100_v4  ;;  %v89_v7 = vunpack.c.h.bf16 %v100_v4 }
   0x3   :  { %v73_v5 = vld [vmem:[%s142_s2] ss:$0 sm:$0xff] }
   0x4   :  { %v29_v8 = vmul.f32 %v84_v2, %v72_v1  ;;  %v30_v9 = vmul.f32 %v85_v3, %v72_v1  ;;  %v31_v10 = vmul.f32 %v88_v6, %v72_v1  ;;  %v32_v11 = vmul.f32 %v89_v7, %v72_v1 }
   0x6   :  { %v40_v12 = vadd.f32 %v73_v5, %v29_v8  ;;  %v41_v13 = vadd.f32 %v73_v5, %v30_v9  ;;  %v42_v14 = vadd.f32 %v73_v5, %v31_v10  ;;  %v43_v15 = vadd.f32 %v73_v5, %v32_v11 }
   0x8   :  { %v44_v16 = vmax.f32 %v40_v12, 0.0  ;;  %v45_v17 = vmax.f32 %v41_v13, 0.0  ;;  %v46_v18 = vmax.f32 %v42_v14, 0.0  ;;  %v47_v19 = vmax.f32 %v43_v15, 0.0 }
   0xa   :  { %v93_v20 = vpack.c.bf16 %v45_v17, %v44_v16  ;;  %v98_v21 = vpack.c.bf16 %v47_v19, %v46_v18 }
   0xc   :  { %94 = vst [vmem:[%s143_s3] sm:$0xff] %v93_v20   ;;  %101 = vst [vmem:[%s143_s3 + $0x8] sm:$0xff] %v98_v21  }

// kernel: net_simple_conv_forward.13
= control target key start
LH: loop header
LB: loop body
LE: loop exit
PB: predicated region body
PF: predicated region fallthrough
CT: control target
= control target key end

     0   :  { %vm374_vm0 = vcmask 523264   ;;  %v808_v46 = vmov 0.0   ;;  %vm602_vm1 = vcmask 1040384   ;;  %s990_s1 = inlined_call_operand.vmem [shape: bf16[576,128], index: 1, kind: input, shape index: {}]   ;;  %s991_s0 = inlined_call_operand.vmem [shape: bf16[32,576], index: 0, kind: input, shape index: {}]   ;;  %s992_s4 = inlined_call_operand.vmem [shape: f32[2,128], index: 4, kind: output, shape index: {1}]   ;;  %s993_s2 = inlined_call_operand.vmem [shape: f32[1,128], index: 2, kind: input, shape index: {}]   ;;  %s994_s3 = inlined_call_operand.vmem [shape: bf16[32,128], index: 3, kind: output, shape index: {0}]  }
   0x1   :  { %v758_v0 = vld [vmem:[%s990_s1 + $0x40] sm:$0xff]   ;;  %v762_v4 = vld [vmem:[%s990_s1 + $0x48] sm:$0xff]   ;;  %v766_v8 = vld [vmem:[%s990_s1 + $0x50] sm:$0xff]   ;;  %552 = vst [vmem:[%s992_s4] sm:$0x3] %v808_v46 }
   0x2   :  { %v759_v1 = vld [vmem:[%s990_s1] sm:$0xff]   ;;  %683 = vmatprep.subr.bf16.mxu0 %v758_v0  ;;  %v763_v5 = vld [vmem:[%s990_s1 + $0x8] sm:$0xff]   ;;  %v767_v9 = vld [vmem:[%s990_s1 + $0x10] sm:$0xff]  }
   0x3   :  { %v760_v2 = vld [vmem:[%s990_s1 + $0xc0] sm:$0xff]   ;;  %684 = vmatpush3.bf16.msra.mxu0 %v759_v1  ;;  %v764_v6 = vld [vmem:[%s990_s1 + $0xc8] sm:$0xff]   ;;  %v768_v10 = vld [vmem:[%s990_s1 + $0xd0] sm:$0xff]  }
   0x4   :  { %v761_v3 = vld [vmem:[%s990_s1 + $0x80] sm:$0xff]   ;;  %711 = vmatprep.subr.bf16.mxu1 %v760_v2  ;;  %685 = vmatprep.subr.bf16.mxu0 %v762_v4  ;;  %v765_v7 = vld [vmem:[%s990_s1 + $0x88] sm:$0xff]   ;;  %v769_v11 = vld [vmem:[%s990_s1 + $0x90] sm:$0xff]  }
   0x5   :  { %712 = vmatpush3.bf16.msra.mxu1 %v761_v3  ;;  %v770_v12 = vld [vmem:[%s990_s1 + $0x58] sm:$0xff]   ;;  %v774_v16 = vld [vmem:[%s990_s1 + $0x60] sm:$0xff]   ;;  %v778_v20 = vld [vmem:[%s990_s1 + $0x68] sm:$0xff]  }
   0x6   :  { %713 = vmatprep.subr.bf16.mxu1 %v764_v6  ;;  %v771_v13 = vld [vmem:[%s990_s1 + $0x18] sm:$0xff]   ;;  %v775_v17 = vld [vmem:[%s990_s1 + $0x20] sm:$0xff]   ;;  %v779_v21 = vld [vmem:[%s990_s1 + $0x28] sm:$0xff]  }
   0x7   :  { %686 = vmatpush3.bf16.msra.mxu0 %v763_v5  ;;  %v772_v14 = vld [vmem:[%s990_s1 + $0xd8] sm:$0xff]   ;;  %v776_v18 = vld [vmem:[%s990_s1 + $0xe0] sm:$0xff]   ;;  %v780_v22 = vld [vmem:[%s990_s1 + $0xe8] sm:$0xff]  }
   0x8   :  { %687 = vmatprep.subr.bf16.mxu0 %v766_v8  ;;  %v773_v15 = vld [vmem:[%s990_s1 + $0x98] sm:$0xff]   ;;  %v777_v19 = vld [vmem:[%s990_s1 + $0xa0] sm:$0xff]   ;;  %v781_v23 = vld [vmem:[%s990_s1 + $0xa8] sm:$0xff]  }
   0x9   :  { %714 = vmatpush3.bf16.msra.mxu1 %v765_v7  ;;  %v782_v24 = vld [vmem:[%s990_s1 + $0x70] sm:$0xff]   ;;  %v786_v28 = vld [vmem:[%s990_s1 + $0x78] sm:$0xff]   ;;  %v793_v34 = vld [vmem:[%s990_s1 + $0x100] sm:$0xff]  }
   0xa   :  { %715 = vmatprep.subr.bf16.mxu1 %v768_v10  ;;  %v783_v25 = vld [vmem:[%s990_s1 + $0x30] sm:$0xff]   ;;  %v787_v29 = vld [vmem:[%s990_s1 + $0x38] sm:$0xff]   ;;  %v796_v36 = vld [vmem:[%s991_s0 + $0xc] ss:$20 sps:$4 sm:$0xff]  }
   0xb   :  { %688 = vmatpush3.bf16.msra.mxu0 %v767_v9  ;;  %v784_v26 = vld [vmem:[%s990_s1 + $0xf0] sm:$0xff]   ;;  %v788_v30 = vld [vmem:[%s990_s1 + $0xf8] sm:$0xff]   ;;  %v797_v37 = vld [vmem:[%s990_s1 + $0x108] sm:$0xff]   ;;  %462 = vmatprep.mubr.bf16.mxu1 %v796_v36 }
   0xc   :  { %689 = vmatprep.subr.bf16.mxu0 %v770_v12  ;;  %v785_v27 = vld [vmem:[%s990_s1 + $0xb0] sm:$0xff]   ;;  %v791_v32 = vld [vmem:[%s991_s0 + $0x4] ss:$20 sps:$4 sm:$0xff]   ;;  %v794_v35 = vld [vmem:[%s991_s0 + $0x8] ss:$20 sps:$4 sm:$0xff]  }
   0xd   :  { %716 = vmatpush3.bf16.msra.mxu1 %v769_v11  ;;  %v789_v31 = vld [vmem:[%s991_s0] ss:$20 sps:$4 sm:$0xff]   ;;  %v792_v33 = vld [vmem:[%s990_s1 + $0xb8] sm:$0xff]   ;;  %413 = vmatprep.mubr.bf16.mxu0 %v791_v32  ;;  %v804_v42 = vld [vmem:[%s991_s0 + $0x30] ss:$20 sps:$4 sm:$0xff]  }
   0xe   :  { %717 = vmatprep.subr.bf16.mxu1 %v772_v14  ;;  %v798_v38 = vld [vmem:[%s991_s0 + $0x2c] ss:$20 sps:$4 sm:$0xff]   ;;  %v800_v39 = vld [vmem:[%s991_s0 + $0x28] ss:$20 sps:$4 sm:$0xff]   ;;  %v801_v40 = vld [vmem:[%s990_s1 + $0x110] sm:$0xff]  }
   0xf   :  { %690 = vmatpush3.bf16.msra.mxu0 %v771_v13  ;;  %v802_v41 = vld [vmem:[%s991_s0 + $0x34] ss:$20 sps:$4 sm:$0xff]   ;;  %v805_v43 = vld [vmem:[%s990_s1 + $0x118] sm:$0xff]   ;;  %v806_v44 = vld [vmem:[%s991_s0 + $0x10] ss:$20 sps:$4 sm:$0xff]  }
  0x10   :  { %691 = vmatprep.subr.bf16.mxu0 %v774_v16  ;;  %v807_v45 = vld [vmem:[%s991_s0 + $0x38] ss:$20 sps:$4 sm:$0xff]   ;;  %v615_v48 = vld [vmem:[%s993_s2] ss:$0 sm:$0xff] }
  0x11   :  { %718 = vmatpush3.bf16.msra.mxu1 %v773_v15 }
  0x12   :  { %719 = vmatprep.subr.bf16.mxu1 %v776_v18 }
  0x13   :  { %692 = vmatpush3.bf16.msra.mxu0 %v775_v17 }
  0x14   :  { %693 = vmatprep.subr.bf16.mxu0 %v778_v20 }
  0x15   :  { %720 = vmatpush3.bf16.msra.mxu1 %v777_v19 }
  0x16   :  { %721 = vmatprep.subr.bf16.mxu1 %v780_v22 }
  0x17   :  { %694 = vmatpush3.bf16.msra.mxu0 %v779_v21 }
  0x18   :  { %695 = vmatprep.subr.bf16.mxu0 %v782_v24 }
  0x19   :  { %722 = vmatpush3.bf16.msra.mxu1 %v781_v23 }
  0x1a   :  { %723 = vmatprep.subr.bf16.mxu1 %v784_v26 }
  0x1b   :  { %696 = vmatpush3.bf16.msra.mxu0 %v783_v25 }
  0x1c   :  { %697 = vmatprep.subr.bf16.mxu0 %v786_v28 }
  0x1d   :  { %724 = vmatpush3.bf16.msra.mxu1 %v785_v27 }
  0x1e   :  { %725 = vmatprep.subr.bf16.mxu1 %v788_v30 }
  0x1f   :  { %698 = vmatpush3.bf16.msra.mxu0 %v787_v29 }
  0x20   :  { %745 = vmatprep.subr.bf16.mxu0 %v793_v34 }
  0x21   :  { %726 = vmatpush3.bf16.msra.mxu1 %v792_v33 }
  0x22   :  { %414 = vmatmul.mubr.bf16.vlgmr.msra.gmra.mrb[0].mxu0 %v789_v31 }
  0x23   :  { %746 = vmatpush3.bf16.msra.mxu0 %v793_v34  ;;  %421 = vmatprep.mubr.bf16.mxu0 %v798_v38 }
  0x24   :  { %463 = vmatmul.mubr.bf16.vlgmr.msra.gmra.mrb[0].mxu1 %v794_v35  ;;  %747 = vmatprep.subr.bf16.mxu0 %v797_v37 }
  0x25   :  { %470 = vmatprep.mubr.bf16.mxu1 %v802_v41 }
  0x27   :  { %748 = vmatpush3.bf16.msra.mxu0 %v797_v37 }
  0x28   :  { %749 = vmatprep.subr.bf16.mxu0 %v801_v40 }
  0x2a   :  { %422 = vmatmul.mubr.bf16.gmra.mrb[4].mxu0 %v800_v39 }
  0x2b   :  { %753 = vmatprep.mubr.msk.bf16.mxu0 %vm374_vm0, %v806_v44  ;;  %750 = vmatpush3.bf16.msra.mxu0 %v801_v40 }
  0x2c   :  { %471 = vmatmul.mubr.bf16.gmra.mrb[4].mxu1 %v804_v42  ;;  %751 = vmatprep.subr.bf16.mxu0 %v805_v43 }
  0x2f   :  { %752 = vmatpush3.bf16.msra.mxu0 %v805_v43 }
  0x32   :  { %754 = vmatmul.mubr.msk.bf16.vlgmr.msra.gmra.mrb[8].mxu0 %vm374_vm0, %v807_v45 }
  0xf5   :  { %v699_v47 = vpop.f32.mrb[0].mxu0 }
  0xf6   :  { %v700_v49 = vpop.f32.mrb[1].mxu0 }
  0xf7   :  { %v701_v50 = vadd.f32 %v700_v49, %v699_v47  ;;  %v702_v51 = vpop.f32.mrb[2].mxu0  ;;  %v727_v52 = vpop.f32.mrb[0].mxu1 }
  0xf8   :  { %v703_v53 = vpop.f32.mrb[3].mxu0  ;;  %v728_v56 = vpop.f32.mrb[1].mxu1 }
  0xf9   :  { %v416_v54 = vadd.f32 %v701_v50, %v615_v48  ;;  %v704_v55 = vadd.f32 %v703_v53, %v702_v51  ;;  %v729_v57 = vadd.f32 %v728_v56, %v727_v52  ;;  %v730_v58 = vpop.f32.mrb[2].mxu1 }
  0xfa   :  { %v731_v60 = vpop.f32.mrb[3].mxu1 }
  0xfb   :  { %v419_v59 = vadd.f32 %v704_v55, %v615_v48  ;;  %v732_v61 = vadd.f32 %v731_v60, %v730_v58  ;;  %v465_v62 = vadd.f32 %v729_v57, %v416_v54 }
  0xfd   :  { %v705_v63 = vpop.f32.mrb[4].mxu0  ;;  %v468_v1 = vadd.f32 %v732_v61, %v419_v59 }
  0xfe   :  { %v706_v0 = vpop.f32.mrb[5].mxu0 }
  0xff   :  { %v707_v2 = vadd.f32 %v706_v0, %v705_v63  ;;  %v708_v3 = vpop.f32.mrb[6].mxu0  ;;  %v733_v4 = vpop.f32.mrb[4].mxu1 }
 0x100   :  { %v709_v5 = vpop.f32.mrb[7].mxu0  ;;  %v734_v8 = vpop.f32.mrb[5].mxu1 }
 0x101   :  { %v424_v6 = vadd.f32 %v707_v2, %v615_v48  ;;  %v710_v7 = vadd.f32 %v709_v5, %v708_v3  ;;  %v735_v9 = vadd.f32 %v734_v8, %v733_v4  ;;  %v736_v10 = vpop.f32.mrb[6].mxu1 }
 0x102   :  { %v737_v12 = vpop.f32.mrb[7].mxu1 }
 0x103   :  { %v427_v11 = vadd.f32 %v710_v7, %v615_v48  ;;  %v738_v13 = vadd.f32 %v737_v12, %v736_v10  ;;  %v473_v14 = vadd.f32 %v735_v9, %v424_v6  ;;  %v604_v48 = vld [vmem:[%s992_s4] sm:$0x3] }
 0x105   :  { %v755_v15 = vpop.f32.mrb[8].mxu0  ;;  %v476_v16 = vadd.f32 %v738_v13, %v427_v11 }
 0x106   :  { %v522_v17 = vadd.f32 %v755_v15, %v473_v14  ;;  %v513_v18 = vpop.f32.mrb[9].mxu0 }
 0x107   :  { %v514_v19 = vadd.f32 %v513_v18, %v465_v62  ;;  %v756_v20 = vpop.f32.mrb[10].mxu0 }
 0x108   :  { %v525_v21 = vadd.f32 %v756_v20, %v476_v16  ;;  %v516_v22 = vpop.f32.mrb[11].mxu0  ;;  %v591_v29 = vmul.f32 %v522_v17, %v522_v17 }
 0x109   :  { %v517_v23 = vadd.f32 %v516_v22, %v468_v1  ;;  %v589_v25 = vmul.f32 %v514_v19, %v514_v19 }
 0x10a   :  { %v680_v24 = vpack.c.bf16 %v525_v21, %v522_v17  ;;  %v592_v32 = vmul.f32 %v525_v21, %v525_v21 }
 0x10b   :  { %v675_v26 = vpack.c.bf16 %v517_v23, %v514_v19  ;;  %v580_v27 = vadd.f32 %v517_v23, %v514_v19  ;;  %v590_v28 = vmul.f32 %v517_v23, %v517_v23 }
 0x10c   :  { %682 = vst [vmem:[%s994_s3 + $0x8] sm:$0xff] %v680_v24  }
 0x10d   :  { %676 = vst [vmem:[%s994_s3] sm:$0xff] %v675_v26   ;;  %v581_v30 = vadd.f32 %v580_v27, %v522_v17  ;;  %v593_v31 = vadd.f32 %v590_v28, %v589_v25 }
 0x10f   :  { %v582_v33 = vadd.f32 %v581_v30, %v525_v21  ;;  %v594_v34 = vadd.f32 %v593_v31, %v591_v29 }
 0x111   :  { %v583_v35 = vrot.slane %v582_v33, 4  ;;  %v595_v36 = vadd.f32 %v594_v34, %v592_v32 }
 0x113   :  { %v584_v37 = vadd.f32 %v583_v35, %v582_v33  ;;  %v596_v38 = vrot.slane %v595_v36, 4 }
 0x115   :  { %v585_v39 = vrot.slane %v584_v37, 2  ;;  %v597_v40 = vadd.f32 %v596_v38, %v595_v36 }
 0x117   :  { %v586_v41 = vadd.f32 %v585_v39, %v584_v37  ;;  %v598_v42 = vrot.slane %v597_v40, 2 }
 0x119   :  { %v587_v43 = vrot.slane %v586_v41, 1  ;;  %v599_v44 = vadd.f32 %v598_v42, %v597_v40 }
 0x11b   :  { %v600_v45 = vrot.slane %v599_v44, 1  ;;  %v588_v46 = vadd.f32 %v587_v43, %v586_v41 }
 0x11d   :  { %v601_v47 = vadd.f32 %v600_v45, %v599_v44 }
 0x11f   :  { %v603_v49 = vsel %vm602_vm1, %v588_v46, %v601_v47 }
 0x120   :  { %v605_v50 = vadd.f32 %v604_v48, %v603_v49 }
 0x122   :  { %606 = vst [vmem:[%s992_s4] sm:$0x3] %v605_v50 }

// kernel: net_simple_conv_forward.16
= control target key start
LH: loop header
LB: loop body
LE: loop exit
PB: predicated region body
PF: predicated region fallthrough
CT: control target
= control target key end

     0   :  { %v19_v0 = vlaneseq  ;;  %s94_s0 = inlined_call_operand.vmem [shape: bf16[8,256], index: 0, kind: input, shape index: {}]   ;;  %s95_s1 = inlined_call_operand.vmem [shape: f32[1,256], index: 1, kind: input, shape index: {}]   ;;  %s96_s2 = inlined_call_operand.vmem [shape: f32[1,256], index: 2, kind: input, shape index: {}]   ;;  %s97_s3 = inlined_call_operand.vmem [shape: bf16[8,256], index: 3, kind: output, shape index: {}]  }
   0x1   :  { %v14_v1 = vld [vmem:[%s94_s0] sm:$0xff] }
   0x2   :  { %v20_v2 = vshrl.u32 %v19_v0, 7  ;;  %v17_v3 = vld [vmem:[%s95_s1] sm:$0x3]  ;;  %v15_v5 = vunpack.c.l.bf16 %v14_v1  ;;  %v16_v6 = vunpack.c.h.bf16 %v14_v1 }
   0x3   :  { %v31_v4 = vld [vmem:[%s96_s2] sm:$0x3] }
   0x4   :  { %v21_v7 = vsub.s32 0, %v20_v2  ;;  %v25_v8 = vsub.s32 1, %v20_v2 }
   0x6   :  { %v22_v9 = vrot.slane %v17_v3, %v21_v7  ;;  %v26_v10 = vrot.slane %v17_v3, %v25_v8  ;;  %v36_v11 = vrot.slane %v31_v4, %v21_v7  ;;  %v40_v12 = vrot.slane %v31_v4, %v25_v8 }
   0x8   :  { %v29_v13 = vmul.f32 %v22_v9, %v15_v5  ;;  %v30_v14 = vmul.f32 %v26_v10, %v16_v6 }
   0xa   :  { %v43_v15 = vadd.f32 %v36_v11, %v29_v13  ;;  %v44_v16 = vadd.f32 %v40_v12, %v30_v14 }
   0xc   :  { %v45_v17 = vmax.f32 %v43_v15, 0.0  ;;  %v46_v18 = vmax.f32 %v44_v16, 0.0 }
   0xe   :  { %v61_v19 = vpack.c.bf16 %v46_v18, %v45_v17 }
  0x10   :  { %55 = vst [vmem:[%s97_s3] sm:$0xff] %v61_v19 }

// kernel: net_simple_conv_forward.15
= control target key start
LH: loop header
LB: loop body
LE: loop exit
PB: predicated region body
PF: predicated region fallthrough
CT: control target
= control target key end

     0   :  { %vm1185_vm0 = vcmask 1040384   ;;  %s2111_s1 = inlined_call_operand.vmem [shape: bf16[1152,256], index: 1, kind: input, shape index: {}]   ;;  %s2112_s0 = inlined_call_operand.vmem [shape: bf16[8,1152], index: 0, kind: input, shape index: {}]   ;;  %s2113_s4 = inlined_call_operand.vmem [shape: f32[2,256], index: 4, kind: output, shape index: {1}]   ;;  %s2114_s2 = inlined_call_operand.vmem [shape: f32[1,256], index: 2, kind: input, shape index: {}]   ;;  %s2115_s3 = inlined_call_operand.vmem [shape: bf16[8,256], index: 3, kind: output, shape index: {0}]  }
   0x1   :  { %v1384_v0 = vld [vmem:[%s2111_s1 + $0x4] ss:$8 sps:$4 sm:$0xff]   ;;  %v1388_v2 = vld [vmem:[%s2111_s1] ss:$8 sps:$4 sm:$0xff]   ;;  %v1390_v4 = vld [vmem:[%s2111_s1 + $0x14] ss:$8 sps:$4 sm:$0xff]  }
   0x2   :  { %v1386_v1 = vld [vmem:[%s2111_s1 + $0x204] ss:$8 sps:$4 sm:$0xff]   ;;  %930 = vmatprep.subr.bf16.mxu1 %v1384_v0  ;;  %v1389_v3 = vld [vmem:[%s2111_s1 + $0x200] ss:$8 sps:$4 sm:$0xff]   ;;  %v1392_v5 = vld [vmem:[%s2111_s1 + $0x214] ss:$8 sps:$4 sm:$0xff]  }
   0x3   :  { %1012 = vmatprep.subr.bf16.mxu0 %v1386_v1  ;;  %931 = vmatpush1.bf16.msra.mxu1 %v1388_v2  ;;  %v1394_v6 = vld [vmem:[%s2111_s1 + $0x10] ss:$8 sps:$4 sm:$0xff]   ;;  %v1396_v8 = vld [vmem:[%s2111_s1 + $0x24] ss:$8 sps:$4 sm:$0xff]   ;;  %v1400_v10 = vld [vmem:[%s2111_s1 + $0x20] ss:$8 sps:$4 sm:$0xff]  }
   0x4   :  { %1013 = vmatpush1.bf16.msra.mxu0 %v1389_v3  ;;  %932 = vmatprep.subr.bf16.mxu1 %v1390_v4  ;;  %v1395_v7 = vld [vmem:[%s2111_s1 + $0x210] ss:$8 sps:$4 sm:$0xff]   ;;  %v1398_v9 = vld [vmem:[%s2111_s1 + $0x224] ss:$8 sps:$4 sm:$0xff]   ;;  %v1401_v11 = vld [vmem:[%s2111_s1 + $0x220] ss:$8 sps:$4 sm:$0xff]  }
   0x5   :  { %1014 = vmatprep.subr.bf16.mxu0 %v1392_v5  ;;  %v1402_v12 = vld [vmem:[%s2111_s1 + $0x34] ss:$8 sps:$4 sm:$0xff]   ;;  %v1406_v14 = vld [vmem:[%s2111_s1 + $0x30] ss:$8 sps:$4 sm:$0xff]   ;;  %v1408_v16 = vld [vmem:[%s2111_s1 + $0x44] ss:$8 sps:$4 sm:$0xff]  }
   0x6   :  { %v1404_v13 = vld [vmem:[%s2111_s1 + $0x234] ss:$8 sps:$4 sm:$0xff]   ;;  %v1407_v15 = vld [vmem:[%s2111_s1 + $0x230] ss:$8 sps:$4 sm:$0xff]   ;;  %v1410_v17 = vld [vmem:[%s2111_s1 + $0x244] ss:$8 sps:$4 sm:$0xff]  }
   0x7   :  { %933 = vmatpush1.bf16.msra.mxu1 %v1394_v6  ;;  %v1412_v18 = vld [vmem:[%s2111_s1 + $0x40] ss:$8 sps:$4 sm:$0xff]   ;;  %v1414_v20 = vld [vmem:[%s2111_s1 + $0x54] ss:$8 sps:$4 sm:$0xff]   ;;  %v1418_v22 = vld [vmem:[%s2111_s1 + $0x50] ss:$8 sps:$4 sm:$0xff]  }
   0x8   :  { %1015 = vmatpush1.bf16.msra.mxu0 %v1395_v7  ;;  %934 = vmatprep.subr.bf16.mxu1 %v1396_v8  ;;  %v1413_v19 = vld [vmem:[%s2111_s1 + $0x240] ss:$8 sps:$4 sm:$0xff]   ;;  %v1416_v21 = vld [vmem:[%s2111_s1 + $0x254] ss:$8 sps:$4 sm:$0xff]   ;;  %v1419_v23 = vld [vmem:[%s2111_s1 + $0x250] ss:$8 sps:$4 sm:$0xff]  }
   0x9   :  { %1016 = vmatprep.subr.bf16.mxu0 %v1398_v9  ;;  %v1420_v24 = vld [vmem:[%s2111_s1 + $0x64] ss:$8 sps:$4 sm:$0xff]   ;;  %v1424_v26 = vld [vmem:[%s2111_s1 + $0x60] ss:$8 sps:$4 sm:$0xff]   ;;  %v1426_v28 = vld [vmem:[%s2111_s1 + $0x74] ss:$8 sps:$4 sm:$0xff]  }
   0xa   :  { %v1422_v25 = vld [vmem:[%s2111_s1 + $0x264] ss:$8 sps:$4 sm:$0xff]   ;;  %v1425_v27 = vld [vmem:[%s2111_s1 + $0x260] ss:$8 sps:$4 sm:$0xff]   ;;  %v1428_v29 = vld [vmem:[%s2111_s1 + $0x274] ss:$8 sps:$4 sm:$0xff]  }
   0xb   :  { %935 = vmatpush1.bf16.msra.mxu1 %v1400_v10  ;;  %v1430_v30 = vld [vmem:[%s2111_s1 + $0x70] ss:$8 sps:$4 sm:$0xff]   ;;  %v1432_v32 = vld [vmem:[%s2111_s1 + $0x84] ss:$8 sps:$4 sm:$0xff]   ;;  %v1436_v34 = vld [vmem:[%s2111_s1 + $0x80] ss:$8 sps:$4 sm:$0xff]  }
   0xc   :  { %1017 = vmatpush1.bf16.msra.mxu0 %v1401_v11  ;;  %936 = vmatprep.subr.bf16.mxu1 %v1402_v12  ;;  %v1431_v31 = vld [vmem:[%s2111_s1 + $0x270] ss:$8 sps:$4 sm:$0xff]   ;;  %v1434_v33 = vld [vmem:[%s2111_s1 + $0x284] ss:$8 sps:$4 sm:$0xff]   ;;  %v1437_v35 = vld [vmem:[%s2111_s1 + $0x280] ss:$8 sps:$4 sm:$0xff]  }
   0xd   :  { %1018 = vmatprep.subr.bf16.mxu0 %v1404_v13  ;;  %v1438_v36 = vld [vmem:[%s2111_s1 + $0x94] ss:$8 sps:$4 sm:$0xff]   ;;  %v1442_v38 = vld [vmem:[%s2111_s1 + $0x90] ss:$8 sps:$4 sm:$0xff]   ;;  %v1444_v40 = vld [vmem:[%s2111_s1 + $0xa4] ss:$8 sps:$4 sm:$0xff]  }
   0xe   :  { %v1440_v37 = vld [vmem:[%s2111_s1 + $0x294] ss:$8 sps:$4 sm:$0xff]   ;;  %v1443_v39 = vld [vmem:[%s2111_s1 + $0x290] ss:$8 sps:$4 sm:$0xff]   ;;  %v1446_v41 = vld [vmem:[%s2111_s1 + $0x2a4] ss:$8 sps:$4 sm:$0xff]  }
   0xf   :  { %937 = vmatpush1.bf16.msra.mxu1 %v1406_v14  ;;  %v1448_v42 = vld [vmem:[%s2111_s1 + $0xa0] ss:$8 sps:$4 sm:$0xff]   ;;  %v1450_v44 = vld [vmem:[%s2111_s1 + $0xb4] ss:$8 sps:$4 sm:$0xff]   ;;  %v1454_v47 = vld [vmem:[%s2111_s1 + $0xb0] ss:$8 sps:$4 sm:$0xff]  }
  0x10   :  { %1019 = vmatpush1.bf16.msra.mxu0 %v1407_v15  ;;  %938 = vmatprep.subr.bf16.mxu1 %v1408_v16  ;;  %v1449_v43 = vld [vmem:[%s2111_s1 + $0x2a0] ss:$8 sps:$4 sm:$0xff]   ;;  %v1452_v45 = vld [vmem:[%s2111_s1 + $0x2b4] ss:$8 sps:$4 sm:$0xff]   ;;  %v1455_v49 = vld [vmem:[%s2111_s1 + $0x2b0] ss:$8 sps:$4 sm:$0xff]  }
  0x11   :  { %1020 = vmatprep.subr.bf16.mxu0 %v1410_v17  ;;  %v17_v46 = vld [vmem:[%s2112_s0] sm:$0xff]  ;;  %v19_v50 = vld [vmem:[%s2112_s0 + $0x10] sm:$0xff] }
  0x12   :  { %v1211_v48 = vcombine.high %v17_v46, %v17_v46  ;;  %v1456_v51 = vld [vmem:[%s2111_s1 + $0xc4] ss:$8 sps:$4 sm:$0xff]   ;;  %v1215_v53 = vcombine.high %v19_v50, %v19_v50  ;;  %v1460_v54 = vld [vmem:[%s2111_s1 + $0xc0] ss:$8 sps:$4 sm:$0xff]   ;;  %v1462_v56 = vld [vmem:[%s2111_s1 + $0xd4] ss:$8 sps:$4 sm:$0xff]   ;;  %v1210_v6 = vcombine.low %v17_v46, %v17_v46  ;;  %v1214_v7 = vcombine.low %v19_v50, %v19_v50 }
  0x13   :  { %939 = vmatpush1.bf16.msra.mxu1 %v1412_v18  ;;  %v1458_v52 = vld [vmem:[%s2111_s1 + $0x2c4] ss:$8 sps:$4 sm:$0xff]   ;;  %v1461_v55 = vld [vmem:[%s2111_s1 + $0x2c0] ss:$8 sps:$4 sm:$0xff]   ;;  %v1464_v57 = vld [vmem:[%s2111_s1 + $0x2d4] ss:$8 sps:$4 sm:$0xff]  }
  0x14   :  { %1021 = vmatpush1.bf16.msra.mxu0 %v1413_v19  ;;  %940 = vmatprep.subr.bf16.mxu1 %v1414_v20  ;;  %v1466_v58 = vld [vmem:[%s2111_s1 + $0xd0] ss:$8 sps:$4 sm:$0xff]   ;;  %v1468_v60 = vld [vmem:[%s2111_s1 + $0xe4] ss:$8 sps:$4 sm:$0xff]   ;;  %v1472_v62 = vld [vmem:[%s2111_s1 + $0xe0] ss:$8 sps:$4 sm:$0xff]  }
  0x15   :  { %1022 = vmatprep.subr.bf16.mxu0 %v1416_v21  ;;  %962 = vmatprep.mubr.bf16.mxu1 %v1211_v48  ;;  %v1467_v59 = vld [vmem:[%s2111_s1 + $0x2d0] ss:$8 sps:$4 sm:$0xff]   ;;  %v1470_v61 = vld [vmem:[%s2111_s1 + $0x2e4] ss:$8 sps:$4 sm:$0xff]   ;;  %v1473_v63 = vld [vmem:[%s2111_s1 + $0x2e0] ss:$8 sps:$4 sm:$0xff]  }
  0x16   :  { %1044 = vmatprep.mubr.bf16.mxu0 %v1215_v53  ;;  %v1474_v0 = vld [vmem:[%s2111_s1 + $0xf4] ss:$8 sps:$4 sm:$0xff]   ;;  %v1478_v2 = vld [vmem:[%s2111_s1 + $0xf0] ss:$8 sps:$4 sm:$0xff]   ;;  %v1484_v4 = vld [vmem:[%s2111_s1 + $0x104] ss:$8 sps:$4 sm:$0xff]  }
  0x17   :  { %941 = vmatpush1.bf16.msra.mxu1 %v1418_v22  ;;  %v1476_v1 = vld [vmem:[%s2111_s1 + $0x2f4] ss:$8 sps:$4 sm:$0xff]   ;;  %v1479_v3 = vld [vmem:[%s2111_s1 + $0x2f0] ss:$8 sps:$4 sm:$0xff]   ;;  %v1489_v5 = vld [vmem:[%s2111_s1 + $0x304] ss:$8 sps:$4 sm:$0xff]  }
  0x18   :  { %1023 = vmatpush1.bf16.msra.mxu0 %v1419_v23  ;;  %942 = vmatprep.subr.bf16.mxu1 %v1420_v24  ;;  %v1482_v8 = vld [vmem:[%s2111_s1 + $0x100] ss:$8 sps:$4 sm:$0xff]   ;;  %v1492_v10 = vld [vmem:[%s2111_s1 + $0x114] ss:$8 sps:$4 sm:$0xff]   ;;  %v1490_v12 = vld [vmem:[%s2111_s1 + $0x110] ss:$8 sps:$4 sm:$0xff]  }
  0x19   :  { %1024 = vmatprep.subr.bf16.mxu0 %v1422_v25  ;;  %v1487_v9 = vld [vmem:[%s2111_s1 + $0x300] ss:$8 sps:$4 sm:$0xff]   ;;  %v1495_v11 = vld [vmem:[%s2111_s1 + $0x314] ss:$8 sps:$4 sm:$0xff]   ;;  %v1493_v13 = vld [vmem:[%s2111_s1 + $0x310] ss:$8 sps:$4 sm:$0xff]  }
  0x1a   :  { %v1498_v14 = vld [vmem:[%s2111_s1 + $0x124] ss:$8 sps:$4 sm:$0xff]   ;;  %v1496_v16 = vld [vmem:[%s2111_s1 + $0x120] ss:$8 sps:$4 sm:$0xff]   ;;  %v1504_v18 = vld [vmem:[%s2111_s1 + $0x134] ss:$8 sps:$4 sm:$0xff]  }
  0x1b   :  { %943 = vmatpush1.bf16.msra.mxu1 %v1424_v26  ;;  %v1501_v15 = vld [vmem:[%s2111_s1 + $0x324] ss:$8 sps:$4 sm:$0xff]   ;;  %v1499_v17 = vld [vmem:[%s2111_s1 + $0x320] ss:$8 sps:$4 sm:$0xff]   ;;  %v1507_v19 = vld [vmem:[%s2111_s1 + $0x334] ss:$8 sps:$4 sm:$0xff]  }
  0x1c   :  { %1025 = vmatpush1.bf16.msra.mxu0 %v1425_v27  ;;  %944 = vmatprep.subr.bf16.mxu1 %v1426_v28  ;;  %v1502_v20 = vld [vmem:[%s2111_s1 + $0x130] ss:$8 sps:$4 sm:$0xff]   ;;  %v1510_v22 = vld [vmem:[%s2111_s1 + $0x144] ss:$8 sps:$4 sm:$0xff]   ;;  %v1508_v24 = vld [vmem:[%s2111_s1 + $0x140] ss:$8 sps:$4 sm:$0xff]  }
  0x1d   :  { %1026 = vmatprep.subr.bf16.mxu0 %v1428_v29  ;;  %v1505_v21 = vld [vmem:[%s2111_s1 + $0x330] ss:$8 sps:$4 sm:$0xff]   ;;  %v1513_v23 = vld [vmem:[%s2111_s1 + $0x344] ss:$8 sps:$4 sm:$0xff]   ;;  %v1511_v25 = vld [vmem:[%s2111_s1 + $0x340] ss:$8 sps:$4 sm:$0xff]  }
  0x1e   :  { %v1516_v26 = vld [vmem:[%s2111_s1 + $0x154] ss:$8 sps:$4 sm:$0xff]   ;;  %v1514_v28 = vld [vmem:[%s2111_s1 + $0x150] ss:$8 sps:$4 sm:$0xff]   ;;  %v1546_v50 = vld [vmem:[%s2111_s1 + $0x1a4] ss:$8 sps:$4 sm:$0xff]  }
  0x1f   :  { %945 = vmatpush1.bf16.msra.mxu1 %v1430_v30  ;;  %v1519_v27 = vld [vmem:[%s2111_s1 + $0x354] ss:$8 sps:$4 sm:$0xff]   ;;  %v1517_v29 = vld [vmem:[%s2111_s1 + $0x350] ss:$8 sps:$4 sm:$0xff]   ;;  %v1522_v30 = vld [vmem:[%s2111_s1 + $0x164] ss:$8 sps:$4 sm:$0xff]  }
  0x20   :  { %1027 = vmatpush1.bf16.msra.mxu0 %v1431_v31  ;;  %946 = vmatprep.subr.bf16.mxu1 %v1432_v32  ;;  %v1525_v31 = vld [vmem:[%s2111_s1 + $0x364] ss:$8 sps:$4 sm:$0xff]   ;;  %v1540_v46 = vld [vmem:[%s2111_s1 + $0x194] ss:$8 sps:$4 sm:$0xff]   ;;  %v1538_v48 = vld [vmem:[%s2111_s1 + $0x190] ss:$8 sps:$4 sm:$0xff]  }
  0x21   :  { %1028 = vmatprep.subr.bf16.mxu0 %v1434_v33  ;;  %v1916_v32 = vld [vmem:[%s2112_s0 + $0x8] sm:$0xff]  ;;  %v1921_v33 = vld [vmem:[%s2112_s0 + $0x18] sm:$0xff] }
  0x22   :  { %v1547_v53 = vld [vmem:[%s2111_s1 + $0x3a0] ss:$8 sps:$4 sm:$0xff]  }
  0x23   :  { %947 = vmatpush1.bf16.msra.mxu1 %v1436_v34  ;;  %v1520_v34 = vld [vmem:[%s2111_s1 + $0x160] ss:$8 sps:$4 sm:$0xff]  }
  0x24   :  { %1029 = vmatpush1.bf16.msra.mxu0 %v1437_v35  ;;  %948 = vmatprep.subr.bf16.mxu1 %v1438_v36  ;;  %v1523_v35 = vld [vmem:[%s2111_s1 + $0x360] ss:$8 sps:$4 sm:$0xff]   ;;  %v1213_v36 = vcombine.high %v1916_v32, %v1916_v32 }
  0x25   :  { %1030 = vmatprep.subr.bf16.mxu0 %v1440_v37  ;;  %v1217_v37 = vcombine.high %v1921_v33, %v1921_v33 }
  0x27   :  { %949 = vmatpush1.bf16.msra.mxu1 %v1442_v38  ;;  %v1528_v38 = vld [vmem:[%s2111_s1 + $0x174] ss:$8 sps:$4 sm:$0xff]  }
  0x28   :  { %1031 = vmatpush1.bf16.msra.mxu0 %v1443_v39  ;;  %950 = vmatprep.subr.bf16.mxu1 %v1444_v40  ;;  %v1531_v39 = vld [vmem:[%s2111_s1 + $0x374] ss:$8 sps:$4 sm:$0xff]   ;;  %v1526_v40 = vld [vmem:[%s2111_s1 + $0x170] ss:$8 sps:$4 sm:$0xff]  }
  0x29   :  { %1032 = vmatprep.subr.bf16.mxu0 %v1446_v41  ;;  %v1529_v41 = vld [vmem:[%s2111_s1 + $0x370] ss:$8 sps:$4 sm:$0xff]  }
  0x2b   :  { %951 = vmatpush1.bf16.msra.mxu1 %v1448_v42  ;;  %v1534_v42 = vld [vmem:[%s2111_s1 + $0x184] ss:$8 sps:$4 sm:$0xff]  }
  0x2c   :  { %1033 = vmatpush1.bf16.msra.mxu0 %v1449_v43  ;;  %952 = vmatprep.subr.bf16.mxu1 %v1450_v44  ;;  %v1537_v43 = vld [vmem:[%s2111_s1 + $0x384] ss:$8 sps:$4 sm:$0xff]   ;;  %v1532_v44 = vld [vmem:[%s2111_s1 + $0x180] ss:$8 sps:$4 sm:$0xff]  }
  0x2d   :  { %1034 = vmatprep.subr.bf16.mxu0 %v1452_v45  ;;  %v1535_v45 = vld [vmem:[%s2111_s1 + $0x380] ss:$8 sps:$4 sm:$0xff]  }
  0x2f   :  { %953 = vmatpush1.bf16.msra.mxu1 %v1454_v47  ;;  %v1543_v47 = vld [vmem:[%s2111_s1 + $0x394] ss:$8 sps:$4 sm:$0xff]  }
  0x30   :  { %1035 = vmatpush1.bf16.msra.mxu0 %v1455_v49  ;;  %954 = vmatprep.subr.bf16.mxu1 %v1456_v51  ;;  %v1541_v49 = vld [vmem:[%s2111_s1 + $0x390] ss:$8 sps:$4 sm:$0xff]   ;;  %v1549_v51 = vld [vmem:[%s2111_s1 + $0x3a4] ss:$8 sps:$4 sm:$0xff]  }
  0x31   :  { %1036 = vmatprep.subr.bf16.mxu0 %v1458_v52  ;;  %v1544_v52 = vld [vmem:[%s2111_s1 + $0x1a0] ss:$8 sps:$4 sm:$0xff]  }
  0x33   :  { %955 = vmatpush1.bf16.msra.mxu1 %v1460_v54  ;;  %v1552_v54 = vld [vmem:[%s2111_s1 + $0x1b4] ss:$8 sps:$4 sm:$0xff]  }
  0x34   :  { %1037 = vmatpush1.bf16.msra.mxu0 %v1461_v55  ;;  %956 = vmatprep.subr.bf16.mxu1 %v1462_v56  ;;  %v1555_v55 = vld [vmem:[%s2111_s1 + $0x3b4] ss:$8 sps:$4 sm:$0xff]   ;;  %v1550_v56 = vld [vmem:[%s2111_s1 + $0x1b0] ss:$8 sps:$4 sm:$0xff]  }
  0x35   :  { %1038 = vmatprep.subr.bf16.mxu0 %v1464_v57  ;;  %v1553_v57 = vld [vmem:[%s2111_s1 + $0x3b0] ss:$8 sps:$4 sm:$0xff]  }
  0x37   :  { %957 = vmatpush1.bf16.msra.mxu1 %v1466_v58  ;;  %v1558_v58 = vld [vmem:[%s2111_s1 + $0x1c4] ss:$8 sps:$4 sm:$0xff]  }
  0x38   :  { %1039 = vmatpush1.bf16.msra.mxu0 %v1467_v59  ;;  %958 = vmatprep.subr.bf16.mxu1 %v1468_v60  ;;  %v1561_v59 = vld [vmem:[%s2111_s1 + $0x3c4] ss:$8 sps:$4 sm:$0xff]   ;;  %v1556_v60 = vld [vmem:[%s2111_s1 + $0x1c0] ss:$8 sps:$4 sm:$0xff]  }
  0x39   :  { %1040 = vmatprep.subr.bf16.mxu0 %v1470_v61  ;;  %v1559_v61 = vld [vmem:[%s2111_s1 + $0x3c0] ss:$8 sps:$4 sm:$0xff]  }
  0x3b   :  { %959 = vmatpush1.bf16.msra.mxu1 %v1472_v62  ;;  %v1564_v62 = vld [vmem:[%s2111_s1 + $0x1d4] ss:$8 sps:$4 sm:$0xff]  }
  0x3c   :  { %1041 = vmatpush1.bf16.msra.mxu0 %v1473_v63  ;;  %960 = vmatprep.subr.bf16.mxu1 %v1474_v0  ;;  %v1567_v63 = vld [vmem:[%s2111_s1 + $0x3d4] ss:$8 sps:$4 sm:$0xff]   ;;  %v1562_v0 = vld [vmem:[%s2111_s1 + $0x1d0] ss:$8 sps:$4 sm:$0xff]  }
  0x3d   :  { %1042 = vmatprep.subr.bf16.mxu0 %v1476_v1  ;;  %v1565_v1 = vld [vmem:[%s2111_s1 + $0x3d0] ss:$8 sps:$4 sm:$0xff]  }
  0x3f   :  { %961 = vmatpush1.bf16.msra.mxu1 %v1478_v2  ;;  %v1570_v2 = vld [vmem:[%s2111_s1 + $0x1e4] ss:$8 sps:$4 sm:$0xff]  }
  0x40   :  { %1043 = vmatpush1.bf16.msra.mxu0 %v1479_v3  ;;  %971 = vmatprep.subr.bf16.mxu1 %v1484_v4  ;;  %v1573_v3 = vld [vmem:[%s2111_s1 + $0x3e4] ss:$8 sps:$4 sm:$0xff]   ;;  %v1568_v4 = vld [vmem:[%s2111_s1 + $0x1e0] ss:$8 sps:$4 sm:$0xff]  }
  0x41   :  { %1053 = vmatprep.subr.bf16.mxu0 %v1489_v5  ;;  %v1571_v5 = vld [vmem:[%s2111_s1 + $0x3e0] ss:$8 sps:$4 sm:$0xff]  }
  0x42   :  { %963 = vmatmul.mubr.bf16.vlgmr.msra.gmra.mrb[0].mxu1 %v1210_v6  ;;  %v1576_v6 = vld [vmem:[%s2111_s1 + $0x1f4] ss:$8 sps:$4 sm:$0xff]  }
  0x43   :  { %1045 = vmatmul.mubr.bf16.vlgmr.msra.gmra.mrb[0].mxu0 %v1214_v7  ;;  %972 = vmatpush1.bf16.msra.mxu1 %v1482_v8  ;;  %v1579_v7 = vld [vmem:[%s2111_s1 + $0x3f4] ss:$8 sps:$4 sm:$0xff]   ;;  %v1574_v8 = vld [vmem:[%s2111_s1 + $0x1f0] ss:$8 sps:$4 sm:$0xff]  }
  0x44   :  { %1054 = vmatpush1.bf16.msra.mxu0 %v1487_v9  ;;  %973 = vmatprep.subr.bf16.mxu1 %v1492_v10  ;;  %v1577_v9 = vld [vmem:[%s2111_s1 + $0x3f0] ss:$8 sps:$4 sm:$0xff]   ;;  %v1586_v10 = vld [vmem:[%s2111_s1 + $0x404] ss:$8 sps:$4 sm:$0xff]  }
  0x45   :  { %1055 = vmatprep.subr.bf16.mxu0 %v1495_v11  ;;  %1003 = vmatprep.mubr.bf16.mxu1 %v1213_v36  ;;  %v1212_v11 = vcombine.low %v1916_v32, %v1916_v32 }
  0x46   :  { %1085 = vmatprep.mubr.bf16.mxu0 %v1217_v37 }
  0x47   :  { %974 = vmatpush1.bf16.msra.mxu1 %v1490_v12  ;;  %v1216_v12 = vcombine.low %v1921_v33, %v1921_v33 }
  0x48   :  { %1056 = vmatpush1.bf16.msra.mxu0 %v1493_v13  ;;  %975 = vmatprep.subr.bf16.mxu1 %v1498_v14  ;;  %v1584_v13 = vld [vmem:[%s2111_s1 + $0x400] ss:$8 sps:$4 sm:$0xff]   ;;  %v1589_v14 = vld [vmem:[%s2111_s1 + $0x414] ss:$8 sps:$4 sm:$0xff]  }
  0x49   :  { %1057 = vmatprep.subr.bf16.mxu0 %v1501_v15  ;;  %v1587_v15 = vld [vmem:[%s2111_s1 + $0x410] ss:$8 sps:$4 sm:$0xff]  }
  0x4b   :  { %976 = vmatpush1.bf16.msra.mxu1 %v1496_v16  ;;  %v1609_v16 = vmov 0  }
  0x4c   :  { %1058 = vmatpush1.bf16.msra.mxu0 %v1499_v17  ;;  %977 = vmatprep.subr.bf16.mxu1 %v1504_v18  ;;  %v1592_v17 = vld [vmem:[%s2111_s1 + $0x424] ss:$8 sps:$4 sm:$0xff]   ;;  %v1590_v18 = vld [vmem:[%s2111_s1 + $0x420] ss:$8 sps:$4 sm:$0xff]  }
  0x4d   :  { %1059 = vmatprep.subr.bf16.mxu0 %v1507_v19  ;;  %v1595_v19 = vld [vmem:[%s2111_s1 + $0x434] ss:$8 sps:$4 sm:$0xff]  }
  0x4f   :  { %978 = vmatpush1.bf16.msra.mxu1 %v1502_v20  ;;  %v1593_v20 = vld [vmem:[%s2111_s1 + $0x430] ss:$8 sps:$4 sm:$0xff]  }
  0x50   :  { %1060 = vmatpush1.bf16.msra.mxu0 %v1505_v21  ;;  %979 = vmatprep.subr.bf16.mxu1 %v1510_v22  ;;  %v1598_v21 = vld [vmem:[%s2111_s1 + $0x444] ss:$8 sps:$4 sm:$0xff]   ;;  %v1596_v22 = vld [vmem:[%s2111_s1 + $0x440] ss:$8 sps:$4 sm:$0xff]  }
  0x51   :  { %1061 = vmatprep.subr.bf16.mxu0 %v1513_v23  ;;  %v1601_v23 = vld [vmem:[%s2111_s1 + $0x454] ss:$8 sps:$4 sm:$0xff]  }
  0x53   :  { %980 = vmatpush1.bf16.msra.mxu1 %v1508_v24  ;;  %v1599_v24 = vld [vmem:[%s2111_s1 + $0x450] ss:$8 sps:$4 sm:$0xff]  }
  0x54   :  { %1062 = vmatpush1.bf16.msra.mxu0 %v1511_v25  ;;  %981 = vmatprep.subr.bf16.mxu1 %v1516_v26  ;;  %v1604_v25 = vld [vmem:[%s2111_s1 + $0x464] ss:$8 sps:$4 sm:$0xff]   ;;  %v1602_v26 = vld [vmem:[%s2111_s1 + $0x460] ss:$8 sps:$4 sm:$0xff]  }
  0x55   :  { %1063 = vmatprep.subr.bf16.mxu0 %v1519_v27  ;;  %v1607_v27 = vld [vmem:[%s2111_s1 + $0x474] ss:$8 sps:$4 sm:$0xff]  }
  0x57   :  { %982 = vmatpush1.bf16.msra.mxu1 %v1514_v28  ;;  %v1605_v28 = vld [vmem:[%s2111_s1 + $0x470] ss:$8 sps:$4 sm:$0xff]  }
  0x58   :  { %1064 = vmatpush1.bf16.msra.mxu0 %v1517_v29  ;;  %983 = vmatprep.subr.bf16.mxu1 %v1522_v30  ;;  %v1608_v29 = vld [vmem:[%s2112_s0 + $0x20] ss:$0 sps:$4 sm:$0xff]   ;;  %v1610_v30 = vmov 0.0  }
  0x59   :  { %1065 = vmatprep.subr.bf16.mxu0 %v1525_v31  ;;  %1148 = vst [vmem:[%s2113_s4] sm:$0xf] %v1610_v30 }
  0x5b   :  { %984 = vmatpush1.bf16.msra.mxu1 %v1520_v34 }
  0x5c   :  { %1066 = vmatpush1.bf16.msra.mxu0 %v1523_v35  ;;  %985 = vmatprep.subr.bf16.mxu1 %v1528_v38  ;;  %v168_v35 = vlaneseq  ;;  %v166_v38 = vld [vmem:[%s2114_s2] sm:$0x3] }
  0x5d   :  { %1067 = vmatprep.subr.bf16.mxu0 %v1531_v39 }
  0x5e   :  { %v169_v36 = vshrl.u32 %v168_v35, 7 }
  0x5f   :  { %986 = vmatpush1.bf16.msra.mxu1 %v1526_v40 }
  0x60   :  { %1068 = vmatpush1.bf16.msra.mxu0 %v1529_v41  ;;  %987 = vmatprep.subr.bf16.mxu1 %v1534_v42  ;;  %v170_v37 = vsub.s32 0, %v169_v36  ;;  %v174_v39 = vsub.s32 1, %v169_v36 }
  0x61   :  { %1069 = vmatprep.subr.bf16.mxu0 %v1537_v43 }
  0x62   :  { %v171_v40 = vrot.slane %v166_v38, %v170_v37  ;;  %v175_v41 = vrot.slane %v166_v38, %v174_v39 }
  0x63   :  { %988 = vmatpush1.bf16.msra.mxu1 %v1532_v44 }
  0x64   :  { %1070 = vmatpush1.bf16.msra.mxu0 %v1535_v45  ;;  %989 = vmatprep.subr.bf16.mxu1 %v1540_v46 }
  0x65   :  { %1071 = vmatprep.subr.bf16.mxu0 %v1543_v47 }
  0x67   :  { %990 = vmatpush1.bf16.msra.mxu1 %v1538_v48 }
  0x68   :  { %1072 = vmatpush1.bf16.msra.mxu0 %v1541_v49  ;;  %991 = vmatprep.subr.bf16.mxu1 %v1546_v50 }
  0x69   :  { %1073 = vmatprep.subr.bf16.mxu0 %v1549_v51 }
  0x6b   :  { %992 = vmatpush1.bf16.msra.mxu1 %v1544_v52 }
  0x6c   :  { %1074 = vmatpush1.bf16.msra.mxu0 %v1547_v53  ;;  %993 = vmatprep.subr.bf16.mxu1 %v1552_v54 }
  0x6d   :  { %1075 = vmatprep.subr.bf16.mxu0 %v1555_v55 }
  0x6f   :  { %994 = vmatpush1.bf16.msra.mxu1 %v1550_v56 }
  0x70   :  { %1076 = vmatpush1.bf16.msra.mxu0 %v1553_v57  ;;  %995 = vmatprep.subr.bf16.mxu1 %v1558_v58 }
  0x71   :  { %1077 = vmatprep.subr.bf16.mxu0 %v1561_v59 }
  0x73   :  { %996 = vmatpush1.bf16.msra.mxu1 %v1556_v60 }
  0x74   :  { %1078 = vmatpush1.bf16.msra.mxu0 %v1559_v61  ;;  %997 = vmatprep.subr.bf16.mxu1 %v1564_v62 }
  0x75   :  { %1079 = vmatprep.subr.bf16.mxu0 %v1567_v63  ;;  %v1611_v63 = vmov 1983009808  }
  0x77   :  { %998 = vmatpush1.bf16.msra.mxu1 %v1562_v0  ;;  %v1193_v0 = vunpack.c.l.s4 %v1611_v63 }
  0x78   :  { %1080 = vmatpush1.bf16.msra.mxu0 %v1565_v1  ;;  %999 = vmatprep.subr.bf16.mxu1 %v1570_v2 }
  0x79   :  { %1081 = vmatprep.subr.bf16.mxu0 %v1573_v3 }
  0x7b   :  { %1000 = vmatpush1.bf16.msra.mxu1 %v1568_v4 }
  0x7c   :  { %1082 = vmatpush1.bf16.msra.mxu0 %v1571_v5  ;;  %1001 = vmatprep.subr.bf16.mxu1 %v1576_v6 }
  0x7d   :  { %1083 = vmatprep.subr.bf16.mxu0 %v1579_v7 }
  0x7f   :  { %1002 = vmatpush1.bf16.msra.mxu1 %v1574_v8 }
  0x80   :  { %1084 = vmatpush1.bf16.msra.mxu0 %v1577_v9  ;;  %v1194_v9 = vunpack.c.0.s8 %v1193_v0 }
  0x81   :  { %1094 = vmatprep.subr.bf16.mxu0 %v1586_v10 }
  0x82   :  { %1004 = vmatmul.mubr.bf16.vlgmr.msra.gmra.mrb[0].mxu1 %v1212_v11 }
  0x83   :  { %1086 = vmatmul.mubr.bf16.vlgmr.msra.gmra.mrb[0].mxu0 %v1216_v12 }
  0x84   :  { %1095 = vmatpush1.bf16.msra.mxu0 %v1584_v13  ;;  %1126 = vmatprep.mubr.bf16.mxu0 %v1609_v16  ;;  %v1197_v16 = vsub.s32 %v1194_v9, %v169_v36 }
  0x85   :  { %1096 = vmatprep.subr.bf16.mxu0 %v1589_v14 }
  0x88   :  { %1097 = vmatpush1.bf16.msra.mxu0 %v1587_v15 }
  0x89   :  { %1098 = vmatprep.subr.bf16.mxu0 %v1592_v17 }
  0x8c   :  { %1099 = vmatpush1.bf16.msra.mxu0 %v1590_v18 }
  0x8d   :  { %1100 = vmatprep.subr.bf16.mxu0 %v1595_v19 }
  0x90   :  { %1101 = vmatpush1.bf16.msra.mxu0 %v1593_v20  ;;  %v1188_v20 = vld [vmem:[%s2113_s4] sm:$0xf] }
  0x91   :  { %1102 = vmatprep.subr.bf16.mxu0 %v1598_v21 }
  0x94   :  { %1103 = vmatpush1.bf16.msra.mxu0 %v1596_v22 }
  0x95   :  { %1104 = vmatprep.subr.bf16.mxu0 %v1601_v23 }
  0x98   :  { %1105 = vmatpush1.bf16.msra.mxu0 %v1599_v24 }
  0x99   :  { %1106 = vmatprep.subr.bf16.mxu0 %v1604_v25 }
  0x9c   :  { %1107 = vmatpush1.bf16.msra.mxu0 %v1602_v26 }
  0x9d   :  { %1108 = vmatprep.subr.bf16.mxu0 %v1607_v27 }
  0xa0   :  { %1109 = vmatpush1.bf16.msra.mxu0 %v1605_v28 }
  0xa3   :  { %1127 = vmatmul.mubr.bf16.vlgmr.msra.gmra.mrb[0].mxu0 %v1608_v29 }
 0x155   :  { %v1005_v31 = vpop.f32.mrb[0].mxu1 }
 0x156   :  { %v1007_v32 = vpop.f32.mrb[1].mxu1  ;;  %v1365_v42 = vadd.f32 %v1005_v31, %v171_v40 }
 0x157   :  { %v1009_v33 = vpop.f32.mrb[2].mxu1  ;;  %v1367_v43 = vadd.f32 %v1007_v32, %v175_v41 }
 0x158   :  { %v1010_v34 = vpop.f32.mrb[3].mxu1 }
 0x176   :  { %v1128_v44 = vpop.f32.mrb[0].mxu0 }
 0x177   :  { %v1366_v45 = vadd.f32 %v1365_v42, %v1128_v44  ;;  %v1130_v46 = vpop.f32.mrb[1].mxu0 }
 0x178   :  { %v1368_v47 = vadd.f32 %v1367_v43, %v1130_v46  ;;  %v1132_v48 = vpop.f32.mrb[2].mxu0 }
 0x179   :  { %v1159_v49 = vrot.slane %v1366_v45, 4  ;;  %v1171_v50 = vmul.f32 %v1366_v45, %v1366_v45  ;;  %v1133_v51 = vpop.f32.mrb[3].mxu0 }
 0x17a   :  { %v1364_v52 = vpack.c.bf16 %v1368_v47, %v1366_v45  ;;  %v1165_v53 = vrot.slane %v1368_v47, 4  ;;  %v1172_v54 = vmul.f32 %v1368_v47, %v1368_v47 }
 0x17b   :  { %v1160_v55 = vadd.f32 %v1366_v45, %v1159_v49  ;;  %v1173_v56 = vrot.slane %v1171_v50, 4 }
 0x17c   :  { %1143 = vst [vmem:[%s2115_s3] sm:$0xff] %v1364_v52  ;;  %v1166_v57 = vadd.f32 %v1368_v47, %v1165_v53  ;;  %v1179_v58 = vrot.slane %v1172_v54, 4 }
 0x17d   :  { %v1161_v59 = vrot.slane %v1160_v55, 2  ;;  %v1174_v60 = vadd.f32 %v1173_v56, %v1171_v50 }
 0x17e   :  { %v1167_v61 = vrot.slane %v1166_v57, 2  ;;  %v1180_v62 = vadd.f32 %v1179_v58, %v1172_v54 }
 0x17f   :  { %v1162_v1 = vadd.f32 %v1161_v59, %v1160_v55  ;;  %v1175_v2 = vrot.slane %v1174_v60, 2 }
 0x180   :  { %v1168_v3 = vadd.f32 %v1167_v61, %v1166_v57  ;;  %v1181_v4 = vrot.slane %v1180_v62, 2 }
 0x181   :  { %v1163_v5 = vrot.slane %v1162_v1, 1  ;;  %v1176_v6 = vadd.f32 %v1175_v2, %v1174_v60 }
 0x182   :  { %v1169_v7 = vrot.slane %v1168_v3, 1  ;;  %v1182_v8 = vadd.f32 %v1181_v4, %v1180_v62 }
 0x183   :  { %v1177_v10 = vrot.slane %v1176_v6, 1  ;;  %v1164_v12 = vadd.f32 %v1163_v5, %v1162_v1 }
 0x184   :  { %v1183_v11 = vrot.slane %v1182_v8, 1  ;;  %v1170_v14 = vadd.f32 %v1169_v7, %v1168_v3 }
 0x185   :  { %v1178_v13 = vadd.f32 %v1177_v10, %v1176_v6 }
 0x186   :  { %v1184_v15 = vadd.f32 %v1183_v11, %v1182_v8 }
 0x187   :  { %v1186_v17 = vsel %vm1185_vm0, %v1164_v12, %v1178_v13 }
 0x188   :  { %v1187_v18 = vsel %vm1185_vm0, %v1170_v14, %v1184_v15 }
 0x189   :  { %v1191_v19 = vcombine.low %v1186_v17, %v1187_v18 }
 0x18b   :  { %v1198_v21 = vrot.slane %v1191_v19, %v1197_v16 }
 0x18d   :  { %v1200_v22 = vadd.f32 %v1198_v21, %v1188_v20 }
 0x18f   :  { %1201 = vst [vmem:[%s2113_s4] sm:$0xf] %v1200_v22 }

// kernel: net_simple_conv_forward.17
= control target key start
LH: loop header
LB: loop body
LE: loop exit
PB: predicated region body
PF: predicated region fallthrough
CT: control target
= control target key end

     0   :  { %s1194_s1 = inlined_call_operand.vmem [shape: bf16[1024,128], index: 1, kind: input, shape index: {}]   ;;  %s1195_s0 = inlined_call_operand.vmem [shape: bf16[8,1024], index: 0, kind: input, shape index: {}]   ;;  %s1196_s2 = inlined_call_operand.vmem [shape: f32[1,128], index: 2, kind: input, shape index: {}]   ;;  %s1197_s3 = inlined_call_operand.vmem [shape: f32[8,128], index: 3, kind: output, shape index: {}]  }
   0x1   :  { %v892_v0 = vld [vmem:[%s1194_s1 + $0x40] sm:$0xff]   ;;  %v896_v4 = vld [vmem:[%s1194_s1 + $0x48] sm:$0xff]   ;;  %v900_v8 = vld [vmem:[%s1194_s1 + $0x50] sm:$0xff]  }
   0x2   :  { %v893_v1 = vld [vmem:[%s1194_s1 + $0xc0] sm:$0xff]   ;;  %804 = vmatprep.subr.bf16.mxu0 %v892_v0  ;;  %v897_v5 = vld [vmem:[%s1194_s1 + $0xc8] sm:$0xff]   ;;  %v901_v9 = vld [vmem:[%s1194_s1 + $0xd0] sm:$0xff]  }
   0x3   :  { %v894_v2 = vld [vmem:[%s1194_s1] sm:$0xff]   ;;  %826 = vmatprep.subr.bf16.mxu1 %v893_v1  ;;  %v898_v6 = vld [vmem:[%s1194_s1 + $0x8] sm:$0xff]   ;;  %v902_v10 = vld [vmem:[%s1194_s1 + $0x10] sm:$0xff]  }
   0x4   :  { %v895_v3 = vld [vmem:[%s1194_s1 + $0x80] sm:$0xff]   ;;  %805 = vmatpush3.bf16.msra.mxu0 %v894_v2  ;;  %v899_v7 = vld [vmem:[%s1194_s1 + $0x88] sm:$0xff]   ;;  %v903_v11 = vld [vmem:[%s1194_s1 + $0x90] sm:$0xff]  }
   0x5   :  { %827 = vmatpush3.bf16.msra.mxu1 %v895_v3  ;;  %806 = vmatprep.subr.bf16.mxu0 %v896_v4  ;;  %v904_v12 = vld [vmem:[%s1194_s1 + $0x58] sm:$0xff]   ;;  %v908_v16 = vld [vmem:[%s1194_s1 + $0x60] sm:$0xff]   ;;  %v912_v20 = vld [vmem:[%s1194_s1 + $0x68] sm:$0xff]  }
   0x6   :  { %828 = vmatprep.subr.bf16.mxu1 %v897_v5  ;;  %v905_v13 = vld [vmem:[%s1194_s1 + $0xd8] sm:$0xff]   ;;  %v909_v17 = vld [vmem:[%s1194_s1 + $0xe0] sm:$0xff]   ;;  %v913_v21 = vld [vmem:[%s1194_s1 + $0xe8] sm:$0xff]  }
   0x7   :  { %v906_v14 = vld [vmem:[%s1194_s1 + $0x18] sm:$0xff]   ;;  %v910_v18 = vld [vmem:[%s1194_s1 + $0x20] sm:$0xff]   ;;  %v914_v22 = vld [vmem:[%s1194_s1 + $0x28] sm:$0xff]  }
   0x8   :  { %807 = vmatpush3.bf16.msra.mxu0 %v898_v6  ;;  %v907_v15 = vld [vmem:[%s1194_s1 + $0x98] sm:$0xff]   ;;  %v911_v19 = vld [vmem:[%s1194_s1 + $0xa0] sm:$0xff]   ;;  %v915_v23 = vld [vmem:[%s1194_s1 + $0xa8] sm:$0xff]  }
   0x9   :  { %829 = vmatpush3.bf16.msra.mxu1 %v899_v7  ;;  %808 = vmatprep.subr.bf16.mxu0 %v900_v8  ;;  %v916_v24 = vld [vmem:[%s1194_s1 + $0x70] sm:$0xff]   ;;  %v920_v28 = vld [vmem:[%s1194_s1 + $0x78] sm:$0xff]   ;;  %v15_v32 = vld [vmem:[%s1195_s0] sm:$0xff] }
   0xa   :  { %830 = vmatprep.subr.bf16.mxu1 %v901_v9  ;;  %v917_v25 = vld [vmem:[%s1194_s1 + $0xf0] sm:$0xff]   ;;  %v921_v29 = vld [vmem:[%s1194_s1 + $0xf8] sm:$0xff]   ;;  %v16_v33 = vld [vmem:[%s1195_s0 + $0x8] sm:$0xff]  ;;  %v732_v34 = vcombine.low %v15_v32, %v15_v32  ;;  %v733_v35 = vcombine.high %v15_v32, %v15_v32 }
   0xb   :  { %v918_v26 = vld [vmem:[%s1194_s1 + $0x30] sm:$0xff]   ;;  %v922_v30 = vld [vmem:[%s1194_s1 + $0x38] sm:$0xff]   ;;  %v734_v36 = vcombine.low %v16_v33, %v16_v33  ;;  %v735_v37 = vcombine.high %v16_v33, %v16_v33  ;;  %v928_v38 = vld [vmem:[%s1194_s1 + $0x140] sm:$0xff]  }
   0xc   :  { %809 = vmatpush3.bf16.msra.mxu0 %v902_v10  ;;  %v919_v27 = vld [vmem:[%s1194_s1 + $0xb0] sm:$0xff]   ;;  %v923_v31 = vld [vmem:[%s1194_s1 + $0xb8] sm:$0xff]   ;;  %v929_v39 = vld [vmem:[%s1194_s1 + $0x1c0] sm:$0xff]   ;;  %598 = vmatprep.mubr.bf16.mxu0 %v733_v35 }
   0xd   :  { %831 = vmatpush3.bf16.msra.mxu1 %v903_v11  ;;  %810 = vmatprep.subr.bf16.mxu0 %v904_v12  ;;  %v930_v40 = vld [vmem:[%s1194_s1 + $0x100] sm:$0xff]   ;;  %v932_v42 = vld [vmem:[%s1194_s1 + $0x148] sm:$0xff]   ;;  %v936_v46 = vld [vmem:[%s1194_s1 + $0x150] sm:$0xff]  }
   0xe   :  { %832 = vmatprep.subr.bf16.mxu1 %v905_v13  ;;  %638 = vmatprep.mubr.bf16.mxu1 %v735_v37  ;;  %v931_v41 = vld [vmem:[%s1194_s1 + $0x180] sm:$0xff]   ;;  %v933_v43 = vld [vmem:[%s1194_s1 + $0x1c8] sm:$0xff]   ;;  %v937_v47 = vld [vmem:[%s1194_s1 + $0x1d0] sm:$0xff]  }
   0xf   :  { %v934_v44 = vld [vmem:[%s1194_s1 + $0x108] sm:$0xff]   ;;  %v938_v48 = vld [vmem:[%s1194_s1 + $0x110] sm:$0xff]   ;;  %v940_v50 = vld [vmem:[%s1194_s1 + $0x158] sm:$0xff]  }
  0x10   :  { %811 = vmatpush3.bf16.msra.mxu0 %v906_v14  ;;  %v935_v45 = vld [vmem:[%s1194_s1 + $0x188] sm:$0xff]   ;;  %v939_v49 = vld [vmem:[%s1194_s1 + $0x190] sm:$0xff]   ;;  %v941_v51 = vld [vmem:[%s1194_s1 + $0x1d8] sm:$0xff]  }
  0x11   :  { %833 = vmatpush3.bf16.msra.mxu1 %v907_v15  ;;  %812 = vmatprep.subr.bf16.mxu0 %v908_v16  ;;  %v942_v52 = vld [vmem:[%s1194_s1 + $0x118] sm:$0xff]   ;;  %v944_v54 = vld [vmem:[%s1194_s1 + $0x160] sm:$0xff]   ;;  %v948_v58 = vld [vmem:[%s1194_s1 + $0x168] sm:$0xff]  }
  0x12   :  { %834 = vmatprep.subr.bf16.mxu1 %v909_v17  ;;  %v943_v53 = vld [vmem:[%s1194_s1 + $0x198] sm:$0xff]   ;;  %v945_v55 = vld [vmem:[%s1194_s1 + $0x1e0] sm:$0xff]   ;;  %v949_v59 = vld [vmem:[%s1194_s1 + $0x1e8] sm:$0xff]  }
  0x13   :  { %v946_v56 = vld [vmem:[%s1194_s1 + $0x120] sm:$0xff]   ;;  %v950_v60 = vld [vmem:[%s1194_s1 + $0x128] sm:$0xff]   ;;  %v952_v62 = vld [vmem:[%s1194_s1 + $0x170] sm:$0xff]  }
  0x14   :  { %813 = vmatpush3.bf16.msra.mxu0 %v910_v18  ;;  %v947_v57 = vld [vmem:[%s1194_s1 + $0x1a0] sm:$0xff]   ;;  %v951_v61 = vld [vmem:[%s1194_s1 + $0x1a8] sm:$0xff]   ;;  %v953_v63 = vld [vmem:[%s1194_s1 + $0x1f0] sm:$0xff]  }
  0x15   :  { %835 = vmatpush3.bf16.msra.mxu1 %v911_v19  ;;  %814 = vmatprep.subr.bf16.mxu0 %v912_v20  ;;  %v954_v0 = vld [vmem:[%s1194_s1 + $0x130] sm:$0xff]   ;;  %v956_v2 = vld [vmem:[%s1194_s1 + $0x178] sm:$0xff]   ;;  %v731_v14 = vld [vmem:[%s1196_s2] ss:$0 sm:$0xff] }
  0x16   :  { %836 = vmatprep.subr.bf16.mxu1 %v913_v21  ;;  %v955_v1 = vld [vmem:[%s1194_s1 + $0x1b0] sm:$0xff]   ;;  %v957_v3 = vld [vmem:[%s1194_s1 + $0x1f8] sm:$0xff]  }
  0x17   :  { %v958_v4 = vld [vmem:[%s1194_s1 + $0x138] sm:$0xff]   ;;  %v17_v6 = vld [vmem:[%s1195_s0 + $0x10] sm:$0xff] }
  0x18   :  { %815 = vmatpush3.bf16.msra.mxu0 %v914_v22  ;;  %v959_v5 = vld [vmem:[%s1194_s1 + $0x1b8] sm:$0xff]   ;;  %v736_v7 = vcombine.low %v17_v6, %v17_v6  ;;  %v737_v8 = vcombine.high %v17_v6, %v17_v6 }
  0x19   :  { %837 = vmatpush3.bf16.msra.mxu1 %v915_v23  ;;  %816 = vmatprep.subr.bf16.mxu0 %v916_v24  ;;  %v18_v9 = vld [vmem:[%s1195_s0 + $0x18] sm:$0xff] }
  0x1a   :  { %838 = vmatprep.subr.bf16.mxu1 %v917_v25  ;;  %v738_v10 = vcombine.low %v18_v9, %v18_v9  ;;  %v739_v11 = vcombine.high %v18_v9, %v18_v9 }
  0x1c   :  { %817 = vmatpush3.bf16.msra.mxu0 %v918_v26 }
  0x1d   :  { %839 = vmatpush3.bf16.msra.mxu1 %v919_v27  ;;  %818 = vmatprep.subr.bf16.mxu0 %v920_v28 }
  0x1e   :  { %840 = vmatprep.subr.bf16.mxu1 %v921_v29 }
  0x20   :  { %819 = vmatpush3.bf16.msra.mxu0 %v922_v30 }
  0x21   :  { %841 = vmatpush3.bf16.msra.mxu1 %v923_v31  ;;  %848 = vmatprep.subr.bf16.mxu0 %v928_v38 }
  0x22   :  { %870 = vmatprep.subr.bf16.mxu1 %v929_v39 }
  0x23   :  { %599 = vmatmul.mubr.bf16.vlgmr.msra.gmra.mrb[0].mxu0 %v732_v34 }
  0x24   :  { %639 = vmatmul.mubr.bf16.vlgmr.msra.gmra.mrb[0].mxu1 %v734_v36  ;;  %849 = vmatpush3.bf16.msra.mxu0 %v930_v40 }
  0x25   :  { %871 = vmatpush3.bf16.msra.mxu1 %v931_v41  ;;  %850 = vmatprep.subr.bf16.mxu0 %v932_v42 }
  0x26   :  { %872 = vmatprep.subr.bf16.mxu1 %v933_v43  ;;  %678 = vmatprep.mubr.bf16.mxu0 %v737_v8 }
  0x27   :  { %718 = vmatprep.mubr.bf16.mxu1 %v739_v11 }
  0x28   :  { %851 = vmatpush3.bf16.msra.mxu0 %v934_v44 }
  0x29   :  { %873 = vmatpush3.bf16.msra.mxu1 %v935_v45  ;;  %852 = vmatprep.subr.bf16.mxu0 %v936_v46 }
  0x2a   :  { %874 = vmatprep.subr.bf16.mxu1 %v937_v47 }
  0x2c   :  { %853 = vmatpush3.bf16.msra.mxu0 %v938_v48 }
  0x2d   :  { %875 = vmatpush3.bf16.msra.mxu1 %v939_v49  ;;  %854 = vmatprep.subr.bf16.mxu0 %v940_v50 }
  0x2e   :  { %876 = vmatprep.subr.bf16.mxu1 %v941_v51 }
  0x30   :  { %855 = vmatpush3.bf16.msra.mxu0 %v942_v52 }
  0x31   :  { %877 = vmatpush3.bf16.msra.mxu1 %v943_v53  ;;  %856 = vmatprep.subr.bf16.mxu0 %v944_v54 }
  0x32   :  { %878 = vmatprep.subr.bf16.mxu1 %v945_v55 }
  0x34   :  { %857 = vmatpush3.bf16.msra.mxu0 %v946_v56 }
  0x35   :  { %879 = vmatpush3.bf16.msra.mxu1 %v947_v57  ;;  %858 = vmatprep.subr.bf16.mxu0 %v948_v58 }
  0x36   :  { %880 = vmatprep.subr.bf16.mxu1 %v949_v59 }
  0x38   :  { %859 = vmatpush3.bf16.msra.mxu0 %v950_v60 }
  0x39   :  { %881 = vmatpush3.bf16.msra.mxu1 %v951_v61  ;;  %860 = vmatprep.subr.bf16.mxu0 %v952_v62 }
  0x3a   :  { %882 = vmatprep.subr.bf16.mxu1 %v953_v63 }
  0x3c   :  { %861 = vmatpush3.bf16.msra.mxu0 %v954_v0 }
  0x3d   :  { %883 = vmatpush3.bf16.msra.mxu1 %v955_v1  ;;  %862 = vmatprep.subr.bf16.mxu0 %v956_v2 }
  0x3e   :  { %884 = vmatprep.subr.bf16.mxu1 %v957_v3 }
  0x40   :  { %863 = vmatpush3.bf16.msra.mxu0 %v958_v4 }
  0x41   :  { %885 = vmatpush3.bf16.msra.mxu1 %v959_v5 }
  0x43   :  { %679 = vmatmul.mubr.bf16.vlgmr.msra.gmra.mrb[4].mxu0 %v736_v7 }
  0x44   :  { %719 = vmatmul.mubr.bf16.vlgmr.msra.gmra.mrb[4].mxu1 %v738_v10 }
  0xf6   :  { %v820_v12 = vpop.f32.mrb[0].mxu0 }
  0xf7   :  { %v842_v13 = vpop.f32.mrb[0].mxu1  ;;  %v821_v15 = vpop.f32.mrb[1].mxu0 }
  0xf8   :  { %v843_v16 = vpop.f32.mrb[1].mxu1  ;;  %v822_v17 = vadd.f32 %v821_v15, %v820_v12  ;;  %v823_v19 = vpop.f32.mrb[2].mxu0 }
  0xf9   :  { %v844_v18 = vadd.f32 %v843_v16, %v842_v13  ;;  %v845_v20 = vpop.f32.mrb[2].mxu1  ;;  %v824_v21 = vpop.f32.mrb[3].mxu0 }
  0xfa   :  { %v846_v22 = vpop.f32.mrb[3].mxu1  ;;  %v601_v23 = vadd.f32 %v822_v17, %v731_v14 }
  0xfc   :  { %v641_v24 = vadd.f32 %v844_v18, %v601_v23 }
 0x116   :  { %v864_v25 = vpop.f32.mrb[4].mxu0 }
 0x117   :  { %v886_v26 = vpop.f32.mrb[4].mxu1  ;;  %v865_v27 = vpop.f32.mrb[5].mxu0 }
 0x118   :  { %v887_v28 = vpop.f32.mrb[5].mxu1  ;;  %v866_v29 = vadd.f32 %v865_v27, %v864_v25  ;;  %v867_v31 = vpop.f32.mrb[6].mxu0 }
 0x119   :  { %v888_v30 = vadd.f32 %v887_v28, %v886_v26  ;;  %v889_v32 = vpop.f32.mrb[6].mxu1  ;;  %v868_v33 = vpop.f32.mrb[7].mxu0 }
 0x11a   :  { %v890_v34 = vpop.f32.mrb[7].mxu1  ;;  %v681_v35 = vadd.f32 %v866_v29, %v641_v24 }
 0x11c   :  { %v721_v36 = vadd.f32 %v888_v30, %v681_v35 }
 0x11e   :  { %726 = vst [vmem:[%s1197_s3] sm:$0xff] %v721_v36 }

</bundles_post_ra>
